<compile_context>
chip_gen: v6e
topology: v6e:2x2x1
jax: 0.10.0
libtpu: 0.0.40
codegen_flags: <defaults>
</compile_context>

<pallas_src>
import jax
import jax.numpy as jnp
from jax import lax
from jax.experimental import pallas as pl
from jax.experimental.pallas import tpu as pltpu


def _round_up(x: int, m: int) -> int:
    return ((x + m - 1) // m) * m


def _pick_block_b(batch: int, t_pad: int, target_rows: int = 256) -> int:
    """Largest divisor of `batch` with block_b*t_pad <= target_rows that still
    leaves >= 2 grid blocks (so the 'parallel' axis can use both v7x TCs)."""
    best = 1
    for cand in range(1, batch + 1):
        if batch % cand != 0:
            continue
        if cand * t_pad > target_rows:
            continue
        if batch // cand < 2 and batch != 1:
            continue
        best = cand
    # TODO(synk): for batch == 1 on v7x, split the grid along time (with a
    # sum-of-dilations halo) so both TensorCores are used.
    return best


# ----------------------------------------------------------------------------
# Fused multi-stage kernel (per batch-block grid step).
# ----------------------------------------------------------------------------
def make_fused_kernel(*, n_stages, n_layers, c_out, t_valid, t_pad, block_b,
                      hidden, c_in_pad, c_out_pad, halo):
    m_rows = block_b * t_pad

    def kernel(x_ref, mask_ref, w_in0_ref, w_in_r_ref, b_in_ref,
               wd_ref, bd_ref, w1_ref, b1_ref, w_out_ref, b_out_ref,
               out_ref, h_scr):
        # Halo rows of the tap scratch are never selected (tap predicates zero
        # them), but keep them zeroed for hygiene (tiny aligned stores).
        zeros_halo = jnp.zeros((halo, hidden), jnp.bfloat16)
        h_scr[0:halo, :] = zeros_halo
        h_scr[halo + m_rows:halo + m_rows + halo, :] = zeros_halo

        # Fold batch into the matmul M dimension: (Bb, T, C) -> (Bb*T, C).
        x = x_ref[...].reshape(m_rows, c_in_pad)
        mask = mask_ref[...].reshape(m_rows, 1).astype(jnp.float32)

        # Hoisted broadcasts (JAX does not CSE broadcast_in_dim).
        mask_h = jnp.broadcast_to(mask, (m_rows, hidden))
        mask_c = jnp.broadcast_to(mask, (m_rows, c_out_pad))

        # Per-sequence time index (M,1); tap-validity predicates are derived
        # from it per layer (cheap (M,1) compares, not 2*L full-size masks).
        t_idx = lax.broadcasted_iota(jnp.int32, (m_rows, 1), 0) % t_pad

        # Valid-channel mask for the inter-stage channel softmax.
        c_valid = lax.broadcasted_iota(jnp.int32, (m_rows, c_out_pad), 1) < c_out

        def mm(a, w):  # bf16 MXU operands, f32 accumulation
            return jnp.dot(a.astype(jnp.bfloat16), w,
                           preferred_element_type=jnp.float32)

        def layer_step(s, li, h):
            # Dilated conv k=3, dilation d, padding d: taps at t-d, t, t+d.
            d = 1 << li
            h_bf = h.astype(jnp.bfloat16)
            # Store the bf16 center into the halo-padded scratch, then read the
            # left/right taps as shifted sublane slices (vld slots) instead of
            # pltpu.roll (XLU) + jnp.concatenate ((M,3H) materialization).
            h_scr[halo:halo + m_rows, :] = h_bf
            left = h_scr[pl.ds(halo - d, m_rows), :]
            right = h_scr[pl.ds(halo + d, m_rows), :]
            # Zero taps that cross a sequence boundary (matches Conv1d zero pad;
            # also prevents leakage between sequences folded into the block and
            # masks any halo contents).
            left = jnp.where(t_idx >= d, left, 0)
            right = jnp.where(t_idx < t_valid - d, right, 0)
            acc = (jnp.dot(left, wd_ref[s, li, 0], preferred_element_type=jnp.float32)
                   + jnp.dot(h_bf, wd_ref[s, li, 1], preferred_element_type=jnp.float32)
                   + jnp.dot(right, wd_ref[s, li, 2], preferred_element_type=jnp.float32)
                   + bd_ref[s, li])
            acc = jnp.maximum(acc, 0.0)                    # ReLU
            acc = mm(acc, w1_ref[s, li]) + b1_ref[s, li]   # 1x1 conv
            # TODO(synk): nn.Dropout is identity in eval mode; training-mode
            # dropout is not implemented.
            return (h + acc) * mask_h                      # residual + mask

        prev = None
        for s in range(n_stages):                          # n_stages is tiny
            if s == 0:
                h = mm(x, w_in0_ref[...]) + b_in_ref[0]    # (M, H) f32
            else:
                # torch: out.softmax(dim=1) * mask over the true c_out channels
                # (padded lanes excluded via c_valid).
                zm = jnp.where(c_valid, prev, -jnp.inf)
                e = jnp.exp(zm - jnp.max(zm, axis=-1, keepdims=True))
                cur = (e / jnp.sum(e, axis=-1, keepdims=True)) * mask_c
                h = mm(cur, w_in_r_ref[s - 1]) + b_in_ref[s]

            if n_layers >= 4:
                # fori_loop bounds vreg live ranges / compile time for deep TCNs.
                h = lax.fori_loop(0, n_layers,
                                  lambda li, hh: layer_step(s, li, hh), h)
            else:
                for li in range(n_layers):
                    h = layer_step(s, li, h)

            # conv_out with lane-padded weights -> lane-dense (c_out_pad) store.
            out = (mm(h, w_out_ref[s]) + b_out_ref[s]) * mask_c
            out_ref[s] = out.reshape(block_b, t_pad, c_out_pad).astype(out_ref.dtype)
            prev = out

    return kernel


# ----------------------------------------------------------------------------
# Wrapper: pad / reshape / stack parameters once, single pallas_call.
# ----------------------------------------------------------------------------
def _prepare_params(stage_params, c_in_pad, c_out_pad):
    p0 = stage_params[0]
    c_in, hidden = p0["w_in"].shape
    c_out = p0["w_out"].shape[1]
    n_stages = len(stage_params)
    bf16, f32 = jnp.bfloat16, jnp.float32

    w_in0 = jnp.pad(p0["w_in"], ((0, c_in_pad - c_in), (0, 0))).astype(bf16)
    if n_stages > 1:
        w_in_rest = jnp.stack(
            [jnp.pad(p["w_in"], ((0, c_out_pad - p["w_in"].shape[0]), (0, 0)))
             for p in stage_params[1:]]).astype(bf16)
    else:
        w_in_rest = jnp.zeros((1, c_out_pad, hidden), bf16)   # unused dummy

    stack = lambda name: jnp.stack([p[name] for p in stage_params])
    return dict(
        w_in0=w_in0,
        w_in_rest=w_in_rest,
        b_in=stack("b_in").astype(f32),                    # (S, 1, H)
        wd=stack("wd").astype(bf16),                       # (S, L, 3, H, H)
        bd=stack("bd").astype(f32),                        # (S, L, 1, H)
        w1=stack("w1").astype(bf16),                       # (S, L, H, H)
        b1=stack("b1").astype(f32),                        # (S, L, 1, H)
        w_out=jnp.stack([jnp.pad(p["w_out"], ((0, 0), (0, c_out_pad - c_out)))
                         for p in stage_params]).astype(bf16),   # (S, H, Cp)
        b_out=jnp.stack([jnp.pad(p["b_out"], ((0, 0), (0, c_out_pad - c_out)))
                         for p in stage_params]).astype(f32),    # (S, 1, Cp)
    )


def _full_spec(arr):
    # Whole-array block, constant across the grid.
    # TODO(synk): pipeline_mode=pl.Buffered(1) would drop the second VMEM
    # buffer for these constant weights (worth it under v7x's 64 MiB VMEM).
    zeros = (0,) * arr.ndim
    return pl.BlockSpec(arr.shape, lambda b: zeros)


def multi_stage_tcn(x_nct, mask_n1t, stage_params, block_b=None):
    """x_nct: (B, C_in, T); mask_n1t: (B, 1, T). Returns (n_stages, B, C_out, T)."""
    batch, c_in, t_valid = x_nct.shape
    n_stages = len(stage_params)
    hidden = stage_params[0]["w_in"].shape[1]
    c_out = stage_params[0]["w_out"].shape[1]
    n_layers = stage_params[0]["wd"].shape[0]

    # Decoupled channel padding: big input features only widen the stage-0
    # conv_in operand; everything downstream is c_out_pad lanes wide.
    c_in_pad = _round_up(c_in, 128)
    c_out_pad = _round_up(c_out, 128)
    t_pad = _round_up(t_valid, 8)      # keep (bb,T,C)<->(bb*T,C) reshapes no-op

    x_btc = jnp.transpose(x_nct, (0, 2, 1))                        # (B, T, C_in)
    x_btc = jnp.pad(x_btc, ((0, 0), (0, t_pad - t_valid), (0, c_in_pad - c_in)))
    mask_bt1 = jnp.transpose(mask_n1t, (0, 2, 1)).astype(jnp.float32)
    mask_bt1 = jnp.pad(mask_bt1, ((0, 0), (0, t_pad - t_valid), (0, 0)))

    p = _prepare_params(stage_params, c_in_pad, c_out_pad)

    if block_b is None:
        block_b = _pick_block_b(batch, t_pad)
    assert batch % block_b == 0
    nb = batch // block_b
    m_rows = block_b * t_pad
    halo = _round_up(2 ** (n_layers - 1), 8)   # max dilation, sublane-aligned

    kernel = make_fused_kernel(
        n_stages=n_stages, n_layers=n_layers, c_out=c_out, t_valid=t_valid,
        t_pad=t_pad, block_b=block_b, hidden=hidden,
        c_in_pad=c_in_pad, c_out_pad=c_out_pad, halo=halo)

    # Explicit VMEM budget: double-buffered x/mask/out blocks + weights +
    # tap scratch + working-set slack (clamped to 64 MiB = v7x physical; on
    # v5e/v6e this also lifts the 16/32 MiB scoped default when needed).
    w_bytes = sum(v.size * v.dtype.itemsize for v in p.values())
    est = (2 * (m_rows * c_in_pad * 4 + m_rows * 4
                + n_stages * m_rows * c_out_pad * 4 + w_bytes)
           + (m_rows + 2 * halo) * hidden * 2
           + m_rows * (c_in_pad + 2 * c_out_pad + 8 * hidden) * 4)
    vmem_limit = int(min(max(est, 32 << 20), 64 << 20))

    out = pl.pallas_call(
        kernel,
        out_shape=jax.ShapeDtypeStruct((n_stages, batch, t_pad, c_out_pad),
                                       x_nct.dtype),
        grid=(nb,),
        in_specs=[
            pl.BlockSpec((block_b, t_pad, c_in_pad), lambda b: (b, 0, 0)),  # x
            pl.BlockSpec((block_b, t_pad, 1), lambda b: (b, 0, 0)),         # mask
            _full_spec(p["w_in0"]), _full_spec(p["w_in_rest"]),
            _full_spec(p["b_in"]), _full_spec(p["wd"]), _full_spec(p["bd"]),
            _full_spec(p["w1"]), _full_spec(p["b1"]),
            _full_spec(p["w_out"]), _full_spec(p["b_out"]),
        ],
        out_specs=pl.BlockSpec((n_stages, block_b, t_pad, c_out_pad),
                               lambda b: (0, b, 0, 0)),
        scratch_shapes=[pltpu.VMEM((m_rows + 2 * halo, hidden), jnp.bfloat16)],
        compiler_params=pltpu.CompilerParams(
            dimension_semantics=("parallel",),
            vmem_limit_bytes=vmem_limit),
    )(x_btc, mask_bt1, p["w_in0"], p["w_in_rest"], p["b_in"], p["wd"], p["bd"],
      p["w1"], p["b1"], p["w_out"], p["b_out"])

    out = out[:, :, :t_valid, :c_out]               # drop time/lane padding
    return jnp.transpose(out, (0, 1, 3, 2))         # (S, B, C_out, T)


# ----------------------------------------------------------------------------
# Pure-JAX reference (independent shift-via-padding implementation; matmul
# operands cast to bf16 to match the kernel's MXU precision).
# ----------------------------------------------------------------------------
def _ref_mm(a, w):
    return jnp.dot(a.astype(jnp.bfloat16), w.astype(jnp.bfloat16),
                   preferred_element_type=jnp.float32)


def ref_stage(x_btc, mask_bt1, p, apply_input_softmax):
    x = x_btc.astype(jnp.float32)
    mask = mask_bt1.astype(jnp.float32)
    if apply_input_softmax:
        x = jax.nn.softmax(x, axis=-1) * mask
    h = _ref_mm(x, p["w_in"]) + p["b_in"]
    seq_len = h.shape[1]
    for li in range(p["wd"].shape[0]):
        d = 2 ** li
        padh = jnp.pad(h, ((0, 0), (d, d), (0, 0)))
        acc = (_ref_mm(padh[:, 0:seq_len], p["wd"][li, 0])
               + _ref_mm(padh[:, d:d + seq_len], p["wd"][li, 1])
               + _ref_mm(padh[:, 2 * d:2 * d + seq_len], p["wd"][li, 2])
               + p["bd"][li])
        acc = jnp.maximum(acc, 0.0)
        acc = _ref_mm(acc, p["w1"][li]) + p["b1"][li]
        h = (h + acc) * mask
    out = _ref_mm(h, p["w_out"]) + p["b_out"]
    return (out * mask).astype(x_btc.dtype)


def ref_multi_stage(x_nct, mask_n1t, stage_params):
    x_btc = jnp.transpose(x_nct, (0, 2, 1))
    mask_bt1 = jnp.transpose(mask_n1t, (0, 2, 1))
    out = ref_stage(x_btc, mask_bt1, stage_params[0], False)
    outs = [out]
    for p in stage_params[1:]:
        out = ref_stage(out, mask_bt1, p, True)
        outs.append(out)
    return jnp.transpose(jnp.stack(outs), (0, 1, 3, 2))


# ----------------------------------------------------------------------------
# Deterministic parameter init (channel-last weight layout).
# ----------------------------------------------------------------------------
def init_stage_params(key, c_in, hidden, c_out, n_layers, scale=0.1):
    ks = jax.random.split(key, 8)
    f32 = jnp.float32
    return dict(
        w_in=jax.random.normal(ks[0], (c_in, hidden), f32) * scale,
        b_in=jax.random.normal(ks[1], (1, hidden), f32) * scale,
        wd=jax.random.normal(ks[2], (n_layers, 3, hidden, hidden), f32) * scale,
        bd=jax.random.normal(ks[3], (n_layers, 1, hidden), f32) * scale,
        w1=jax.random.normal(ks[4], (n_layers, hidden, hidden), f32) * scale,
        b1=jax.random.normal(ks[5], (n_layers, 1, hidden), f32) * scale,
        w_out=jax.random.normal(ks[6], (hidden, c_out), f32) * scale,
        b_out=jax.random.normal(ks[7], (1, c_out), f32) * scale,
    )


if __name__ == "__main__":
    def run_case(case_key, batch, c_in, hidden, c_out, t, n_stages, n_layers,
                 lengths):
        k_x, k_p = jax.random.split(case_key)
        x = jax.random.normal(k_x, (batch, c_in, t), jnp.float32)     # NCT
        mask = (jnp.arange(t)[None, None, :]
                < jnp.asarray(lengths, jnp.int32)[:, None, None]).astype(jnp.float32)
        stage_keys = jax.random.split(k_p, n_stages)
        params = [init_stage_params(stage_keys[0], c_in, hidden, c_out, n_layers)]
        for s in range(1, n_stages):
            params.append(init_stage_params(stage_keys[s], c_out, hidden, c_out,
                                            n_layers))
        out = jax.block_until_ready(multi_stage_tcn(x, mask, params))
        ref = ref_multi_stage(x, mask, params)
        assert out.shape == (n_stages, batch, c_out, t), out.shape
        err = float(jnp.max(jnp.abs(out - ref)))
        assert jnp.allclose(out, ref, rtol=2e-3, atol=2e-3), err

    key = jax.random.PRNGKey(0)
    k1, k2 = jax.random.split(key)

    # Small MS-TCN: unrolled layer path, 2 grid blocks (one sequence each).
    run_case(k1, batch=2, c_in=4, hidden=32, c_out=4, t=16,
             n_stages=3, n_layers=3, lengths=[16, 11])

    # Deeper TCN: fori_loop layer path, T padded 15->16, two sequences folded
    # into each grid block (exercises per-sequence tap masks + time padding).
    run_case(k2, batch=4, c_in=6, hidden=32, c_out=5, t=15,
             n_stages=2, n_layers=5, lengths=[15, 9, 12, 15])

    print("KERNEL_OK")
</pallas_src>

<mosaic_0001>
module attributes {stable_mosaic.version = 11 : i64} {
  func.func @kernel(%arg0: i32, %arg1: memref<1x16x128xf32, #tpu.memory_space<vmem>>, %arg2: memref<1x16x1xf32, #tpu.memory_space<vmem>>, %arg3: memref<128x32xbf16, #tpu.memory_space<vmem>>, %arg4: memref<2x128x32xbf16, #tpu.memory_space<vmem>>, %arg5: memref<3x1x32xf32, #tpu.memory_space<vmem>>, %arg6: memref<3x3x3x32x32xbf16, #tpu.memory_space<vmem>>, %arg7: memref<3x3x1x32xf32, #tpu.memory_space<vmem>>, %arg8: memref<3x3x32x32xbf16, #tpu.memory_space<vmem>>, %arg9: memref<3x3x1x32xf32, #tpu.memory_space<vmem>>, %arg10: memref<3x32x128xbf16, #tpu.memory_space<vmem>>, %arg11: memref<3x1x128xf32, #tpu.memory_space<vmem>>, %arg12: memref<3x1x16x128xf32, #tpu.memory_space<vmem>>, %arg13: memref<32x32xbf16, #tpu.memory_space<vmem>>) attributes {dimension_semantics = [#tpu.dimension_semantics<parallel>], iteration_bounds = array<i64: 2>, scalar_prefetch = 0 : i64, scratch_operands = 1 : i64, tpu.core_type = #tpu.core_type<tc>, window_params = [{transform_indices = @transform_0, window_bounds = array<i64: 1, 16, 128>}, {transform_indices = @transform_1, window_bounds = array<i64: 1, 16, 1>}, {pipeline_mode = #tpu.pipeline_mode<synchronous>, transform_indices = @transform_2, window_bounds = array<i64: 128, 32>}, {pipeline_mode = #tpu.pipeline_mode<synchronous>, transform_indices = @transform_3, window_bounds = array<i64: 2, 128, 32>}, {pipeline_mode = #tpu.pipeline_mode<synchronous>, transform_indices = @transform_4, window_bounds = array<i64: 3, 1, 32>}, {pipeline_mode = #tpu.pipeline_mode<synchronous>, transform_indices = @transform_5, window_bounds = array<i64: 3, 3, 3, 32, 32>}, {pipeline_mode = #tpu.pipeline_mode<synchronous>, transform_indices = @transform_6, window_bounds = array<i64: 3, 3, 1, 32>}, {pipeline_mode = #tpu.pipeline_mode<synchronous>, transform_indices = @transform_7, window_bounds = array<i64: 3, 3, 32, 32>}, {pipeline_mode = #tpu.pipeline_mode<synchronous>, transform_indices = @transform_8, window_bounds = array<i64: 3, 3, 1, 32>}, {pipeline_mode = #tpu.pipeline_mode<synchronous>, transform_indices = @transform_9, window_bounds = array<i64: 3, 32, 128>}, {pipeline_mode = #tpu.pipeline_mode<synchronous>, transform_indices = @transform_10, window_bounds = array<i64: 3, 1, 128>}, {transform_indices = @transform_11, window_bounds = array<i64: 3, 1, 16, 128>}]} {
    %cst = arith.constant 0.000000e+00 : bf16
    %0 = vector.broadcast %cst : bf16 to vector<8x32xbf16>
    %c0 = arith.constant 0 : index
    %c0_0 = arith.constant 0 : index
    %1 = vector.load %arg13[%c0, %c0_0] : memref<32x32xbf16, #tpu.memory_space<vmem>>, vector<8x32xbf16>
    tpu.vector_store %arg13[%c0, %c0_0], %0 {strides = array<i32>} : memref<32x32xbf16, #tpu.memory_space<vmem>>, vector<8x32xbf16>,
    %c24 = arith.constant 24 : index
    %c0_1 = arith.constant 0 : index
    %2 = vector.load %arg13[%c24, %c0_1] : memref<32x32xbf16, #tpu.memory_space<vmem>>, vector<8x32xbf16>
    tpu.vector_store %arg13[%c24, %c0_1], %0 {strides = array<i32>} : memref<32x32xbf16, #tpu.memory_space<vmem>>, vector<8x32xbf16>,
    %c0_2 = arith.constant 0 : index
    %c0_3 = arith.constant 0 : index
    %c0_4 = arith.constant 0 : index
    %3 = vector.load %arg1[%c0_2, %c0_3, %c0_4] : memref<1x16x128xf32, #tpu.memory_space<vmem>>, vector<1x16x128xf32>
    %4 = vector.shape_cast %3 : vector<1x16x128xf32> to vector<16x128xf32>
    %c0_5 = arith.constant 0 : index
    %c0_6 = arith.constant 0 : index
    %c0_7 = arith.constant 0 : index
    %5 = vector.load %arg2[%c0_5, %c0_6, %c0_7] : memref<1x16x1xf32, #tpu.memory_space<vmem>>, vector<1x16x1xf32>
    %6 = vector.shape_cast %5 : vector<1x16x1xf32> to vector<16x1xf32>
    %7 = vector.shape_cast %6 : vector<16x1xf32> to vector<16x1xf32>
    %8 = vector.broadcast %7 : vector<16x1xf32> to vector<16x32xf32>
    %9 = vector.shape_cast %6 : vector<16x1xf32> to vector<16x1xf32>
    %10 = vector.broadcast %9 : vector<16x1xf32> to vector<16x128xf32>
    %11 = tpu.iota {dimensions = array<i32: 0>} : vector<16x1xi32>
    %c16_i32 = arith.constant 16 : i32
    %c0_i32 = arith.constant 0 : i32
    %12 = arith.cmpi eq, %c16_i32, %c0_i32 : i32
    %c1_i32 = arith.constant 1 : i32
    %13 = arith.select %12, %c1_i32, %c16_i32 : i32
    %14 = vector.broadcast %13 : i32 to vector<16x1xi32>
    %15 = arith.remsi %11, %14 : vector<16x1xi32>
    %c0_i32_8 = arith.constant 0 : i32
    %16 = vector.broadcast %c0_i32_8 : i32 to vector<16x1xi32>
    %17 = arith.cmpi ne, %15, %16 : vector<16x1xi32>
    %c0_i32_9 = arith.constant 0 : i32
    %18 = vector.broadcast %c0_i32_9 : i32 to vector<16x1xi32>
    %19 = arith.cmpi slt, %15, %18 : vector<16x1xi32>
    %c0_i32_10 = arith.constant 0 : i32
    %20 = arith.cmpi slt, %13, %c0_i32_10 : i32
    %21 = vector.broadcast %20 : i1 to vector<16x1xi1>
    %22 = vector.broadcast %21 : vector<16x1xi1> to vector<16x1xi1>
    %23 = arith.xori %19, %22 : vector<16x1xi1>
    %24 = arith.andi %23, %17 : vector<16x1xi1>
    %25 = vector.broadcast %13 : i32 to vector<16x1xi32>
    %26 = arith.addi %15, %25 : vector<16x1xi32>
    %27 = arith.select %24, %26, %15 : vector<16x1xi1>, vector<16x1xi32>
    %28 = tpu.iota {dimensions = array<i32: 1>} : vector<16x128xi32>
    %c4_i32 = arith.constant 4 : i32
    %29 = vector.broadcast %c4_i32 : i32 to vector<16x128xi32>
    %30 = arith.cmpi slt, %28, %29 : vector<16x128xi32>
    %c0_11 = arith.constant 0 : index
    %c0_12 = arith.constant 0 : index
    %31 = vector.load %arg3[%c0_11, %c0_12] : memref<128x32xbf16, #tpu.memory_space<vmem>>, vector<128x32xbf16>
    %32 = arith.truncf %4 : vector<16x128xf32> to vector<16x128xbf16>
    %cst_13 = arith.constant dense<0.000000e+00> : vector<16x32xf32>
    %33 = tpu.matmul %32, %31, %cst_13 {dimension_numbers = #tpu.dot_dimension_numbers<[1], [0], [0], [1], [0, 0, 1, 1], [], []>} : vector<16x128xbf16>, vector<128x32xbf16>, vector<16x32xf32> -> vector<16x32xf32>
    %c0_14 = arith.constant 0 : index
    %c0_15 = arith.constant 0 : index
    %c0_16 = arith.constant 0 : index
    %34 = vector.load %arg5[%c0_14, %c0_15, %c0_16] : memref<3x1x32xf32, #tpu.memory_space<vmem>>, vector<1x1x32xf32>
    %35 = vector.shape_cast %34 : vector<1x1x32xf32> to vector<1x32xf32>
    %36 = vector.broadcast %35 : vector<1x32xf32> to vector<16x32xf32>
    %37 = arith.addf %33, %36 : vector<16x32xf32>
    %38 = arith.truncf %37 : vector<16x32xf32> to vector<16x32xbf16>
    %c8 = arith.constant 8 : index
    %c0_17 = arith.constant 0 : index
    %39 = vector.load %arg13[%c8, %c0_17] : memref<32x32xbf16, #tpu.memory_space<vmem>>, vector<16x32xbf16>
    tpu.vector_store %arg13[%c8, %c0_17], %38 {strides = array<i32>} : memref<32x32xbf16, #tpu.memory_space<vmem>>, vector<16x32xbf16>,
    %c7 = arith.constant 7 : index
    %c0_18 = arith.constant 0 : index
    %40 = vector.load %arg13[%c7, %c0_18] : memref<32x32xbf16, #tpu.memory_space<vmem>>, vector<16x32xbf16>
    %c9 = arith.constant 9 : index
    %c0_19 = arith.constant 0 : index
    %41 = vector.load %arg13[%c9, %c0_19] : memref<32x32xbf16, #tpu.memory_space<vmem>>, vector<16x32xbf16>
    %c1_i32_20 = arith.constant 1 : i32
    %42 = vector.broadcast %c1_i32_20 : i32 to vector<16x1xi32>
    %43 = arith.cmpi sge, %27, %42 : vector<16x1xi32>
    %c0_i32_21 = arith.constant 0 : i32
    %44 = arith.sitofp %c0_i32_21 : i32 to bf16
    %45 = vector.shape_cast %43 : vector<16x1xi1> to vector<16x1xi1>
    %46 = vector.broadcast %45 : vector<16x1xi1> to vector<16x32xi1>
    %47 = vector.broadcast %44 : bf16 to vector<16x32xbf16>
    %48 = arith.select %46, %40, %47 : vector<16x32xi1>, vector<16x32xbf16>
    %c15_i32 = arith.constant 15 : i32
    %49 = vector.broadcast %c15_i32 : i32 to vector<16x1xi32>
    %50 = arith.cmpi slt, %27, %49 : vector<16x1xi32>
    %c0_i32_22 = arith.constant 0 : i32
    %51 = arith.sitofp %c0_i32_22 : i32 to bf16
    %52 = vector.shape_cast %50 : vector<16x1xi1> to vector<16x1xi1>
    %53 = vector.broadcast %52 : vector<16x1xi1> to vector<16x32xi1>
    %54 = vector.broadcast %51 : bf16 to vector<16x32xbf16>
    %55 = arith.select %53, %41, %54 : vector<16x32xi1>, vector<16x32xbf16>
    %c0_23 = arith.constant 0 : index
    %c0_24 = arith.constant 0 : index
    %c0_25 = arith.constant 0 : index
    %c0_26 = arith.constant 0 : index
    %c0_27 = arith.constant 0 : index
    %56 = vector.load %arg6[%c0_23, %c0_24, %c0_25, %c0_26, %c0_27] : memref<3x3x3x32x32xbf16, #tpu.memory_space<vmem>>, vector<1x1x1x32x32xbf16>
    %57 = vector.shape_cast %56 : vector<1x1x1x32x32xbf16> to vector<32x32xbf16>
    %cst_28 = arith.constant dense<0.000000e+00> : vector<16x32xf32>
    %58 = tpu.matmul %48, %57, %cst_28 {dimension_numbers = #tpu.dot_dimension_numbers<[1], [0], [0], [1], [0, 0, 1, 1], [], []>} : vector<16x32xbf16>, vector<32x32xbf16>, vector<16x32xf32> -> vector<16x32xf32>
    %c0_29 = arith.constant 0 : index
    %c0_30 = arith.constant 0 : index
    %c1 = arith.constant 1 : index
    %c0_31 = arith.constant 0 : index
    %c0_32 = arith.constant 0 : index
    %59 = vector.load %arg6[%c0_29, %c0_30, %c1, %c0_31, %c0_32] : memref<3x3x3x32x32xbf16, #tpu.memory_space<vmem>>, vector<1x1x1x32x32xbf16>
    %60 = vector.shape_cast %59 : vector<1x1x1x32x32xbf16> to vector<32x32xbf16>
    %cst_33 = arith.constant dense<0.000000e+00> : vector<16x32xf32>
    %61 = tpu.matmul %38, %60, %cst_33 {dimension_numbers = #tpu.dot_dimension_numbers<[1], [0], [0], [1], [0, 0, 1, 1], [], []>} : vector<16x32xbf16>, vector<32x32xbf16>, vector<16x32xf32> -> vector<16x32xf32>
    %62 = arith.addf %58, %61 : vector<16x32xf32>
    %c0_34 = arith.constant 0 : index
    %c0_35 = arith.constant 0 : index
    %c2 = arith.constant 2 : index
    %c0_36 = arith.constant 0 : index
    %c0_37 = arith.constant 0 : index
    %63 = vector.load %arg6[%c0_34, %c0_35, %c2, %c0_36, %c0_37] : memref<3x3x3x32x32xbf16, #tpu.memory_space<vmem>>, vector<1x1x1x32x32xbf16>
    %64 = vector.shape_cast %63 : vector<1x1x1x32x32xbf16> to vector<32x32xbf16>
    %cst_38 = arith.constant dense<0.000000e+00> : vector<16x32xf32>
    %65 = tpu.matmul %55, %64, %cst_38 {dimension_numbers = #tpu.dot_dimension_numbers<[1], [0], [0], [1], [0, 0, 1, 1], [], []>} : vector<16x32xbf16>, vector<32x32xbf16>, vector<16x32xf32> -> vector<16x32xf32>
    %66 = arith.addf %62, %65 : vector<16x32xf32>
    %c0_39 = arith.constant 0 : index
    %c0_40 = arith.constant 0 : index
    %c0_41 = arith.constant 0 : index
    %c0_42 = arith.constant 0 : index
    %67 = vector.load %arg7[%c0_39, %c0_40, %c0_41, %c0_42] : memref<3x3x1x32xf32, #tpu.memory_space<vmem>>, vector<1x1x1x32xf32>
    %68 = vector.shape_cast %67 : vector<1x1x1x32xf32> to vector<1x32xf32>
    %69 = vector.broadcast %68 : vector<1x32xf32> to vector<16x32xf32>
    %70 = arith.addf %66, %69 : vector<16x32xf32>
    %cst_43 = arith.constant 0.000000e+00 : f32
    %71 = vector.broadcast %cst_43 : f32 to vector<16x32xf32>
    %72 = arith.maximumf %70, %71 : vector<16x32xf32>
    %c0_44 = arith.constant 0 : index
    %c0_45 = arith.constant 0 : index
    %c0_46 = arith.constant 0 : index
    %c0_47 = arith.constant 0 : index
    %73 = vector.load %arg8[%c0_44, %c0_45, %c0_46, %c0_47] : memref<3x3x32x32xbf16, #tpu.memory_space<vmem>>, vector<1x1x32x32xbf16>
    %74 = vector.shape_cast %73 : vector<1x1x32x32xbf16> to vector<32x32xbf16>
    %75 = arith.truncf %72 : vector<16x32xf32> to vector<16x32xbf16>
    %cst_48 = arith.constant dense<0.000000e+00> : vector<16x32xf32>
    %76 = tpu.matmul %75, %74, %cst_48 {dimension_numbers = #tpu.dot_dimension_numbers<[1], [0], [0], [1], [0, 0, 1, 1], [], []>} : vector<16x32xbf16>, vector<32x32xbf16>, vector<16x32xf32> -> vector<16x32xf32>
    %c0_49 = arith.constant 0 : index
    %c0_50 = arith.constant 0 : index
    %c0_51 = arith.constant 0 : index
    %c0_52 = arith.constant 0 : index
    %77 = vector.load %arg9[%c0_49, %c0_50, %c0_51, %c0_52] : memref<3x3x1x32xf32, #tpu.memory_space<vmem>>, vector<1x1x1x32xf32>
    %78 = vector.shape_cast %77 : vector<1x1x1x32xf32> to vector<1x32xf32>
    %79 = vector.broadcast %78 : vector<1x32xf32> to vector<16x32xf32>
    %80 = arith.addf %76, %79 : vector<16x32xf32>
    %81 = arith.addf %37, %80 : vector<16x32xf32>
    %82 = arith.mulf %81, %8 : vector<16x32xf32>
    %83 = arith.truncf %82 : vector<16x32xf32> to vector<16x32xbf16>
    %c8_53 = arith.constant 8 : index
    %c0_54 = arith.constant 0 : index
    %84 = vector.load %arg13[%c8_53, %c0_54] : memref<32x32xbf16, #tpu.memory_space<vmem>>, vector<16x32xbf16>
    tpu.vector_store %arg13[%c8_53, %c0_54], %83 {strides = array<i32>} : memref<32x32xbf16, #tpu.memory_space<vmem>>, vector<16x32xbf16>,
    %c6 = arith.constant 6 : index
    %c0_55 = arith.constant 0 : index
    %85 = vector.load %arg13[%c6, %c0_55] : memref<32x32xbf16, #tpu.memory_space<vmem>>, vector<16x32xbf16>
    %c10 = arith.constant 10 : index
    %c0_56 = arith.constant 0 : index
    %86 = vector.load %arg13[%c10, %c0_56] : memref<32x32xbf16, #tpu.memory_space<vmem>>, vector<16x32xbf16>
    %c2_i32 = arith.constant 2 : i32
    %87 = vector.broadcast %c2_i32 : i32 to vector<16x1xi32>
    %88 = arith.cmpi sge, %27, %87 : vector<16x1xi32>
    %c0_i32_57 = arith.constant 0 : i32
    %89 = arith.sitofp %c0_i32_57 : i32 to bf16
    %90 = vector.shape_cast %88 : vector<16x1xi1> to vector<16x1xi1>
    %91 = vector.broadcast %90 : vector<16x1xi1> to vector<16x32xi1>
    %92 = vector.broadcast %89 : bf16 to vector<16x32xbf16>
    %93 = arith.select %91, %85, %92 : vector<16x32xi1>, vector<16x32xbf16>
    %c14_i32 = arith.constant 14 : i32
    %94 = vector.broadcast %c14_i32 : i32 to vector<16x1xi32>
    %95 = arith.cmpi slt, %27, %94 : vector<16x1xi32>
    %c0_i32_58 = arith.constant 0 : i32
    %96 = arith.sitofp %c0_i32_58 : i32 to bf16
    %97 = vector.shape_cast %95 : vector<16x1xi1> to vector<16x1xi1>
    %98 = vector.broadcast %97 : vector<16x1xi1> to vector<16x32xi1>
    %99 = vector.broadcast %96 : bf16 to vector<16x32xbf16>
    %100 = arith.select %98, %86, %99 : vector<16x32xi1>, vector<16x32xbf16>
    %c0_59 = arith.constant 0 : index
    %c1_60 = arith.constant 1 : index
    %c0_61 = arith.constant 0 : index
    %c0_62 = arith.constant 0 : index
    %c0_63 = arith.constant 0 : index
    %101 = vector.load %arg6[%c0_59, %c1_60, %c0_61, %c0_62, %c0_63] : memref<3x3x3x32x32xbf16, #tpu.memory_space<vmem>>, vector<1x1x1x32x32xbf16>
    %102 = vector.shape_cast %101 : vector<1x1x1x32x32xbf16> to vector<32x32xbf16>
    %cst_64 = arith.constant dense<0.000000e+00> : vector<16x32xf32>
    %103 = tpu.matmul %93, %102, %cst_64 {dimension_numbers = #tpu.dot_dimension_numbers<[1], [0], [0], [1], [0, 0, 1, 1], [], []>} : vector<16x32xbf16>, vector<32x32xbf16>, vector<16x32xf32> -> vector<16x32xf32>
    %c0_65 = arith.constant 0 : index
    %c1_66 = arith.constant 1 : index
    %c1_67 = arith.constant 1 : index
    %c0_68 = arith.constant 0 : index
    %c0_69 = arith.constant 0 : index
    %104 = vector.load %arg6[%c0_65, %c1_66, %c1_67, %c0_68, %c0_69] : memref<3x3x3x32x32xbf16, #tpu.memory_space<vmem>>, vector<1x1x1x32x32xbf16>
    %105 = vector.shape_cast %104 : vector<1x1x1x32x32xbf16> to vector<32x32xbf16>
    %cst_70 = arith.constant dense<0.000000e+00> : vector<16x32xf32>
    %106 = tpu.matmul %83, %105, %cst_70 {dimension_numbers = #tpu.dot_dimension_numbers<[1], [0], [0], [1], [0, 0, 1, 1], [], []>} : vector<16x32xbf16>, vector<32x32xbf16>, vector<16x32xf32> -> vector<16x32xf32>
    %107 = arith.addf %103, %106 : vector<16x32xf32>
    %c0_71 = arith.constant 0 : index
    %c1_72 = arith.constant 1 : index
    %c2_73 = arith.constant 2 : index
    %c0_74 = arith.constant 0 : index
    %c0_75 = arith.constant 0 : index
    %108 = vector.load %arg6[%c0_71, %c1_72, %c2_73, %c0_74, %c0_75] : memref<3x3x3x32x32xbf16, #tpu.memory_space<vmem>>, vector<1x1x1x32x32xbf16>
    %109 = vector.shape_cast %108 : vector<1x1x1x32x32xbf16> to vector<32x32xbf16>
    %cst_76 = arith.constant dense<0.000000e+00> : vector<16x32xf32>
    %110 = tpu.matmul %100, %109, %cst_76 {dimension_numbers = #tpu.dot_dimension_numbers<[1], [0], [0], [1], [0, 0, 1, 1], [], []>} : vector<16x32xbf16>, vector<32x32xbf16>, vector<16x32xf32> -> vector<16x32xf32>
    %111 = arith.addf %107, %110 : vector<16x32xf32>
    %c0_77 = arith.constant 0 : index
    %c1_78 = arith.constant 1 : index
    %c0_79 = arith.constant 0 : index
    %c0_80 = arith.constant 0 : index
    %112 = vector.load %arg7[%c0_77, %c1_78, %c0_79, %c0_80] : memref<3x3x1x32xf32, #tpu.memory_space<vmem>>, vector<1x1x1x32xf32>
    %113 = vector.shape_cast %112 : vector<1x1x1x32xf32> to vector<1x32xf32>
    %114 = vector.broadcast %113 : vector<1x32xf32> to vector<16x32xf32>
    %115 = arith.addf %111, %114 : vector<16x32xf32>
    %cst_81 = arith.constant 0.000000e+00 : f32
    %116 = vector.broadcast %cst_81 : f32 to vector<16x32xf32>
    %117 = arith.maximumf %115, %116 : vector<16x32xf32>
    %c0_82 = arith.constant 0 : index
    %c1_83 = arith.constant 1 : index
    %c0_84 = arith.constant 0 : index
    %c0_85 = arith.constant 0 : index
    %118 = vector.load %arg8[%c0_82, %c1_83, %c0_84, %c0_85] : memref<3x3x32x32xbf16, #tpu.memory_space<vmem>>, vector<1x1x32x32xbf16>
    %119 = vector.shape_cast %118 : vector<1x1x32x32xbf16> to vector<32x32xbf16>
    %120 = arith.truncf %117 : vector<16x32xf32> to vector<16x32xbf16>
    %cst_86 = arith.constant dense<0.000000e+00> : vector<16x32xf32>
    %121 = tpu.matmul %120, %119, %cst_86 {dimension_numbers = #tpu.dot_dimension_numbers<[1], [0], [0], [1], [0, 0, 1, 1], [], []>} : vector<16x32xbf16>, vector<32x32xbf16>, vector<16x32xf32> -> vector<16x32xf32>
    %c0_87 = arith.constant 0 : index
    %c1_88 = arith.constant 1 : index
    %c0_89 = arith.constant 0 : index
    %c0_90 = arith.constant 0 : index
    %122 = vector.load %arg9[%c0_87, %c1_88, %c0_89, %c0_90] : memref<3x3x1x32xf32, #tpu.memory_space<vmem>>, vector<1x1x1x32xf32>
    %123 = vector.shape_cast %122 : vector<1x1x1x32xf32> to vector<1x32xf32>
    %124 = vector.broadcast %123 : vector<1x32xf32> to vector<16x32xf32>
    %125 = arith.addf %121, %124 : vector<16x32xf32>
    %126 = arith.addf %82, %125 : vector<16x32xf32>
    %127 = arith.mulf %126, %8 : vector<16x32xf32>
    %128 = arith.truncf %127 : vector<16x32xf32> to vector<16x32xbf16>
    %c8_91 = arith.constant 8 : index
    %c0_92 = arith.constant 0 : index
    %129 = vector.load %arg13[%c8_91, %c0_92] : memref<32x32xbf16, #tpu.memory_space<vmem>>, vector<16x32xbf16>
    tpu.vector_store %arg13[%c8_91, %c0_92], %128 {strides = array<i32>} : memref<32x32xbf16, #tpu.memory_space<vmem>>, vector<16x32xbf16>,
    %c4 = arith.constant 4 : index
    %c0_93 = arith.constant 0 : index
    %130 = vector.load %arg13[%c4, %c0_93] : memref<32x32xbf16, #tpu.memory_space<vmem>>, vector<16x32xbf16>
    %c12 = arith.constant 12 : index
    %c0_94 = arith.constant 0 : index
    %131 = vector.load %arg13[%c12, %c0_94] : memref<32x32xbf16, #tpu.memory_space<vmem>>, vector<16x32xbf16>
    %c4_i32_95 = arith.constant 4 : i32
    %132 = vector.broadcast %c4_i32_95 : i32 to vector<16x1xi32>
    %133 = arith.cmpi sge, %27, %132 : vector<16x1xi32>
    %c0_i32_96 = arith.constant 0 : i32
    %134 = arith.sitofp %c0_i32_96 : i32 to bf16
    %135 = vector.shape_cast %133 : vector<16x1xi1> to vector<16x1xi1>
    %136 = vector.broadcast %135 : vector<16x1xi1> to vector<16x32xi1>
    %137 = vector.broadcast %134 : bf16 to vector<16x32xbf16>
    %138 = arith.select %136, %130, %137 : vector<16x32xi1>, vector<16x32xbf16>
    %c12_i32 = arith.constant 12 : i32
    %139 = vector.broadcast %c12_i32 : i32 to vector<16x1xi32>
    %140 = arith.cmpi slt, %27, %139 : vector<16x1xi32>
    %c0_i32_97 = arith.constant 0 : i32
    %141 = arith.sitofp %c0_i32_97 : i32 to bf16
    %142 = vector.shape_cast %140 : vector<16x1xi1> to vector<16x1xi1>
    %143 = vector.broadcast %142 : vector<16x1xi1> to vector<16x32xi1>
    %144 = vector.broadcast %141 : bf16 to vector<16x32xbf16>
    %145 = arith.select %143, %131, %144 : vector<16x32xi1>, vector<16x32xbf16>
    %c0_98 = arith.constant 0 : index
    %c2_99 = arith.constant 2 : index
    %c0_100 = arith.constant 0 : index
    %c0_101 = arith.constant 0 : index
    %c0_102 = arith.constant 0 : index
    %146 = vector.load %arg6[%c0_98, %c2_99, %c0_100, %c0_101, %c0_102] : memref<3x3x3x32x32xbf16, #tpu.memory_space<vmem>>, vector<1x1x1x32x32xbf16>
    %147 = vector.shape_cast %146 : vector<1x1x1x32x32xbf16> to vector<32x32xbf16>
    %cst_103 = arith.constant dense<0.000000e+00> : vector<16x32xf32>
    %148 = tpu.matmul %138, %147, %cst_103 {dimension_numbers = #tpu.dot_dimension_numbers<[1], [0], [0], [1], [0, 0, 1, 1], [], []>} : vector<16x32xbf16>, vector<32x32xbf16>, vector<16x32xf32> -> vector<16x32xf32>
    %c0_104 = arith.constant 0 : index
    %c2_105 = arith.constant 2 : index
    %c1_106 = arith.constant 1 : index
    %c0_107 = arith.constant 0 : index
    %c0_108 = arith.constant 0 : index
    %149 = vector.load %arg6[%c0_104, %c2_105, %c1_106, %c0_107, %c0_108] : memref<3x3x3x32x32xbf16, #tpu.memory_space<vmem>>, vector<1x1x1x32x32xbf16>
    %150 = vector.shape_cast %149 : vector<1x1x1x32x32xbf16> to vector<32x32xbf16>
    %cst_109 = arith.constant dense<0.000000e+00> : vector<16x32xf32>
    %151 = tpu.matmul %128, %150, %cst_109 {dimension_numbers = #tpu.dot_dimension_numbers<[1], [0], [0], [1], [0, 0, 1, 1], [], []>} : vector<16x32xbf16>, vector<32x32xbf16>, vector<16x32xf32> -> vector<16x32xf32>
    %152 = arith.addf %148, %151 : vector<16x32xf32>
    %c0_110 = arith.constant 0 : index
    %c2_111 = arith.constant 2 : index
    %c2_112 = arith.constant 2 : index
    %c0_113 = arith.constant 0 : index
    %c0_114 = arith.constant 0 : index
    %153 = vector.load %arg6[%c0_110, %c2_111, %c2_112, %c0_113, %c0_114] : memref<3x3x3x32x32xbf16, #tpu.memory_space<vmem>>, vector<1x1x1x32x32xbf16>
    %154 = vector.shape_cast %153 : vector<1x1x1x32x32xbf16> to vector<32x32xbf16>
    %cst_115 = arith.constant dense<0.000000e+00> : vector<16x32xf32>
    %155 = tpu.matmul %145, %154, %cst_115 {dimension_numbers = #tpu.dot_dimension_numbers<[1], [0], [0], [1], [0, 0, 1, 1], [], []>} : vector<16x32xbf16>, vector<32x32xbf16>, vector<16x32xf32> -> vector<16x32xf32>
    %156 = arith.addf %152, %155 : vector<16x32xf32>
    %c0_116 = arith.constant 0 : index
    %c2_117 = arith.constant 2 : index
    %c0_118 = arith.constant 0 : index
    %c0_119 = arith.constant 0 : index
    %157 = vector.load %arg7[%c0_116, %c2_117, %c0_118, %c0_119] : memref<3x3x1x32xf32, #tpu.memory_space<vmem>>, vector<1x1x1x32xf32>
    %158 = vector.shape_cast %157 : vector<1x1x1x32xf32> to vector<1x32xf32>
    %159 = vector.broadcast %158 : vector<1x32xf32> to vector<16x32xf32>
    %160 = arith.addf %156, %159 : vector<16x32xf32>
    %cst_120 = arith.constant 0.000000e+00 : f32
    %161 = vector.broadcast %cst_120 : f32 to vector<16x32xf32>
    %162 = arith.maximumf %160, %161 : vector<16x32xf32>
    %c0_121 = arith.constant 0 : index
    %c2_122 = arith.constant 2 : index
    %c0_123 = arith.constant 0 : index
    %c0_124 = arith.constant 0 : index
    %163 = vector.load %arg8[%c0_121, %c2_122, %c0_123, %c0_124] : memref<3x3x32x32xbf16, #tpu.memory_space<vmem>>, vector<1x1x32x32xbf16>
    %164 = vector.shape_cast %163 : vector<1x1x32x32xbf16> to vector<32x32xbf16>
    %165 = arith.truncf %162 : vector<16x32xf32> to vector<16x32xbf16>
    %cst_125 = arith.constant dense<0.000000e+00> : vector<16x32xf32>
    %166 = tpu.matmul %165, %164, %cst_125 {dimension_numbers = #tpu.dot_dimension_numbers<[1], [0], [0], [1], [0, 0, 1, 1], [], []>} : vector<16x32xbf16>, vector<32x32xbf16>, vector<16x32xf32> -> vector<16x32xf32>
    %c0_126 = arith.constant 0 : index
    %c2_127 = arith.constant 2 : index
    %c0_128 = arith.constant 0 : index
    %c0_129 = arith.constant 0 : index
    %167 = vector.load %arg9[%c0_126, %c2_127, %c0_128, %c0_129] : memref<3x3x1x32xf32, #tpu.memory_space<vmem>>, vector<1x1x1x32xf32>
    %168 = vector.shape_cast %167 : vector<1x1x1x32xf32> to vector<1x32xf32>
    %169 = vector.broadcast %168 : vector<1x32xf32> to vector<16x32xf32>
    %170 = arith.addf %166, %169 : vector<16x32xf32>
    %171 = arith.addf %127, %170 : vector<16x32xf32>
    %172 = arith.mulf %171, %8 : vector<16x32xf32>
    %c0_130 = arith.constant 0 : index
    %c0_131 = arith.constant 0 : index
    %c0_132 = arith.constant 0 : index
    %173 = vector.load %arg10[%c0_130, %c0_131, %c0_132] : memref<3x32x128xbf16, #tpu.memory_space<vmem>>, vector<1x32x128xbf16>
    %174 = vector.shape_cast %173 : vector<1x32x128xbf16> to vector<32x128xbf16>
    %175 = arith.truncf %172 : vector<16x32xf32> to vector<16x32xbf16>
    %cst_133 = arith.constant dense<0.000000e+00> : vector<16x128xf32>
    %176 = tpu.matmul %175, %174, %cst_133 {dimension_numbers = #tpu.dot_dimension_numbers<[1], [0], [0], [1], [0, 0, 1, 1], [], []>} : vector<16x32xbf16>, vector<32x128xbf16>, vector<16x128xf32> -> vector<16x128xf32>
    %c0_134 = arith.constant 0 : index
    %c0_135 = arith.constant 0 : index
    %c0_136 = arith.constant 0 : index
    %177 = vector.load %arg11[%c0_134, %c0_135, %c0_136] : memref<3x1x128xf32, #tpu.memory_space<vmem>>, vector<1x1x128xf32>
    %178 = vector.shape_cast %177 : vector<1x1x128xf32> to vector<1x128xf32>
    %179 = vector.broadcast %178 : vector<1x128xf32> to vector<16x128xf32>
    %180 = arith.addf %176, %179 : vector<16x128xf32>
    %181 = arith.mulf %180, %10 : vector<16x128xf32>
    %182 = vector.shape_cast %181 : vector<16x128xf32> to vector<1x16x128xf32>
    %c0_137 = arith.constant 0 : index
    %c0_138 = arith.constant 0 : index
    %c0_139 = arith.constant 0 : index
    %c0_140 = arith.constant 0 : index
    %183 = vector.load %arg12[%c0_137, %c0_138, %c0_139, %c0_140] : memref<3x1x16x128xf32, #tpu.memory_space<vmem>>, vector<1x1x16x128xf32>
    %184 = vector.shape_cast %183 : vector<1x1x16x128xf32> to vector<1x16x128xf32>
    %185 = vector.shape_cast %182 : vector<1x16x128xf32> to vector<1x1x16x128xf32>
    tpu.vector_store %arg12[%c0_137, %c0_138, %c0_139, %c0_140], %185 {strides = array<i32>} : memref<3x1x16x128xf32, #tpu.memory_space<vmem>>, vector<1x1x16x128xf32>,
    %cst_141 = arith.constant 0xFF800000 : f32
    %186 = vector.broadcast %cst_141 : f32 to vector<16x128xf32>
    %187 = arith.select %30, %181, %186 : vector<16x128xi1>, vector<16x128xf32>
    %cst_142 = arith.constant dense<0xFF800000> : vector<16xf32>
    %188 = vector.multi_reduction <maximumf>, %187, %cst_142 [1] : vector<16x128xf32> to vector<16xf32>
    %189 = vector.shape_cast %188 : vector<16xf32> to vector<16x1xf32>
    %190 = vector.broadcast %189 : vector<16x1xf32> to vector<16x128xf32>
    %191 = arith.subf %187, %190 : vector<16x128xf32>
    %192 = math.exp %191 : vector<16x128xf32>
    %cst_143 = arith.constant dense<0.000000e+00> : vector<16xf32>
    %193 = vector.multi_reduction <add>, %192, %cst_143 [1] : vector<16x128xf32> to vector<16xf32>
    %194 = vector.shape_cast %193 : vector<16xf32> to vector<16x1xf32>
    %195 = vector.broadcast %194 : vector<16x1xf32> to vector<16x128xf32>
    %196 = arith.divf %192, %195 : vector<16x128xf32>
    %197 = arith.mulf %196, %10 : vector<16x128xf32>
    %c0_144 = arith.constant 0 : index
    %c0_145 = arith.constant 0 : index
    %c0_146 = arith.constant 0 : index
    %198 = vector.load %arg4[%c0_144, %c0_145, %c0_146] : memref<2x128x32xbf16, #tpu.memory_space<vmem>>, vector<1x128x32xbf16>
    %199 = vector.shape_cast %198 : vector<1x128x32xbf16> to vector<128x32xbf16>
    %200 = arith.truncf %197 : vector<16x128xf32> to vector<16x128xbf16>
    %cst_147 = arith.constant dense<0.000000e+00> : vector<16x32xf32>
    %201 = tpu.matmul %200, %199, %cst_147 {dimension_numbers = #tpu.dot_dimension_numbers<[1], [0], [0], [1], [0, 0, 1, 1], [], []>} : vector<16x128xbf16>, vector<128x32xbf16>, vector<16x32xf32> -> vector<16x32xf32>
    %c1_148 = arith.constant 1 : index
    %c0_149 = arith.constant 0 : index
    %c0_150 = arith.constant 0 : index
    %202 = vector.load %arg5[%c1_148, %c0_149, %c0_150] : memref<3x1x32xf32, #tpu.memory_space<vmem>>, vector<1x1x32xf32>
    %203 = vector.shape_cast %202 : vector<1x1x32xf32> to vector<1x32xf32>
    %204 = vector.broadcast %203 : vector<1x32xf32> to vector<16x32xf32>
    %205 = arith.addf %201, %204 : vector<16x32xf32>
    %206 = arith.truncf %205 : vector<16x32xf32> to vector<16x32xbf16>
    %c8_151 = arith.constant 8 : index
    %c0_152 = arith.constant 0 : index
    %207 = vector.load %arg13[%c8_151, %c0_152] : memref<32x32xbf16, #tpu.memory_space<vmem>>, vector<16x32xbf16>
    tpu.vector_store %arg13[%c8_151, %c0_152], %206 {strides = array<i32>} : memref<32x32xbf16, #tpu.memory_space<vmem>>, vector<16x32xbf16>,
    %c7_153 = arith.constant 7 : index
    %c0_154 = arith.constant 0 : index
    %208 = vector.load %arg13[%c7_153, %c0_154] : memref<32x32xbf16, #tpu.memory_space<vmem>>, vector<16x32xbf16>
    %c9_155 = arith.constant 9 : index
    %c0_156 = arith.constant 0 : index
    %209 = vector.load %arg13[%c9_155, %c0_156] : memref<32x32xbf16, #tpu.memory_space<vmem>>, vector<16x32xbf16>
    %c1_i32_157 = arith.constant 1 : i32
    %210 = vector.broadcast %c1_i32_157 : i32 to vector<16x1xi32>
    %211 = arith.cmpi sge, %27, %210 : vector<16x1xi32>
    %c0_i32_158 = arith.constant 0 : i32
    %212 = arith.sitofp %c0_i32_158 : i32 to bf16
    %213 = vector.shape_cast %211 : vector<16x1xi1> to vector<16x1xi1>
    %214 = vector.broadcast %213 : vector<16x1xi1> to vector<16x32xi1>
    %215 = vector.broadcast %212 : bf16 to vector<16x32xbf16>
    %216 = arith.select %214, %208, %215 : vector<16x32xi1>, vector<16x32xbf16>
    %c15_i32_159 = arith.constant 15 : i32
    %217 = vector.broadcast %c15_i32_159 : i32 to vector<16x1xi32>
    %218 = arith.cmpi slt, %27, %217 : vector<16x1xi32>
    %c0_i32_160 = arith.constant 0 : i32
    %219 = arith.sitofp %c0_i32_160 : i32 to bf16
    %220 = vector.shape_cast %218 : vector<16x1xi1> to vector<16x1xi1>
    %221 = vector.broadcast %220 : vector<16x1xi1> to vector<16x32xi1>
    %222 = vector.broadcast %219 : bf16 to vector<16x32xbf16>
    %223 = arith.select %221, %209, %222 : vector<16x32xi1>, vector<16x32xbf16>
    %c1_161 = arith.constant 1 : index
    %c0_162 = arith.constant 0 : index
    %c0_163 = arith.constant 0 : index
    %c0_164 = arith.constant 0 : index
    %c0_165 = arith.constant 0 : index
    %224 = vector.load %arg6[%c1_161, %c0_162, %c0_163, %c0_164, %c0_165] : memref<3x3x3x32x32xbf16, #tpu.memory_space<vmem>>, vector<1x1x1x32x32xbf16>
    %225 = vector.shape_cast %224 : vector<1x1x1x32x32xbf16> to vector<32x32xbf16>
    %cst_166 = arith.constant dense<0.000000e+00> : vector<16x32xf32>
    %226 = tpu.matmul %216, %225, %cst_166 {dimension_numbers = #tpu.dot_dimension_numbers<[1], [0], [0], [1], [0, 0, 1, 1], [], []>} : vector<16x32xbf16>, vector<32x32xbf16>, vector<16x32xf32> -> vector<16x32xf32>
    %c1_167 = arith.constant 1 : index
    %c0_168 = arith.constant 0 : index
    %c1_169 = arith.constant 1 : index
    %c0_170 = arith.constant 0 : index
    %c0_171 = arith.constant 0 : index
    %227 = vector.load %arg6[%c1_167, %c0_168, %c1_169, %c0_170, %c0_171] : memref<3x3x3x32x32xbf16, #tpu.memory_space<vmem>>, vector<1x1x1x32x32xbf16>
    %228 = vector.shape_cast %227 : vector<1x1x1x32x32xbf16> to vector<32x32xbf16>
    %cst_172 = arith.constant dense<0.000000e+00> : vector<16x32xf32>
    %229 = tpu.matmul %206, %228, %cst_172 {dimension_numbers = #tpu.dot_dimension_numbers<[1], [0], [0], [1], [0, 0, 1, 1], [], []>} : vector<16x32xbf16>, vector<32x32xbf16>, vector<16x32xf32> -> vector<16x32xf32>
    %230 = arith.addf %226, %229 : vector<16x32xf32>
    %c1_173 = arith.constant 1 : index
    %c0_174 = arith.constant 0 : index
    %c2_175 = arith.constant 2 : index
    %c0_176 = arith.constant 0 : index
    %c0_177 = arith.constant 0 : index
    %231 = vector.load %arg6[%c1_173, %c0_174, %c2_175, %c0_176, %c0_177] : memref<3x3x3x32x32xbf16, #tpu.memory_space<vmem>>, vector<1x1x1x32x32xbf16>
    %232 = vector.shape_cast %231 : vector<1x1x1x32x32xbf16> to vector<32x32xbf16>
    %cst_178 = arith.constant dense<0.000000e+00> : vector<16x32xf32>
    %233 = tpu.matmul %223, %232, %cst_178 {dimension_numbers = #tpu.dot_dimension_numbers<[1], [0], [0], [1], [0, 0, 1, 1], [], []>} : vector<16x32xbf16>, vector<32x32xbf16>, vector<16x32xf32> -> vector<16x32xf32>
    %234 = arith.addf %230, %233 : vector<16x32xf32>
    %c1_179 = arith.constant 1 : index
    %c0_180 = arith.constant 0 : index
    %c0_181 = arith.constant 0 : index
    %c0_182 = arith.constant 0 : index
    %235 = vector.load %arg7[%c1_179, %c0_180, %c0_181, %c0_182] : memref<3x3x1x32xf32, #tpu.memory_space<vmem>>, vector<1x1x1x32xf32>
    %236 = vector.shape_cast %235 : vector<1x1x1x32xf32> to vector<1x32xf32>
    %237 = vector.broadcast %236 : vector<1x32xf32> to vector<16x32xf32>
    %238 = arith.addf %234, %237 : vector<16x32xf32>
    %cst_183 = arith.constant 0.000000e+00 : f32
    %239 = vector.broadcast %cst_183 : f32 to vector<16x32xf32>
    %240 = arith.maximumf %238, %239 : vector<16x32xf32>
    %c1_184 = arith.constant 1 : index
    %c0_185 = arith.constant 0 : index
    %c0_186 = arith.constant 0 : index
    %c0_187 = arith.constant 0 : index
    %241 = vector.load %arg8[%c1_184, %c0_185, %c0_186, %c0_187] : memref<3x3x32x32xbf16, #tpu.memory_space<vmem>>, vector<1x1x32x32xbf16>
    %242 = vector.shape_cast %241 : vector<1x1x32x32xbf16> to vector<32x32xbf16>
    %243 = arith.truncf %240 : vector<16x32xf32> to vector<16x32xbf16>
    %cst_188 = arith.constant dense<0.000000e+00> : vector<16x32xf32>
    %244 = tpu.matmul %243, %242, %cst_188 {dimension_numbers = #tpu.dot_dimension_numbers<[1], [0], [0], [1], [0, 0, 1, 1], [], []>} : vector<16x32xbf16>, vector<32x32xbf16>, vector<16x32xf32> -> vector<16x32xf32>
    %c1_189 = arith.constant 1 : index
    %c0_190 = arith.constant 0 : index
    %c0_191 = arith.constant 0 : index
    %c0_192 = arith.constant 0 : index
    %245 = vector.load %arg9[%c1_189, %c0_190, %c0_191, %c0_192] : memref<3x3x1x32xf32, #tpu.memory_space<vmem>>, vector<1x1x1x32xf32>
    %246 = vector.shape_cast %245 : vector<1x1x1x32xf32> to vector<1x32xf32>
    %247 = vector.broadcast %246 : vector<1x32xf32> to vector<16x32xf32>
    %248 = arith.addf %244, %247 : vector<16x32xf32>
    %249 = arith.addf %205, %248 : vector<16x32xf32>
    %250 = arith.mulf %249, %8 : vector<16x32xf32>
    %251 = arith.truncf %250 : vector<16x32xf32> to vector<16x32xbf16>
    %c8_193 = arith.constant 8 : index
    %c0_194 = arith.constant 0 : index
    %252 = vector.load %arg13[%c8_193, %c0_194] : memref<32x32xbf16, #tpu.memory_space<vmem>>, vector<16x32xbf16>
    tpu.vector_store %arg13[%c8_193, %c0_194], %251 {strides = array<i32>} : memref<32x32xbf16, #tpu.memory_space<vmem>>, vector<16x32xbf16>,
    %c6_195 = arith.constant 6 : index
    %c0_196 = arith.constant 0 : index
    %253 = vector.load %arg13[%c6_195, %c0_196] : memref<32x32xbf16, #tpu.memory_space<vmem>>, vector<16x32xbf16>
    %c10_197 = arith.constant 10 : index
    %c0_198 = arith.constant 0 : index
    %254 = vector.load %arg13[%c10_197, %c0_198] : memref<32x32xbf16, #tpu.memory_space<vmem>>, vector<16x32xbf16>
    %c2_i32_199 = arith.constant 2 : i32
    %255 = vector.broadcast %c2_i32_199 : i32 to vector<16x1xi32>
    %256 = arith.cmpi sge, %27, %255 : vector<16x1xi32>
    %c0_i32_200 = arith.constant 0 : i32
    %257 = arith.sitofp %c0_i32_200 : i32 to bf16
    %258 = vector.shape_cast %256 : vector<16x1xi1> to vector<16x1xi1>
    %259 = vector.broadcast %258 : vector<16x1xi1> to vector<16x32xi1>
    %260 = vector.broadcast %257 : bf16 to vector<16x32xbf16>
    %261 = arith.select %259, %253, %260 : vector<16x32xi1>, vector<16x32xbf16>
    %c14_i32_201 = arith.constant 14 : i32
    %262 = vector.broadcast %c14_i32_201 : i32 to vector<16x1xi32>
    %263 = arith.cmpi slt, %27, %262 : vector<16x1xi32>
    %c0_i32_202 = arith.constant 0 : i32
    %264 = arith.sitofp %c0_i32_202 : i32 to bf16
    %265 = vector.shape_cast %263 : vector<16x1xi1> to vector<16x1xi1>
    %266 = vector.broadcast %265 : vector<16x1xi1> to vector<16x32xi1>
    %267 = vector.broadcast %264 : bf16 to vector<16x32xbf16>
    %268 = arith.select %266, %254, %267 : vector<16x32xi1>, vector<16x32xbf16>
    %c1_203 = arith.constant 1 : index
    %c1_204 = arith.constant 1 : index
    %c0_205 = arith.constant 0 : index
    %c0_206 = arith.constant 0 : index
    %c0_207 = arith.constant 0 : index
    %269 = vector.load %arg6[%c1_203, %c1_204, %c0_205, %c0_206, %c0_207] : memref<3x3x3x32x32xbf16, #tpu.memory_space<vmem>>, vector<1x1x1x32x32xbf16>
    %270 = vector.shape_cast %269 : vector<1x1x1x32x32xbf16> to vector<32x32xbf16>
    %cst_208 = arith.constant dense<0.000000e+00> : vector<16x32xf32>
    %271 = tpu.matmul %261, %270, %cst_208 {dimension_numbers = #tpu.dot_dimension_numbers<[1], [0], [0], [1], [0, 0, 1, 1], [], []>} : vector<16x32xbf16>, vector<32x32xbf16>, vector<16x32xf32> -> vector<16x32xf32>
    %c1_209 = arith.constant 1 : index
    %c1_210 = arith.constant 1 : index
    %c1_211 = arith.constant 1 : index
    %c0_212 = arith.constant 0 : index
    %c0_213 = arith.constant 0 : index
    %272 = vector.load %arg6[%c1_209, %c1_210, %c1_211, %c0_212, %c0_213] : memref<3x3x3x32x32xbf16, #tpu.memory_space<vmem>>, vector<1x1x1x32x32xbf16>
    %273 = vector.shape_cast %272 : vector<1x1x1x32x32xbf16> to vector<32x32xbf16>
    %cst_214 = arith.constant dense<0.000000e+00> : vector<16x32xf32>
    %274 = tpu.matmul %251, %273, %cst_214 {dimension_numbers = #tpu.dot_dimension_numbers<[1], [0], [0], [1], [0, 0, 1, 1], [], []>} : vector<16x32xbf16>, vector<32x32xbf16>, vector<16x32xf32> -> vector<16x32xf32>
    %275 = arith.addf %271, %274 : vector<16x32xf32>
    %c1_215 = arith.constant 1 : index
    %c1_216 = arith.constant 1 : index
    %c2_217 = arith.constant 2 : index
    %c0_218 = arith.constant 0 : index
    %c0_219 = arith.constant 0 : index
    %276 = vector.load %arg6[%c1_215, %c1_216, %c2_217, %c0_218, %c0_219] : memref<3x3x3x32x32xbf16, #tpu.memory_space<vmem>>, vector<1x1x1x32x32xbf16>
    %277 = vector.shape_cast %276 : vector<1x1x1x32x32xbf16> to vector<32x32xbf16>
    %cst_220 = arith.constant dense<0.000000e+00> : vector<16x32xf32>
    %278 = tpu.matmul %268, %277, %cst_220 {dimension_numbers = #tpu.dot_dimension_numbers<[1], [0], [0], [1], [0, 0, 1, 1], [], []>} : vector<16x32xbf16>, vector<32x32xbf16>, vector<16x32xf32> -> vector<16x32xf32>
    %279 = arith.addf %275, %278 : vector<16x32xf32>
    %c1_221 = arith.constant 1 : index
    %c1_222 = arith.constant 1 : index
    %c0_223 = arith.constant 0 : index
    %c0_224 = arith.constant 0 : index
    %280 = vector.load %arg7[%c1_221, %c1_222, %c0_223, %c0_224] : memref<3x3x1x32xf32, #tpu.memory_space<vmem>>, vector<1x1x1x32xf32>
    %281 = vector.shape_cast %280 : vector<1x1x1x32xf32> to vector<1x32xf32>
    %282 = vector.broadcast %281 : vector<1x32xf32> to vector<16x32xf32>
    %283 = arith.addf %279, %282 : vector<16x32xf32>
    %cst_225 = arith.constant 0.000000e+00 : f32
    %284 = vector.broadcast %cst_225 : f32 to vector<16x32xf32>
    %285 = arith.maximumf %283, %284 : vector<16x32xf32>
    %c1_226 = arith.constant 1 : index
    %c1_227 = arith.constant 1 : index
    %c0_228 = arith.constant 0 : index
    %c0_229 = arith.constant 0 : index
    %286 = vector.load %arg8[%c1_226, %c1_227, %c0_228, %c0_229] : memref<3x3x32x32xbf16, #tpu.memory_space<vmem>>, vector<1x1x32x32xbf16>
    %287 = vector.shape_cast %286 : vector<1x1x32x32xbf16> to vector<32x32xbf16>
    %288 = arith.truncf %285 : vector<16x32xf32> to vector<16x32xbf16>
    %cst_230 = arith.constant dense<0.000000e+00> : vector<16x32xf32>
    %289 = tpu.matmul %288, %287, %cst_230 {dimension_numbers = #tpu.dot_dimension_numbers<[1], [0], [0], [1], [0, 0, 1, 1], [], []>} : vector<16x32xbf16>, vector<32x32xbf16>, vector<16x32xf32> -> vector<16x32xf32>
    %c1_231 = arith.constant 1 : index
    %c1_232 = arith.constant 1 : index
    %c0_233 = arith.constant 0 : index
    %c0_234 = arith.constant 0 : index
    %290 = vector.load %arg9[%c1_231, %c1_232, %c0_233, %c0_234] : memref<3x3x1x32xf32, #tpu.memory_space<vmem>>, vector<1x1x1x32xf32>
    %291 = vector.shape_cast %290 : vector<1x1x1x32xf32> to vector<1x32xf32>
    %292 = vector.broadcast %291 : vector<1x32xf32> to vector<16x32xf32>
    %293 = arith.addf %289, %292 : vector<16x32xf32>
    %294 = arith.addf %250, %293 : vector<16x32xf32>
    %295 = arith.mulf %294, %8 : vector<16x32xf32>
    %296 = arith.truncf %295 : vector<16x32xf32> to vector<16x32xbf16>
    %c8_235 = arith.constant 8 : index
    %c0_236 = arith.constant 0 : index
    %297 = vector.load %arg13[%c8_235, %c0_236] : memref<32x32xbf16, #tpu.memory_space<vmem>>, vector<16x32xbf16>
    tpu.vector_store %arg13[%c8_235, %c0_236], %296 {strides = array<i32>} : memref<32x32xbf16, #tpu.memory_space<vmem>>, vector<16x32xbf16>,
    %c4_237 = arith.constant 4 : index
    %c0_238 = arith.constant 0 : index
    %298 = vector.load %arg13[%c4_237, %c0_238] : memref<32x32xbf16, #tpu.memory_space<vmem>>, vector<16x32xbf16>
    %c12_239 = arith.constant 12 : index
    %c0_240 = arith.constant 0 : index
    %299 = vector.load %arg13[%c12_239, %c0_240] : memref<32x32xbf16, #tpu.memory_space<vmem>>, vector<16x32xbf16>
    %c4_i32_241 = arith.constant 4 : i32
    %300 = vector.broadcast %c4_i32_241 : i32 to vector<16x1xi32>
    %301 = arith.cmpi sge, %27, %300 : vector<16x1xi32>
    %c0_i32_242 = arith.constant 0 : i32
    %302 = arith.sitofp %c0_i32_242 : i32 to bf16
    %303 = vector.shape_cast %301 : vector<16x1xi1> to vector<16x1xi1>
    %304 = vector.broadcast %303 : vector<16x1xi1> to vector<16x32xi1>
    %305 = vector.broadcast %302 : bf16 to vector<16x32xbf16>
    %306 = arith.select %304, %298, %305 : vector<16x32xi1>, vector<16x32xbf16>
    %c12_i32_243 = arith.constant 12 : i32
    %307 = vector.broadcast %c12_i32_243 : i32 to vector<16x1xi32>
    %308 = arith.cmpi slt, %27, %307 : vector<16x1xi32>
    %c0_i32_244 = arith.constant 0 : i32
    %309 = arith.sitofp %c0_i32_244 : i32 to bf16
    %310 = vector.shape_cast %308 : vector<16x1xi1> to vector<16x1xi1>
    %311 = vector.broadcast %310 : vector<16x1xi1> to vector<16x32xi1>
    %312 = vector.broadcast %309 : bf16 to vector<16x32xbf16>
    %313 = arith.select %311, %299, %312 : vector<16x32xi1>, vector<16x32xbf16>
    %c1_245 = arith.constant 1 : index
    %c2_246 = arith.constant 2 : index
    %c0_247 = arith.constant 0 : index
    %c0_248 = arith.constant 0 : index
    %c0_249 = arith.constant 0 : index
    %314 = vector.load %arg6[%c1_245, %c2_246, %c0_247, %c0_248, %c0_249] : memref<3x3x3x32x32xbf16, #tpu.memory_space<vmem>>, vector<1x1x1x32x32xbf16>
    %315 = vector.shape_cast %314 : vector<1x1x1x32x32xbf16> to vector<32x32xbf16>
    %cst_250 = arith.constant dense<0.000000e+00> : vector<16x32xf32>
    %316 = tpu.matmul %306, %315, %cst_250 {dimension_numbers = #tpu.dot_dimension_numbers<[1], [0], [0], [1], [0, 0, 1, 1], [], []>} : vector<16x32xbf16>, vector<32x32xbf16>, vector<16x32xf32> -> vector<16x32xf32>
    %c1_251 = arith.constant 1 : index
    %c2_252 = arith.constant 2 : index
    %c1_253 = arith.constant 1 : index
    %c0_254 = arith.constant 0 : index
    %c0_255 = arith.constant 0 : index
    %317 = vector.load %arg6[%c1_251, %c2_252, %c1_253, %c0_254, %c0_255] : memref<3x3x3x32x32xbf16, #tpu.memory_space<vmem>>, vector<1x1x1x32x32xbf16>
    %318 = vector.shape_cast %317 : vector<1x1x1x32x32xbf16> to vector<32x32xbf16>
    %cst_256 = arith.constant dense<0.000000e+00> : vector<16x32xf32>
    %319 = tpu.matmul %296, %318, %cst_256 {dimension_numbers = #tpu.dot_dimension_numbers<[1], [0], [0], [1], [0, 0, 1, 1], [], []>} : vector<16x32xbf16>, vector<32x32xbf16>, vector<16x32xf32> -> vector<16x32xf32>
    %320 = arith.addf %316, %319 : vector<16x32xf32>
    %c1_257 = arith.constant 1 : index
    %c2_258 = arith.constant 2 : index
    %c2_259 = arith.constant 2 : index
    %c0_260 = arith.constant 0 : index
    %c0_261 = arith.constant 0 : index
    %321 = vector.load %arg6[%c1_257, %c2_258, %c2_259, %c0_260, %c0_261] : memref<3x3x3x32x32xbf16, #tpu.memory_space<vmem>>, vector<1x1x1x32x32xbf16>
    %322 = vector.shape_cast %321 : vector<1x1x1x32x32xbf16> to vector<32x32xbf16>
    %cst_262 = arith.constant dense<0.000000e+00> : vector<16x32xf32>
    %323 = tpu.matmul %313, %322, %cst_262 {dimension_numbers = #tpu.dot_dimension_numbers<[1], [0], [0], [1], [0, 0, 1, 1], [], []>} : vector<16x32xbf16>, vector<32x32xbf16>, vector<16x32xf32> -> vector<16x32xf32>
    %324 = arith.addf %320, %323 : vector<16x32xf32>
    %c1_263 = arith.constant 1 : index
    %c2_264 = arith.constant 2 : index
    %c0_265 = arith.constant 0 : index
    %c0_266 = arith.constant 0 : index
    %325 = vector.load %arg7[%c1_263, %c2_264, %c0_265, %c0_266] : memref<3x3x1x32xf32, #tpu.memory_space<vmem>>, vector<1x1x1x32xf32>
    %326 = vector.shape_cast %325 : vector<1x1x1x32xf32> to vector<1x32xf32>
    %327 = vector.broadcast %326 : vector<1x32xf32> to vector<16x32xf32>
    %328 = arith.addf %324, %327 : vector<16x32xf32>
    %cst_267 = arith.constant 0.000000e+00 : f32
    %329 = vector.broadcast %cst_267 : f32 to vector<16x32xf32>
    %330 = arith.maximumf %328, %329 : vector<16x32xf32>
    %c1_268 = arith.constant 1 : index
    %c2_269 = arith.constant 2 : index
    %c0_270 = arith.constant 0 : index
    %c0_271 = arith.constant 0 : index
    %331 = vector.load %arg8[%c1_268, %c2_269, %c0_270, %c0_271] : memref<3x3x32x32xbf16, #tpu.memory_space<vmem>>, vector<1x1x32x32xbf16>
    %332 = vector.shape_cast %331 : vector<1x1x32x32xbf16> to vector<32x32xbf16>
    %333 = arith.truncf %330 : vector<16x32xf32> to vector<16x32xbf16>
    %cst_272 = arith.constant dense<0.000000e+00> : vector<16x32xf32>
    %334 = tpu.matmul %333, %332, %cst_272 {dimension_numbers = #tpu.dot_dimension_numbers<[1], [0], [0], [1], [0, 0, 1, 1], [], []>} : vector<16x32xbf16>, vector<32x32xbf16>, vector<16x32xf32> -> vector<16x32xf32>
    %c1_273 = arith.constant 1 : index
    %c2_274 = arith.constant 2 : index
    %c0_275 = arith.constant 0 : index
    %c0_276 = arith.constant 0 : index
    %335 = vector.load %arg9[%c1_273, %c2_274, %c0_275, %c0_276] : memref<3x3x1x32xf32, #tpu.memory_space<vmem>>, vector<1x1x1x32xf32>
    %336 = vector.shape_cast %335 : vector<1x1x1x32xf32> to vector<1x32xf32>
    %337 = vector.broadcast %336 : vector<1x32xf32> to vector<16x32xf32>
    %338 = arith.addf %334, %337 : vector<16x32xf32>
    %339 = arith.addf %295, %338 : vector<16x32xf32>
    %340 = arith.mulf %339, %8 : vector<16x32xf32>
    %c1_277 = arith.constant 1 : index
    %c0_278 = arith.constant 0 : index
    %c0_279 = arith.constant 0 : index
    %341 = vector.load %arg10[%c1_277, %c0_278, %c0_279] : memref<3x32x128xbf16, #tpu.memory_space<vmem>>, vector<1x32x128xbf16>
    %342 = vector.shape_cast %341 : vector<1x32x128xbf16> to vector<32x128xbf16>
    %343 = arith.truncf %340 : vector<16x32xf32> to vector<16x32xbf16>
    %cst_280 = arith.constant dense<0.000000e+00> : vector<16x128xf32>
    %344 = tpu.matmul %343, %342, %cst_280 {dimension_numbers = #tpu.dot_dimension_numbers<[1], [0], [0], [1], [0, 0, 1, 1], [], []>} : vector<16x32xbf16>, vector<32x128xbf16>, vector<16x128xf32> -> vector<16x128xf32>
    %c1_281 = arith.constant 1 : index
    %c0_282 = arith.constant 0 : index
    %c0_283 = arith.constant 0 : index
    %345 = vector.load %arg11[%c1_281, %c0_282, %c0_283] : memref<3x1x128xf32, #tpu.memory_space<vmem>>, vector<1x1x128xf32>
    %346 = vector.shape_cast %345 : vector<1x1x128xf32> to vector<1x128xf32>
    %347 = vector.broadcast %346 : vector<1x128xf32> to vector<16x128xf32>
    %348 = arith.addf %344, %347 : vector<16x128xf32>
    %349 = arith.mulf %348, %10 : vector<16x128xf32>
    %350 = vector.shape_cast %349 : vector<16x128xf32> to vector<1x16x128xf32>
    %c1_284 = arith.constant 1 : index
    %c0_285 = arith.constant 0 : index
    %c0_286 = arith.constant 0 : index
    %c0_287 = arith.constant 0 : index
    %351 = vector.load %arg12[%c1_284, %c0_285, %c0_286, %c0_287] : memref<3x1x16x128xf32, #tpu.memory_space<vmem>>, vector<1x1x16x128xf32>
    %352 = vector.shape_cast %351 : vector<1x1x16x128xf32> to vector<1x16x128xf32>
    %353 = vector.shape_cast %350 : vector<1x16x128xf32> to vector<1x1x16x128xf32>
    tpu.vector_store %arg12[%c1_284, %c0_285, %c0_286, %c0_287], %353 {strides = array<i32>} : memref<3x1x16x128xf32, #tpu.memory_space<vmem>>, vector<1x1x16x128xf32>,
    %cst_288 = arith.constant 0xFF800000 : f32
    %354 = vector.broadcast %cst_288 : f32 to vector<16x128xf32>
    %355 = arith.select %30, %349, %354 : vector<16x128xi1>, vector<16x128xf32>
    %cst_289 = arith.constant dense<0xFF800000> : vector<16xf32>
    %356 = vector.multi_reduction <maximumf>, %355, %cst_289 [1] : vector<16x128xf32> to vector<16xf32>
    %357 = vector.shape_cast %356 : vector<16xf32> to vector<16x1xf32>
    %358 = vector.broadcast %357 : vector<16x1xf32> to vector<16x128xf32>
    %359 = arith.subf %355, %358 : vector<16x128xf32>
    %360 = math.exp %359 : vector<16x128xf32>
    %cst_290 = arith.constant dense<0.000000e+00> : vector<16xf32>
    %361 = vector.multi_reduction <add>, %360, %cst_290 [1] : vector<16x128xf32> to vector<16xf32>
    %362 = vector.shape_cast %361 : vector<16xf32> to vector<16x1xf32>
    %363 = vector.broadcast %362 : vector<16x1xf32> to vector<16x128xf32>
    %364 = arith.divf %360, %363 : vector<16x128xf32>
    %365 = arith.mulf %364, %10 : vector<16x128xf32>
    %c1_291 = arith.constant 1 : index
    %c0_292 = arith.constant 0 : index
    %c0_293 = arith.constant 0 : index
    %366 = vector.load %arg4[%c1_291, %c0_292, %c0_293] : memref<2x128x32xbf16, #tpu.memory_space<vmem>>, vector<1x128x32xbf16>
    %367 = vector.shape_cast %366 : vector<1x128x32xbf16> to vector<128x32xbf16>
    %368 = arith.truncf %365 : vector<16x128xf32> to vector<16x128xbf16>
    %cst_294 = arith.constant dense<0.000000e+00> : vector<16x32xf32>
    %369 = tpu.matmul %368, %367, %cst_294 {dimension_numbers = #tpu.dot_dimension_numbers<[1], [0], [0], [1], [0, 0, 1, 1], [], []>} : vector<16x128xbf16>, vector<128x32xbf16>, vector<16x32xf32> -> vector<16x32xf32>
    %c2_295 = arith.constant 2 : index
    %c0_296 = arith.constant 0 : index
    %c0_297 = arith.constant 0 : index
    %370 = vector.load %arg5[%c2_295, %c0_296, %c0_297] : memref<3x1x32xf32, #tpu.memory_space<vmem>>, vector<1x1x32xf32>
    %371 = vector.shape_cast %370 : vector<1x1x32xf32> to vector<1x32xf32>
    %372 = vector.broadcast %371 : vector<1x32xf32> to vector<16x32xf32>
    %373 = arith.addf %369, %372 : vector<16x32xf32>
    %374 = arith.truncf %373 : vector<16x32xf32> to vector<16x32xbf16>
    %c8_298 = arith.constant 8 : index
    %c0_299 = arith.constant 0 : index
    %375 = vector.load %arg13[%c8_298, %c0_299] : memref<32x32xbf16, #tpu.memory_space<vmem>>, vector<16x32xbf16>
    tpu.vector_store %arg13[%c8_298, %c0_299], %374 {strides = array<i32>} : memref<32x32xbf16, #tpu.memory_space<vmem>>, vector<16x32xbf16>,
    %c7_300 = arith.constant 7 : index
    %c0_301 = arith.constant 0 : index
    %376 = vector.load %arg13[%c7_300, %c0_301] : memref<32x32xbf16, #tpu.memory_space<vmem>>, vector<16x32xbf16>
    %c9_302 = arith.constant 9 : index
    %c0_303 = arith.constant 0 : index
    %377 = vector.load %arg13[%c9_302, %c0_303] : memref<32x32xbf16, #tpu.memory_space<vmem>>, vector<16x32xbf16>
    %c1_i32_304 = arith.constant 1 : i32
    %378 = vector.broadcast %c1_i32_304 : i32 to vector<16x1xi32>
    %379 = arith.cmpi sge, %27, %378 : vector<16x1xi32>
    %c0_i32_305 = arith.constant 0 : i32
    %380 = arith.sitofp %c0_i32_305 : i32 to bf16
    %381 = vector.shape_cast %379 : vector<16x1xi1> to vector<16x1xi1>
    %382 = vector.broadcast %381 : vector<16x1xi1> to vector<16x32xi1>
    %383 = vector.broadcast %380 : bf16 to vector<16x32xbf16>
    %384 = arith.select %382, %376, %383 : vector<16x32xi1>, vector<16x32xbf16>
    %c15_i32_306 = arith.constant 15 : i32
    %385 = vector.broadcast %c15_i32_306 : i32 to vector<16x1xi32>
    %386 = arith.cmpi slt, %27, %385 : vector<16x1xi32>
    %c0_i32_307 = arith.constant 0 : i32
    %387 = arith.sitofp %c0_i32_307 : i32 to bf16
    %388 = vector.shape_cast %386 : vector<16x1xi1> to vector<16x1xi1>
    %389 = vector.broadcast %388 : vector<16x1xi1> to vector<16x32xi1>
    %390 = vector.broadcast %387 : bf16 to vector<16x32xbf16>
    %391 = arith.select %389, %377, %390 : vector<16x32xi1>, vector<16x32xbf16>
    %c2_308 = arith.constant 2 : index
    %c0_309 = arith.constant 0 : index
    %c0_310 = arith.constant 0 : index
    %c0_311 = arith.constant 0 : index
    %c0_312 = arith.constant 0 : index
    %392 = vector.load %arg6[%c2_308, %c0_309, %c0_310, %c0_311, %c0_312] : memref<3x3x3x32x32xbf16, #tpu.memory_space<vmem>>, vector<1x1x1x32x32xbf16>
    %393 = vector.shape_cast %392 : vector<1x1x1x32x32xbf16> to vector<32x32xbf16>
    %cst_313 = arith.constant dense<0.000000e+00> : vector<16x32xf32>
    %394 = tpu.matmul %384, %393, %cst_313 {dimension_numbers = #tpu.dot_dimension_numbers<[1], [0], [0], [1], [0, 0, 1, 1], [], []>} : vector<16x32xbf16>, vector<32x32xbf16>, vector<16x32xf32> -> vector<16x32xf32>
    %c2_314 = arith.constant 2 : index
    %c0_315 = arith.constant 0 : index
    %c1_316 = arith.constant 1 : index
    %c0_317 = arith.constant 0 : index
    %c0_318 = arith.constant 0 : index
    %395 = vector.load %arg6[%c2_314, %c0_315, %c1_316, %c0_317, %c0_318] : memref<3x3x3x32x32xbf16, #tpu.memory_space<vmem>>, vector<1x1x1x32x32xbf16>
    %396 = vector.shape_cast %395 : vector<1x1x1x32x32xbf16> to vector<32x32xbf16>
    %cst_319 = arith.constant dense<0.000000e+00> : vector<16x32xf32>
    %397 = tpu.matmul %374, %396, %cst_319 {dimension_numbers = #tpu.dot_dimension_numbers<[1], [0], [0], [1], [0, 0, 1, 1], [], []>} : vector<16x32xbf16>, vector<32x32xbf16>, vector<16x32xf32> -> vector<16x32xf32>
    %398 = arith.addf %394, %397 : vector<16x32xf32>
    %c2_320 = arith.constant 2 : index
    %c0_321 = arith.constant 0 : index
    %c2_322 = arith.constant 2 : index
    %c0_323 = arith.constant 0 : index
    %c0_324 = arith.constant 0 : index
    %399 = vector.load %arg6[%c2_320, %c0_321, %c2_322, %c0_323, %c0_324] : memref<3x3x3x32x32xbf16, #tpu.memory_space<vmem>>, vector<1x1x1x32x32xbf16>
    %400 = vector.shape_cast %399 : vector<1x1x1x32x32xbf16> to vector<32x32xbf16>
    %cst_325 = arith.constant dense<0.000000e+00> : vector<16x32xf32>
    %401 = tpu.matmul %391, %400, %cst_325 {dimension_numbers = #tpu.dot_dimension_numbers<[1], [0], [0], [1], [0, 0, 1, 1], [], []>} : vector<16x32xbf16>, vector<32x32xbf16>, vector<16x32xf32> -> vector<16x32xf32>
    %402 = arith.addf %398, %401 : vector<16x32xf32>
    %c2_326 = arith.constant 2 : index
    %c0_327 = arith.constant 0 : index
    %c0_328 = arith.constant 0 : index
    %c0_329 = arith.constant 0 : index
    %403 = vector.load %arg7[%c2_326, %c0_327, %c0_328, %c0_329] : memref<3x3x1x32xf32, #tpu.memory_space<vmem>>, vector<1x1x1x32xf32>
    %404 = vector.shape_cast %403 : vector<1x1x1x32xf32> to vector<1x32xf32>
    %405 = vector.broadcast %404 : vector<1x32xf32> to vector<16x32xf32>
    %406 = arith.addf %402, %405 : vector<16x32xf32>
    %cst_330 = arith.constant 0.000000e+00 : f32
    %407 = vector.broadcast %cst_330 : f32 to vector<16x32xf32>
    %408 = arith.maximumf %406, %407 : vector<16x32xf32>
    %c2_331 = arith.constant 2 : index
    %c0_332 = arith.constant 0 : index
    %c0_333 = arith.constant 0 : index
    %c0_334 = arith.constant 0 : index
    %409 = vector.load %arg8[%c2_331, %c0_332, %c0_333, %c0_334] : memref<3x3x32x32xbf16, #tpu.memory_space<vmem>>, vector<1x1x32x32xbf16>
    %410 = vector.shape_cast %409 : vector<1x1x32x32xbf16> to vector<32x32xbf16>
    %411 = arith.truncf %408 : vector<16x32xf32> to vector<16x32xbf16>
    %cst_335 = arith.constant dense<0.000000e+00> : vector<16x32xf32>
    %412 = tpu.matmul %411, %410, %cst_335 {dimension_numbers = #tpu.dot_dimension_numbers<[1], [0], [0], [1], [0, 0, 1, 1], [], []>} : vector<16x32xbf16>, vector<32x32xbf16>, vector<16x32xf32> -> vector<16x32xf32>
    %c2_336 = arith.constant 2 : index
    %c0_337 = arith.constant 0 : index
    %c0_338 = arith.constant 0 : index
    %c0_339 = arith.constant 0 : index
    %413 = vector.load %arg9[%c2_336, %c0_337, %c0_338, %c0_339] : memref<3x3x1x32xf32, #tpu.memory_space<vmem>>, vector<1x1x1x32xf32>
    %414 = vector.shape_cast %413 : vector<1x1x1x32xf32> to vector<1x32xf32>
    %415 = vector.broadcast %414 : vector<1x32xf32> to vector<16x32xf32>
    %416 = arith.addf %412, %415 : vector<16x32xf32>
    %417 = arith.addf %373, %416 : vector<16x32xf32>
    %418 = arith.mulf %417, %8 : vector<16x32xf32>
    %419 = arith.truncf %418 : vector<16x32xf32> to vector<16x32xbf16>
    %c8_340 = arith.constant 8 : index
    %c0_341 = arith.constant 0 : index
    %420 = vector.load %arg13[%c8_340, %c0_341] : memref<32x32xbf16, #tpu.memory_space<vmem>>, vector<16x32xbf16>
    tpu.vector_store %arg13[%c8_340, %c0_341], %419 {strides = array<i32>} : memref<32x32xbf16, #tpu.memory_space<vmem>>, vector<16x32xbf16>,
    %c6_342 = arith.constant 6 : index
    %c0_343 = arith.constant 0 : index
    %421 = vector.load %arg13[%c6_342, %c0_343] : memref<32x32xbf16, #tpu.memory_space<vmem>>, vector<16x32xbf16>
    %c10_344 = arith.constant 10 : index
    %c0_345 = arith.constant 0 : index
    %422 = vector.load %arg13[%c10_344, %c0_345] : memref<32x32xbf16, #tpu.memory_space<vmem>>, vector<16x32xbf16>
    %c2_i32_346 = arith.constant 2 : i32
    %423 = vector.broadcast %c2_i32_346 : i32 to vector<16x1xi32>
    %424 = arith.cmpi sge, %27, %423 : vector<16x1xi32>
    %c0_i32_347 = arith.constant 0 : i32
    %425 = arith.sitofp %c0_i32_347 : i32 to bf16
    %426 = vector.shape_cast %424 : vector<16x1xi1> to vector<16x1xi1>
    %427 = vector.broadcast %426 : vector<16x1xi1> to vector<16x32xi1>
    %428 = vector.broadcast %425 : bf16 to vector<16x32xbf16>
    %429 = arith.select %427, %421, %428 : vector<16x32xi1>, vector<16x32xbf16>
    %c14_i32_348 = arith.constant 14 : i32
    %430 = vector.broadcast %c14_i32_348 : i32 to vector<16x1xi32>
    %431 = arith.cmpi slt, %27, %430 : vector<16x1xi32>
    %c0_i32_349 = arith.constant 0 : i32
    %432 = arith.sitofp %c0_i32_349 : i32 to bf16
    %433 = vector.shape_cast %431 : vector<16x1xi1> to vector<16x1xi1>
    %434 = vector.broadcast %433 : vector<16x1xi1> to vector<16x32xi1>
    %435 = vector.broadcast %432 : bf16 to vector<16x32xbf16>
    %436 = arith.select %434, %422, %435 : vector<16x32xi1>, vector<16x32xbf16>
    %c2_350 = arith.constant 2 : index
    %c1_351 = arith.constant 1 : index
    %c0_352 = arith.constant 0 : index
    %c0_353 = arith.constant 0 : index
    %c0_354 = arith.constant 0 : index
    %437 = vector.load %arg6[%c2_350, %c1_351, %c0_352, %c0_353, %c0_354] : memref<3x3x3x32x32xbf16, #tpu.memory_space<vmem>>, vector<1x1x1x32x32xbf16>
    %438 = vector.shape_cast %437 : vector<1x1x1x32x32xbf16> to vector<32x32xbf16>
    %cst_355 = arith.constant dense<0.000000e+00> : vector<16x32xf32>
    %439 = tpu.matmul %429, %438, %cst_355 {dimension_numbers = #tpu.dot_dimension_numbers<[1], [0], [0], [1], [0, 0, 1, 1], [], []>} : vector<16x32xbf16>, vector<32x32xbf16>, vector<16x32xf32> -> vector<16x32xf32>
    %c2_356 = arith.constant 2 : index
    %c1_357 = arith.constant 1 : index
    %c1_358 = arith.constant 1 : index
    %c0_359 = arith.constant 0 : index
    %c0_360 = arith.constant 0 : index
    %440 = vector.load %arg6[%c2_356, %c1_357, %c1_358, %c0_359, %c0_360] : memref<3x3x3x32x32xbf16, #tpu.memory_space<vmem>>, vector<1x1x1x32x32xbf16>
    %441 = vector.shape_cast %440 : vector<1x1x1x32x32xbf16> to vector<32x32xbf16>
    %cst_361 = arith.constant dense<0.000000e+00> : vector<16x32xf32>
    %442 = tpu.matmul %419, %441, %cst_361 {dimension_numbers = #tpu.dot_dimension_numbers<[1], [0], [0], [1], [0, 0, 1, 1], [], []>} : vector<16x32xbf16>, vector<32x32xbf16>, vector<16x32xf32> -> vector<16x32xf32>
    %443 = arith.addf %439, %442 : vector<16x32xf32>
    %c2_362 = arith.constant 2 : index
    %c1_363 = arith.constant 1 : index
    %c2_364 = arith.constant 2 : index
    %c0_365 = arith.constant 0 : index
    %c0_366 = arith.constant 0 : index
    %444 = vector.load %arg6[%c2_362, %c1_363, %c2_364, %c0_365, %c0_366] : memref<3x3x3x32x32xbf16, #tpu.memory_space<vmem>>, vector<1x1x1x32x32xbf16>
    %445 = vector.shape_cast %444 : vector<1x1x1x32x32xbf16> to vector<32x32xbf16>
    %cst_367 = arith.constant dense<0.000000e+00> : vector<16x32xf32>
    %446 = tpu.matmul %436, %445, %cst_367 {dimension_numbers = #tpu.dot_dimension_numbers<[1], [0], [0], [1], [0, 0, 1, 1], [], []>} : vector<16x32xbf16>, vector<32x32xbf16>, vector<16x32xf32> -> vector<16x32xf32>
    %447 = arith.addf %443, %446 : vector<16x32xf32>
    %c2_368 = arith.constant 2 : index
    %c1_369 = arith.constant 1 : index
    %c0_370 = arith.constant 0 : index
    %c0_371 = arith.constant 0 : index
    %448 = vector.load %arg7[%c2_368, %c1_369, %c0_370, %c0_371] : memref<3x3x1x32xf32, #tpu.memory_space<vmem>>, vector<1x1x1x32xf32>
    %449 = vector.shape_cast %448 : vector<1x1x1x32xf32> to vector<1x32xf32>
    %450 = vector.broadcast %449 : vector<1x32xf32> to vector<16x32xf32>
    %451 = arith.addf %447, %450 : vector<16x32xf32>
    %cst_372 = arith.constant 0.000000e+00 : f32
    %452 = vector.broadcast %cst_372 : f32 to vector<16x32xf32>
    %453 = arith.maximumf %451, %452 : vector<16x32xf32>
    %c2_373 = arith.constant 2 : index
    %c1_374 = arith.constant 1 : index
    %c0_375 = arith.constant 0 : index
    %c0_376 = arith.constant 0 : index
    %454 = vector.load %arg8[%c2_373, %c1_374, %c0_375, %c0_376] : memref<3x3x32x32xbf16, #tpu.memory_space<vmem>>, vector<1x1x32x32xbf16>
    %455 = vector.shape_cast %454 : vector<1x1x32x32xbf16> to vector<32x32xbf16>
    %456 = arith.truncf %453 : vector<16x32xf32> to vector<16x32xbf16>
    %cst_377 = arith.constant dense<0.000000e+00> : vector<16x32xf32>
    %457 = tpu.matmul %456, %455, %cst_377 {dimension_numbers = #tpu.dot_dimension_numbers<[1], [0], [0], [1], [0, 0, 1, 1], [], []>} : vector<16x32xbf16>, vector<32x32xbf16>, vector<16x32xf32> -> vector<16x32xf32>
    %c2_378 = arith.constant 2 : index
    %c1_379 = arith.constant 1 : index
    %c0_380 = arith.constant 0 : index
    %c0_381 = arith.constant 0 : index
    %458 = vector.load %arg9[%c2_378, %c1_379, %c0_380, %c0_381] : memref<3x3x1x32xf32, #tpu.memory_space<vmem>>, vector<1x1x1x32xf32>
    %459 = vector.shape_cast %458 : vector<1x1x1x32xf32> to vector<1x32xf32>
    %460 = vector.broadcast %459 : vector<1x32xf32> to vector<16x32xf32>
    %461 = arith.addf %457, %460 : vector<16x32xf32>
    %462 = arith.addf %418, %461 : vector<16x32xf32>
    %463 = arith.mulf %462, %8 : vector<16x32xf32>
    %464 = arith.truncf %463 : vector<16x32xf32> to vector<16x32xbf16>
    %c8_382 = arith.constant 8 : index
    %c0_383 = arith.constant 0 : index
    %465 = vector.load %arg13[%c8_382, %c0_383] : memref<32x32xbf16, #tpu.memory_space<vmem>>, vector<16x32xbf16>
    tpu.vector_store %arg13[%c8_382, %c0_383], %464 {strides = array<i32>} : memref<32x32xbf16, #tpu.memory_space<vmem>>, vector<16x32xbf16>,
    %c4_384 = arith.constant 4 : index
    %c0_385 = arith.constant 0 : index
    %466 = vector.load %arg13[%c4_384, %c0_385] : memref<32x32xbf16, #tpu.memory_space<vmem>>, vector<16x32xbf16>
    %c12_386 = arith.constant 12 : index
    %c0_387 = arith.constant 0 : index
    %467 = vector.load %arg13[%c12_386, %c0_387] : memref<32x32xbf16, #tpu.memory_space<vmem>>, vector<16x32xbf16>
    %c4_i32_388 = arith.constant 4 : i32
    %468 = vector.broadcast %c4_i32_388 : i32 to vector<16x1xi32>
    %469 = arith.cmpi sge, %27, %468 : vector<16x1xi32>
    %c0_i32_389 = arith.constant 0 : i32
    %470 = arith.sitofp %c0_i32_389 : i32 to bf16
    %471 = vector.shape_cast %469 : vector<16x1xi1> to vector<16x1xi1>
    %472 = vector.broadcast %471 : vector<16x1xi1> to vector<16x32xi1>
    %473 = vector.broadcast %470 : bf16 to vector<16x32xbf16>
    %474 = arith.select %472, %466, %473 : vector<16x32xi1>, vector<16x32xbf16>
    %c12_i32_390 = arith.constant 12 : i32
    %475 = vector.broadcast %c12_i32_390 : i32 to vector<16x1xi32>
    %476 = arith.cmpi slt, %27, %475 : vector<16x1xi32>
    %c0_i32_391 = arith.constant 0 : i32
    %477 = arith.sitofp %c0_i32_391 : i32 to bf16
    %478 = vector.shape_cast %476 : vector<16x1xi1> to vector<16x1xi1>
    %479 = vector.broadcast %478 : vector<16x1xi1> to vector<16x32xi1>
    %480 = vector.broadcast %477 : bf16 to vector<16x32xbf16>
    %481 = arith.select %479, %467, %480 : vector<16x32xi1>, vector<16x32xbf16>
    %c2_392 = arith.constant 2 : index
    %c2_393 = arith.constant 2 : index
    %c0_394 = arith.constant 0 : index
    %c0_395 = arith.constant 0 : index
    %c0_396 = arith.constant 0 : index
    %482 = vector.load %arg6[%c2_392, %c2_393, %c0_394, %c0_395, %c0_396] : memref<3x3x3x32x32xbf16, #tpu.memory_space<vmem>>, vector<1x1x1x32x32xbf16>
    %483 = vector.shape_cast %482 : vector<1x1x1x32x32xbf16> to vector<32x32xbf16>
    %cst_397 = arith.constant dense<0.000000e+00> : vector<16x32xf32>
    %484 = tpu.matmul %474, %483, %cst_397 {dimension_numbers = #tpu.dot_dimension_numbers<[1], [0], [0], [1], [0, 0, 1, 1], [], []>} : vector<16x32xbf16>, vector<32x32xbf16>, vector<16x32xf32> -> vector<16x32xf32>
    %c2_398 = arith.constant 2 : index
    %c2_399 = arith.constant 2 : index
    %c1_400 = arith.constant 1 : index
    %c0_401 = arith.constant 0 : index
    %c0_402 = arith.constant 0 : index
    %485 = vector.load %arg6[%c2_398, %c2_399, %c1_400, %c0_401, %c0_402] : memref<3x3x3x32x32xbf16, #tpu.memory_space<vmem>>, vector<1x1x1x32x32xbf16>
    %486 = vector.shape_cast %485 : vector<1x1x1x32x32xbf16> to vector<32x32xbf16>
    %cst_403 = arith.constant dense<0.000000e+00> : vector<16x32xf32>
    %487 = tpu.matmul %464, %486, %cst_403 {dimension_numbers = #tpu.dot_dimension_numbers<[1], [0], [0], [1], [0, 0, 1, 1], [], []>} : vector<16x32xbf16>, vector<32x32xbf16>, vector<16x32xf32> -> vector<16x32xf32>
    %488 = arith.addf %484, %487 : vector<16x32xf32>
    %c2_404 = arith.constant 2 : index
    %c2_405 = arith.constant 2 : index
    %c2_406 = arith.constant 2 : index
    %c0_407 = arith.constant 0 : index
    %c0_408 = arith.constant 0 : index
    %489 = vector.load %arg6[%c2_404, %c2_405, %c2_406, %c0_407, %c0_408] : memref<3x3x3x32x32xbf16, #tpu.memory_space<vmem>>, vector<1x1x1x32x32xbf16>
    %490 = vector.shape_cast %489 : vector<1x1x1x32x32xbf16> to vector<32x32xbf16>
    %cst_409 = arith.constant dense<0.000000e+00> : vector<16x32xf32>
    %491 = tpu.matmul %481, %490, %cst_409 {dimension_numbers = #tpu.dot_dimension_numbers<[1], [0], [0], [1], [0, 0, 1, 1], [], []>} : vector<16x32xbf16>, vector<32x32xbf16>, vector<16x32xf32> -> vector<16x32xf32>
    %492 = arith.addf %488, %491 : vector<16x32xf32>
    %c2_410 = arith.constant 2 : index
    %c2_411 = arith.constant 2 : index
    %c0_412 = arith.constant 0 : index
    %c0_413 = arith.constant 0 : index
    %493 = vector.load %arg7[%c2_410, %c2_411, %c0_412, %c0_413] : memref<3x3x1x32xf32, #tpu.memory_space<vmem>>, vector<1x1x1x32xf32>
    %494 = vector.shape_cast %493 : vector<1x1x1x32xf32> to vector<1x32xf32>
    %495 = vector.broadcast %494 : vector<1x32xf32> to vector<16x32xf32>
    %496 = arith.addf %492, %495 : vector<16x32xf32>
    %cst_414 = arith.constant 0.000000e+00 : f32
    %497 = vector.broadcast %cst_414 : f32 to vector<16x32xf32>
    %498 = arith.maximumf %496, %497 : vector<16x32xf32>
    %c2_415 = arith.constant 2 : index
    %c2_416 = arith.constant 2 : index
    %c0_417 = arith.constant 0 : index
    %c0_418 = arith.constant 0 : index
    %499 = vector.load %arg8[%c2_415, %c2_416, %c0_417, %c0_418] : memref<3x3x32x32xbf16, #tpu.memory_space<vmem>>, vector<1x1x32x32xbf16>
    %500 = vector.shape_cast %499 : vector<1x1x32x32xbf16> to vector<32x32xbf16>
    %501 = arith.truncf %498 : vector<16x32xf32> to vector<16x32xbf16>
    %cst_419 = arith.constant dense<0.000000e+00> : vector<16x32xf32>
    %502 = tpu.matmul %501, %500, %cst_419 {dimension_numbers = #tpu.dot_dimension_numbers<[1], [0], [0], [1], [0, 0, 1, 1], [], []>} : vector<16x32xbf16>, vector<32x32xbf16>, vector<16x32xf32> -> vector<16x32xf32>
    %c2_420 = arith.constant 2 : index
    %c2_421 = arith.constant 2 : index
    %c0_422 = arith.constant 0 : index
    %c0_423 = arith.constant 0 : index
    %503 = vector.load %arg9[%c2_420, %c2_421, %c0_422, %c0_423] : memref<3x3x1x32xf32, #tpu.memory_space<vmem>>, vector<1x1x1x32xf32>
    %504 = vector.shape_cast %503 : vector<1x1x1x32xf32> to vector<1x32xf32>
    %505 = vector.broadcast %504 : vector<1x32xf32> to vector<16x32xf32>
    %506 = arith.addf %502, %505 : vector<16x32xf32>
    %507 = arith.addf %463, %506 : vector<16x32xf32>
    %508 = arith.mulf %507, %8 : vector<16x32xf32>
    %c2_424 = arith.constant 2 : index
    %c0_425 = arith.constant 0 : index
    %c0_426 = arith.constant 0 : index
    %509 = vector.load %arg10[%c2_424, %c0_425, %c0_426] : memref<3x32x128xbf16, #tpu.memory_space<vmem>>, vector<1x32x128xbf16>
    %510 = vector.shape_cast %509 : vector<1x32x128xbf16> to vector<32x128xbf16>
    %511 = arith.truncf %508 : vector<16x32xf32> to vector<16x32xbf16>
    %cst_427 = arith.constant dense<0.000000e+00> : vector<16x128xf32>
    %512 = tpu.matmul %511, %510, %cst_427 {dimension_numbers = #tpu.dot_dimension_numbers<[1], [0], [0], [1], [0, 0, 1, 1], [], []>} : vector<16x32xbf16>, vector<32x128xbf16>, vector<16x128xf32> -> vector<16x128xf32>
    %c2_428 = arith.constant 2 : index
    %c0_429 = arith.constant 0 : index
    %c0_430 = arith.constant 0 : index
    %513 = vector.load %arg11[%c2_428, %c0_429, %c0_430] : memref<3x1x128xf32, #tpu.memory_space<vmem>>, vector<1x1x128xf32>
    %514 = vector.shape_cast %513 : vector<1x1x128xf32> to vector<1x128xf32>
    %515 = vector.broadcast %514 : vector<1x128xf32> to vector<16x128xf32>
    %516 = arith.addf %512, %515 : vector<16x128xf32>
    %517 = arith.mulf %516, %10 : vector<16x128xf32>
    %518 = vector.shape_cast %517 : vector<16x128xf32> to vector<1x16x128xf32>
    %c2_431 = arith.constant 2 : index
    %c0_432 = arith.constant 0 : index
    %c0_433 = arith.constant 0 : index
    %c0_434 = arith.constant 0 : index
    %519 = vector.load %arg12[%c2_431, %c0_432, %c0_433, %c0_434] : memref<3x1x16x128xf32, #tpu.memory_space<vmem>>, vector<1x1x16x128xf32>
    %520 = vector.shape_cast %519 : vector<1x1x16x128xf32> to vector<1x16x128xf32>
    %521 = vector.shape_cast %518 : vector<1x16x128xf32> to vector<1x1x16x128xf32>
    tpu.vector_store %arg12[%c2_431, %c0_432, %c0_433, %c0_434], %521 {strides = array<i32>} : memref<3x1x16x128xf32, #tpu.memory_space<vmem>>, vector<1x1x16x128xf32>,
    return
  }
  func.func @transform_0(%arg0: i32) -> (i32, i32, i32) {
    %c0_i32 = arith.constant 0 : i32
    %c0_i32_0 = arith.constant 0 : i32
    %c0_i32_1 = arith.constant 0 : i32
    return %arg0, %c0_i32, %c0_i32_0 : i32, i32, i32
  }
  func.func @transform_1(%arg0: i32) -> (i32, i32, i32) {
    %c0_i32 = arith.constant 0 : i32
    %c0_i32_0 = arith.constant 0 : i32
    %c0_i32_1 = arith.constant 0 : i32
    return %arg0, %c0_i32, %c0_i32_0 : i32, i32, i32
  }
  func.func @transform_2(%arg0: i32) -> (i32, i32) {
    %c0_i32 = arith.constant 0 : i32
    %c0_i32_0 = arith.constant 0 : i32
    %c0_i32_1 = arith.constant 0 : i32
    return %c0_i32, %c0_i32_0 : i32, i32
  }
  func.func @transform_3(%arg0: i32) -> (i32, i32, i32) {
    %c0_i32 = arith.constant 0 : i32
    %c0_i32_0 = arith.constant 0 : i32
    %c0_i32_1 = arith.constant 0 : i32
    %c0_i32_2 = arith.constant 0 : i32
    return %c0_i32, %c0_i32_0, %c0_i32_1 : i32, i32, i32
  }
  func.func @transform_4(%arg0: i32) -> (i32, i32, i32) {
    %c0_i32 = arith.constant 0 : i32
    %c0_i32_0 = arith.constant 0 : i32
    %c0_i32_1 = arith.constant 0 : i32
    %c0_i32_2 = arith.constant 0 : i32
    return %c0_i32, %c0_i32_0, %c0_i32_1 : i32, i32, i32
  }
  func.func @transform_5(%arg0: i32) -> (i32, i32, i32, i32, i32) {
    %c0_i32 = arith.constant 0 : i32
    %c0_i32_0 = arith.constant 0 : i32
    %c0_i32_1 = arith.constant 0 : i32
    %c0_i32_2 = arith.constant 0 : i32
    %c0_i32_3 = arith.constant 0 : i32
    %c0_i32_4 = arith.constant 0 : i32
    return %c0_i32, %c0_i32_0, %c0_i32_1, %c0_i32_2, %c0_i32_3 : i32, i32, i32, i32, i32
  }
  func.func @transform_6(%arg0: i32) -> (i32, i32, i32, i32) {
    %c0_i32 = arith.constant 0 : i32
    %c0_i32_0 = arith.constant 0 : i32
    %c0_i32_1 = arith.constant 0 : i32
    %c0_i32_2 = arith.constant 0 : i32
    %c0_i32_3 = arith.constant 0 : i32
    return %c0_i32, %c0_i32_0, %c0_i32_1, %c0_i32_2 : i32, i32, i32, i32
  }
  func.func @transform_7(%arg0: i32) -> (i32, i32, i32, i32) {
    %c0_i32 = arith.constant 0 : i32
    %c0_i32_0 = arith.constant 0 : i32
    %c0_i32_1 = arith.constant 0 : i32
    %c0_i32_2 = arith.constant 0 : i32
    %c0_i32_3 = arith.constant 0 : i32
    return %c0_i32, %c0_i32_0, %c0_i32_1, %c0_i32_2 : i32, i32, i32, i32
  }
  func.func @transform_8(%arg0: i32) -> (i32, i32, i32, i32) {
    %c0_i32 = arith.constant 0 : i32
    %c0_i32_0 = arith.constant 0 : i32
    %c0_i32_1 = arith.constant 0 : i32
    %c0_i32_2 = arith.constant 0 : i32
    %c0_i32_3 = arith.constant 0 : i32
    return %c0_i32, %c0_i32_0, %c0_i32_1, %c0_i32_2 : i32, i32, i32, i32
  }
  func.func @transform_9(%arg0: i32) -> (i32, i32, i32) {
    %c0_i32 = arith.constant 0 : i32
    %c0_i32_0 = arith.constant 0 : i32
    %c0_i32_1 = arith.constant 0 : i32
    %c0_i32_2 = arith.constant 0 : i32
    return %c0_i32, %c0_i32_0, %c0_i32_1 : i32, i32, i32
  }
  func.func @transform_10(%arg0: i32) -> (i32, i32, i32) {
    %c0_i32 = arith.constant 0 : i32
    %c0_i32_0 = arith.constant 0 : i32
    %c0_i32_1 = arith.constant 0 : i32
    %c0_i32_2 = arith.constant 0 : i32
    return %c0_i32, %c0_i32_0, %c0_i32_1 : i32, i32, i32
  }
  func.func @transform_11(%arg0: i32) -> (i32, i32, i32, i32) {
    %c0_i32 = arith.constant 0 : i32
    %c0_i32_0 = arith.constant 0 : i32
    %c0_i32_1 = arith.constant 0 : i32
    %c0_i32_2 = arith.constant 0 : i32
    return %c0_i32, %arg0, %c0_i32_0, %c0_i32_1 : i32, i32, i32, i32
  }
}

</mosaic_0001>

<bundles_post_ra>
// kernel: tpu_custom_call.1
= control target key start
LH: loop header
LB: loop body
LE: loop exit
PB: predicated region body
PF: predicated region fallthrough
CT: control target
= control target key end

     0   :  { %s6404_s0 = inlined_call_operand.vmem [shape: f32[2,16,128], index: 0, kind: input, shape index: {}]   ;;  %s6405_s1 = inlined_call_operand.vmem [shape: f32[2,16,1], index: 1, kind: input, shape index: {}]   ;;  %s6406_s2 = inlined_call_operand.vmem [shape: bf16[128,32], index: 2, kind: input, shape index: {}]   ;;  %s6407_s3 = inlined_call_operand.vmem [shape: bf16[2,128,32], index: 3, kind: input, shape index: {}]   ;;  %s6408_s4 = inlined_call_operand.vmem [shape: f32[3,1,32], index: 4, kind: input, shape index: {}]   ;;  %s6409_s5 = inlined_call_operand.hbm [shape: bf16[3,3,3,32,32], index: 5, kind: input, shape index: {}]   ;;  %s6410_s6 = inlined_call_operand.vmem [shape: f32[3,3,1,32], index: 6, kind: input, shape index: {}]   ;;  %s6411_s7 = inlined_call_operand.vmem [shape: bf16[3,3,32,32], index: 7, kind: input, shape index: {}]   ;;  %s6412_s8 = inlined_call_operand.vmem [shape: f32[3,3,1,32], index: 8, kind: input, shape index: {}]   ;;  %s6413_s9 = inlined_call_operand.vmem [shape: bf16[3,32,128], index: 9, kind: input, shape index: {}]   ;;  %s6414_s10 = inlined_call_operand.vmem [shape: f32[3,1,128], index: 10, kind: input, shape index: {}]   ;;  %s6415_s11 = inlined_call_operand.hbm [shape: f32[3,2,16,128], index: 11, kind: output, shape index: {}]  }
   0x1   :  { %6431 = sst [smem:[#allocation11_spill]] %s6409_s5 }
   0x2   :  { %16 = vsyncpa [#allocation4], 0 }
   0x3   :  { %17 = vsyncpa [#allocation5], 0 }
   0x4   :  { %19 = vsyncpa [#allocation5 + $0x1], 0  ;;  %s5429_s17 = smov 0   ;;  %s5431_s18 = smov 0  }
   0x5   :  { %s5433_s19 = smov 0   ;;  %s5435_s20 = smov 0  }
   0x6 LB: > { %s5450_s21 = sadd.s32 4294967295, %s5353_s20   ;;  %s4250_s22 = sadd.s32 4294967294, %s5353_s20   ;;  %s5353_s20 = sphi %s5435_s20, %s6487_s20   ;;  %s5349_s19 = sphi %s5433_s19, %s6486_s19   ;;  %s5345_s18 = sphi %s5431_s18, %s6485_s18   ;;  %s5341_s17 = sphi %s5429_s17, %s6484_s17  }
   0x7   : > { %s5454_s23 = sadd.s32 1, %s5353_s20   ;;  %s273_s24 = sadd.s32 1, %s5349_s19 }
   0x8   : > { %s270_s25 = ssub.s32 %s5353_s20, %s5454_s23  ;;  %p283_p0 = scmp.ne.s32.totalorder %s5349_s19, %s5345_s18 }
   0x9   : > { %p271_p1 = scmp.eq.s32.totalorder %s270_s25, 0  ;;  %p284_p2 = scmp.eq.s32.totalorder %s5450_s21, 1 }
   0xa   : > { %p289_p3 = scmp.ne.s32.totalorder %s5345_s18, %s5341_s17  ;;  %p290_p4 = scmp.eq.s32.totalorder %s4250_s22, 1 }
   0xb   : > { %s5465_s26 = scalar_select %p271_p1, %s5349_s19, %s273_s24  }
   0xc   : > { %p5467_p5 = por %p284_p2, %p283_p0  ;;  %p5471_p6 = por %p290_p4, %p289_p3 }
   0xd   : > { %p4251_p7 = scmp.ge.s32.totalorder %s5353_s20, 1  ;;  %p297_p8 = scmp.lt.s32.totalorder %s5353_s20, 3 }
   0xe   : > { %s6433_s28 = scalar_select %p5471_p6, 1, 0 }
   0xf   : > { %p5121_p9 = scmp.eq.s32.totalorder %s5450_s21, 0  ;;  %p5478_p10 = pnand %p4251_p7, %p297_p8 }
  0x10   : > { %s5355_s30 = smov [#allocation3]  }
  0x11   : > { %s318_s12 = sshll.u32 %s5355_s30, 4  ;;  %p5113_p11 = pneg %p5478_p10  ;;  %s319_s12 = int_to_ptr.vmem [resolvable:$true] %s318_s12 }
  0x12   : > { %s5300_s13 = scalar_lea.vmem %s319_s12, 6912  ;;  %p5308_p3 = scmp.lt.s32.totalorder %s319_s12, %s319_s12 }
  0x13   : > { %p5114_p12 = pnand %p5121_p9, %p5113_p11  ;;  %p5301_p0 = scmp.ne.s32.totalorder %s319_s12, %s5300_s13 }
  0x14   : > { %p5309_p4 = scmp.lt.s32.totalorder %s5300_s13, %s5300_s13 }
  0x15   : > { %p5291_p13 = pneg %p5114_p12 }
  0x16   : > { %p5310_p6 = por %p5309_p4, %p5308_p3 }
  0x17   : > { %p5303_p1 = pnand %p5301_p0, %p5291_p13 }
  0x19   : > { %p5304_p2 = pneg %p5303_p1 }
  0x1b   : > { %p5311_p7 = pnand %p5310_p6, %p5304_p2 }
  0x1d   : > { %5314 = shalt.err (!%p5311_p7)
}
  0x1e   : > { %s5356_s14 = smov 64   ;;  %s5357_s15 = smov 4  }
  0x1f   : > { %s6435_s5 = sld [smem:[#allocation11_spill]] }
  0x21   : > { %365 = sbr.rel (%p5478_p10) target bundleno = 5783 (0x1697), region = 64 }
  0x25   : > { %5116 = dma.hbm_to_vmem [thread:$0]  (!%p5114_p12), %s6435_s5, 6912, %s319_s12, [#allocation4], %s5356_s14, %s5356_s14, %s5357_s15  }
  0x26   : > { %5332 = dma.done.wait (%p5121_p9), [#allocation4], 6912  }
  0x27   : > { %5334 = vsyncadd (%p5121_p9), [#allocation4], 4294960384  ;;  %v5358_v0 = vmov 0.0   ;;  %vm5359_vm0 = vmmov 0   ;;  %v5171_v1 = vld [vmem:[%s6406_s2 + $0x38] sm:$0xff]   ;;  %p410_p6 = scmp.lt.s32.totalorder %s5450_s21, 1  ;;  %v440_v15 = vlaneseq }
  0x28   : > { %4728 = vmatprep.subr.bf16.mxu0 %v5358_v0  ;;  %4744 = vmatprep.mubr.msk.bf16.mxu0 %vm5359_vm0, %v5358_v0  ;;  %v5172_v2 = vld [vmem:[%s6406_s2 + $0x30] sm:$0xff]   ;;  %v5173_v3 = vld [vmem:[%s6406_s2 + $0x28] sm:$0xff]   ;;  %v5174_v4 = vld [vmem:[%s6406_s2 + $0x20] sm:$0xff]   ;;  %vm423_vm1 = vcmask 257024   ;;  %v5360_v13 = vmov 0   ;;  %vm5361_vm5 = vmmov 1  }
  0x29   : > { %4748 = vmatprep.subr.bf16.mxu1 %v5358_v0  ;;  %4752 = vmatprep.mubr.msk.bf16.mxu1 %vm5359_vm0, %v5358_v0  ;;  %s5510_s12 = scalar_select %p410_p6, %s5450_s21, 1  ;;  %v5175_v5 = vld [vmem:[%s6406_s2 + $0x18] sm:$0xff]   ;;  %v5176_v6 = vld [vmem:[%s6406_s2 + $0x10] sm:$0xff]   ;;  %v5177_v7 = vld [vmem:[%s6406_s2 + $0x8] sm:$0xff]   ;;  %424 = vst.msk [vmem:[#allocation2] sm:$0xf] %vm423_vm1, %v5360_v13 }
  0x2a   : > { %4729 = vmatpush3.bf16.msra.mxu0 %v5171_v1  ;;  %v5178_v8 = vld [vmem:[%s6406_s2] sm:$0xff]   ;;  %v5179_v12 = vld [vmem:[#allocation3 + $0x18] sm:$0xff]   ;;  %425 = vst.msk [vmem:[#allocation2 + $0xc] sm:$0xf] %vm423_vm1, %v5360_v13  ;;  %5170 = vset.pattern.permute.xlu0 %v5360_v13  ;;  %v441_v16 = vshrl.u32 %v440_v15, 7  ;;  %vm604_vm6 = vmpackc.low %vm5361_vm5, %vm5361_vm5  ;;  %vm692_vm13 = vcmask 261120  }
  0x2b   : > { %4730 = vmatprep.subr.bf16.mxu0 %v5358_v0  ;;  %s4563_s22 = sshll.u32 %s5510_s12, 4  ;;  %4749 = vmatpush3.bf16.msra.mxu1 %v5179_v12  ;;  %v5180_v14 = vld [vmem:[#allocation3 + $0x10] sm:$0xff]   ;;  %v5563_v25 = vsel %vm604_vm6, 65537, %v5360_v13  ;;  %vm607_vm8 = vsmask.f32 3328  ;;  %v5181_v46 = vld [vmem:[#allocation3 + $0x8] sm:$0xff]  }
  0x2c   : > { %s414_s24 = scalar_lea.vmem %s6404_s0, %s4563_s22  ;;  %4750 = vmatprep.subr.bf16.mxu1 %v5358_v0  ;;  %v5553_v17 = vand.u32 15, %v441_v16  ;;  %v442_v18 = vadd.s32 8, %v441_v16  ;;  %v4260_v27 = vld [vmem:[%s6408_s4] ss:$0 sm:$0xff]  ;;  %v620_v29 = vshll.u32 %v5563_v25, 16  ;;  %v624_v32 = vshrl.u32 %v5563_v25, 16  ;;  %s419_s25 = scalar_lea.vmem %s6405_s1, %s4563_s22 }
  0x2d   : > { %v426_v9 = vld [vmem:[%s414_s24] sm:$0xff]  ;;  %v427_v10 = vld [vmem:[%s414_s24 + $0x8] sm:$0xff]  ;;  %vm608_vm9 = vsmask.f32 7440  ;;  %vm645_vm11 = vsmask.f32 256 }
  0x2e   : > { %4731 = vmatpush3.bf16.msra.mxu0 %v5172_v2  ;;  %v486_v11 = vpack.c.bf16 %v427_v10, %v426_v9  ;;  %vm597_vm2 = vcmp.ge.s32.totalorder %v5553_v17, 1  ;;  %v5556_v19 = vand.u32 15, %v442_v18  ;;  %v622_v36 = vrot.slane %v620_v29, 5  ;;  %vm5576_vm10 = vmor %vm607_vm8, %vm608_vm9  ;;  %v5182_v54 = vld [vmem:[#allocation3] sm:$0xff]   ;;  %v5186_v39 = vld [vmem:[%s6411_s7] sm:$0xff]   ;;  %s407_s22 = sand.u32 1, %s5345_s18  }
  0x2f   : > { %4732 = vmatprep.subr.bf16.mxu0 %v5358_v0  ;;  %4751 = vmatpush3.bf16.msra.mxu1 %v5180_v14  ;;  %vm603_vm3 = vmpackc.low %vm597_vm2, %vm597_vm2  ;;  %v626_v37 = vrot.slane %v624_v32, 4  ;;  %vm646_vm12 = vsmask.f32 4368  ;;  %v651_v44 = vrot.slane %v624_v32, 7  ;;  %v5184_v32 = vld [vmem:[#allocation3 + $0x20] sm:$0xff]   ;;  %vm1002_vm9 = vcmp.ge.s32.totalorder %v5553_v17, 2 }
  0x30   : > { %4756 = vmatprep.subr.bf16.mxu1 %v5358_v0  ;;  %v605_v20 = vsel %vm603_vm3, 65537, %v5360_v13  ;;  %vm636_vm4 = vcmp.lt.s32.totalorder %v5556_v19, 15  ;;  %v593_v53 = vld [vmem:[#allocation2] sm:$0x8]  ;;  %vm647_vm15 = vmor %vm645_vm11, %vm646_vm12  ;;  %vm6416_vm8 = vsmask.f32 7424 }
  0x31   : > { %v611_v21 = vshll.u32 %v605_v20, 16  ;;  %v614_v22 = vshrl.u32 %v605_v20, 16  ;;  %vm642_vm7 = vmpackc.low %vm636_vm4, %vm636_vm4  ;;  %v627_v48 = vor.u32 %v626_v37, %v622_v36  ;;  %v655_v51 = vrot.slane %v651_v44, 4  ;;  %v596_v1 = vld [vmem:[#allocation2 + $0xc] sm:$0x1]  ;;  %s5100_s13 = smul.u32 48, %s407_s22 }
  0x32   : > { %4733 = vmatpush3.bf16.msra.mxu0 %v5173_v3  ;;  %v644_v26 = vsel %vm642_vm7, 65537, %v5360_v13  ;;  %v5600_v57 = vor.u32 %v651_v44, %v620_v29  ;;  %vm6423_vm7 = vsmask.f32 4352  ;;  %vm1008_vm11 = vmpackc.low %vm1002_vm9, %vm1002_vm9  ;;  %vm1013_vm9 = vcmask 1046532   ;;  %s4128_s29 = scalar_lea.sflag [#allocation5], %s407_s22 }
  0x33   : > { %4734 = vmatprep.subr.bf16.mxu0 %v5358_v0  ;;  %v5560_v23 = vrot.slane %v611_v21, 5  ;;  %v616_v24 = vrot.slane %v614_v22, 4  ;;  %v657_v30 = vshrl.u32 %v644_v26, 16  ;;  %v660_v41 = vshll.u32 %v644_v26, 16  ;;  %s5875_s14 = scalar_lea.vmem [#allocation6], %s5100_s13 }
  0x34   : > { %v5594_v55 = vrot.slane %v627_v48, 4  ;;  %vm6428_vm4 = vcmp.ne.s16.totalorder %v5600_v57, 0 }
  0x35   : > { %v617_v28 = vor.u32 %v616_v24, %v5560_v23  ;;  %v659_v40 = vrot.slane %v657_v30, 7  ;;  %vm6427_vm14 = vcmp.ne.s16.totalorder %v5560_v23, 0 }
  0x36   : > { %4735 = vmatpush3.bf16.msra.mxu0 %v5174_v4  ;;  %v632_v58 = vsel %vm6427_vm14, %v593_v53, 0  ;;  %vm6429_vm3 = vcmp.ne.s16.totalorder %v5594_v55, 0 }
  0x37   : > { %4736 = vmatprep.subr.bf16.mxu0 %v5358_v0  ;;  %v618_v35 = vrot.slane %v617_v28, 4  ;;  %v662_v52 = vor.u32 %v660_v41, %v659_v40  ;;  %v664_v61 = vrot.slane %v659_v40, 4  ;;  %v5183_v28 = vld [vmem:[#allocation3 + $0x28] sm:$0xff]   ;;  %v428_v40 = vld [vmem:[%s419_s25] sm:$0xff]  ;;  %v429_v41 = vld [vmem:[%s419_s25 + $0x8] sm:$0xff] }
  0x38   : > { %432 = vperm.xlu0 %5170, %v428_v40  }
  0x39   : > { %v623_v47 = vsel %vm5576_vm10, %v618_v35, %v622_v36  ;;  %v5605_v59 = vsel %vm647_vm15, %v655_v51, %v662_v52  ;;  %vm5613_vm6 = vcmp.ne.s16.totalorder %v664_v61, 0  ;;  %vm1027_vm10 = vcmp.lt.s32.totalorder %v5556_v19, 14 }
  0x3a   : > { %4737 = vmatpush3.bf16.msra.mxu0 %v5175_v5  ;;  %vm5596_vm2 = vcmp.ne.s16.totalorder %v623_v47, 0  ;;  %vm6424_vm5 = vcmp.ne.s16.totalorder %v5605_v59, 0  ;;  %vm1033_vm12 = vmpackc.low %vm1027_vm10, %vm1027_vm10  ;;  %vm1012_vm15 = vcmask 1042432   ;;  %v5252_v5 = vld [vmem:[#allocation3 + $0x140] sm:$0xff]  }
  0x3b   : > { %4738 = vmatprep.subr.bf16.mxu0 %v5358_v0  ;;  %vm1014_vm10 = vmor %vm1012_vm15, %vm1013_vm9 }
  0x3c   : > { %437 = vperm.xlu0 %5170, %v429_v41  }
  0x3e   : > { %4739 = vmatpush3.bf16.msra.mxu0 %v5176_v6 }
  0x3f   : > { %4740 = vmatprep.subr.bf16.mxu0 %v5358_v0 }
  0x42   : > { %4741 = vmatpush3.bf16.msra.mxu0 %v5177_v7 }
  0x43   : > { %4742 = vmatprep.subr.bf16.mxu0 %v5358_v0 }
  0x46   : > { %4743 = vmatpush3.bf16.msra.mxu0 %v5178_v8 }
  0x47   : > { %4780 = vmatprep.subr.bf16.mxu0 %v5358_v0 }
  0x49   : > { %4745 = vmatmul.mubr.bf16.vlgmr.msra.gmra.mxu0 %v486_v11  ;;  %v670_v11 = vsel %vm5613_vm6, %v596_v1, 0 }
  0x4a   : > { %4784 = vmatprep.mubr.msk.bf16.mxu0 %vm5359_vm0, %v5358_v0  ;;  %v4280_v22 = vcombine.low %v670_v11, %v670_v11  ;;  %v4285_v11 = vld [vmem:[%s6412_s8] ss:$0 sm:$0xff] }
 0x109   : > { %v576_v31 = vpop.f32.mrf.mxu0 }
 0x10a   : > { %v5572_v33 = vadd.f32 %v4260_v27, %v576_v31  ;;  %v841_v31 = vshll.u32 %v4280_v22, 16 }
 0x10b   : > { %v4746_v34 = vpop.f32.mrf.mxu0 }
 0x10c   : > { %v4565_v38 = vpack.c.bf16 %v5572_v33, %v5572_v33  ;;  %v843_v36 = vrot.slane %v841_v31, 1 }
 0x10d   : > { %v579_v42 = vpop.f32.mrf.mxu0 }
 0x10e   : > { %591 = vst.msk [vmem:[#allocation2 + $0x4] sm:$0xf] %vm423_vm1, %v4565_v38  ;;  %v5581_v43 = vadd.f32 %v4260_v27, %v579_v42  ;;  %v5185_v38 = vld [vmem:[%s6411_s7 + $0x8] sm:$0xff]  }
 0x10f   : > { %v4747_v45 = vpop.f32.mrf.mxu0 }
 0x110   : > { %v583_v49 = vpack.c.bf16 %v5581_v43, %v5572_v33  ;;  %v4566_v50 = vpack.c.bf16 %v5581_v43, %v5581_v43 }
 0x112   : > { %592 = vst.msk [vmem:[#allocation2 + $0x8] sm:$0xf] %vm423_vm1, %v4566_v50  ;;  %4753 = vmatmul.mubr.msk.bf16.vlgmr.msra.gmra.mxu1 %vm692_vm13, %v583_v49 }
 0x113   : > { %4757 = vmatpush3.bf16.msra.mxu1 %v5181_v46  ;;  %4760 = vmatprep.mubr.msk.bf16.mxu1 %vm5359_vm0, %v5358_v0 }
 0x114   : > { %4758 = vmatprep.subr.bf16.mxu1 %v5358_v0 }
 0x115   : > { %v594_v60 = vld [vmem:[#allocation2 + $0x4] sm:$0xf] }
 0x116   : > { %v633_v62 = vsel %vm5596_vm2, %v594_v60, 0  ;;  %v668_v7 = vsel %vm6428_vm4, %v594_v60, 0 }
 0x117   : > { %4759 = vmatpush3.bf16.msra.mxu1 %v5182_v54  ;;  %v4274_v63 = vcombine.low %v632_v58, %v633_v62  ;;  %v4284_v54 = vld [vmem:[%s6410_s6] ss:$0 sm:$0xff] }
 0x118   : > { %4764 = vmatprep.subr.bf16.mxu1 %v5358_v0 }
 0x119   : > { %v595_v2 = vld [vmem:[#allocation2 + $0x8] sm:$0xf]  ;;  %v747_v3 = vshrl.u32 %v4274_v63, 16  ;;  %v750_v4 = vshll.u32 %v4274_v63, 16 }
 0x11a   : > { %v634_v6 = vsel %vm6429_vm3, %v595_v2, 0  ;;  %v669_v8 = vsel %vm6424_vm5, %v595_v2, 0 }
 0x11b   : > { %v4275_v9 = vcombine.low %v634_v6, %v634_v6  ;;  %v4279_v10 = vcombine.low %v668_v7, %v669_v8  ;;  %v749_v12 = vrot.slane %v747_v3, 3  ;;  %v752_v14 = vrot.slane %v750_v4, 4  ;;  %v5187_v7 = vld [vmem:[#allocation3 + $0x48] sm:$0xff]   ;;  %v5188_v8 = vld [vmem:[#allocation3 + $0x40] sm:$0xff]  }
 0x11c   : > { %4781 = vmatpush3.bf16.msra.mxu0 %v5187_v7 }
 0x11d   : > { %v755_v16 = vshrl.u32 %v4275_v9, 16  ;;  %v758_v18 = vshll.u32 %v4275_v9, 16  ;;  %v836_v24 = vshll.u32 %v4279_v10, 16  ;;  %v753_v26 = vor.u32 %v752_v14, %v749_v12  ;;  %4782 = vmatprep.subr.bf16.mxu0 %v5358_v0  ;;  %v5189_v9 = vld [vmem:[#allocation3 + $0x38] sm:$0xff]  }
 0x11e   : > { %v834_v34 = vshrl.u32 %v4279_v10, 16  ;;  %v5191_v10 = vld [vmem:[#allocation3 + $0x30] sm:$0xff]   ;;  %v1010_v12 = vsel %vm1008_vm11, 65537, %v5360_v13  ;;  %vm1036_vm11 = vcmask 1040384  }
 0x11f   : > { %v757_v20 = vrot.slane %v755_v16, 3  ;;  %v760_v21 = vrot.slane %v758_v18, 4  ;;  %v838_v30 = vrot.slane %v836_v24, 1  ;;  %v1035_v18 = vsel %vm1033_vm12, 65537, %v5360_v13 }
 0x120   : > { %4783 = vmatpush3.bf16.msra.mxu0 %v5188_v8  ;;  %v1015_v22 = vrot.slane %v1010_v12, 5  ;;  %vm1037_vm12 = vcmask 1044484  }
 0x121   : > { %v761_v27 = vor.u32 %v760_v21, %v757_v20  ;;  %v839_v35 = vor.u32 %v838_v30, %v834_v34  ;;  %4796 = vmatprep.subr.bf16.mxu0 %v5358_v0  ;;  %v5665_v20 = vpop.permute.xlu0 %432  ;;  %vm1038_vm15 = vmor %vm1036_vm11, %vm1037_vm12 }
 0x122   : > { %v1016_v31 = vrot.slane %v1015_v22, 4 }
 0x123   : > { %v762_v29 = vsel %vm6423_vm7, %v753_v26, %v761_v27  ;;  %v844_v37 = vsel %vm6416_vm8, %v839_v35, %v843_v36  ;;  %v1041_v27 = vrot.slane %v1035_v18, 7  ;;  %v1017_v35 = vrot.slane %v5563_v25, 5 }
 0x124   : > { %4761 = vmatmul.mubr.msk.bf16.vlgmr.msra.gmra.mxu1 %vm692_vm13, %v762_v29  ;;  %v1039_v36 = vrot.slane %v5563_v25, 7  ;;  %vm5697_vm8 = vcmp.ne.s16.totalorder %v1015_v22, 0  ;;  %vm1372_vm7 = vcmask 1045508  }
 0x125   : > { %4765 = vmatpush3.bf16.msra.mxu1 %v5183_v28  ;;  %4768 = vmatprep.mubr.msk.bf16.mxu1 %vm5359_vm0, %v5358_v0  ;;  %v5688_v41 = vsel %vm1014_vm10, %v1016_v31, %v1017_v35 }
 0x126   : > { %4766 = vmatprep.subr.bf16.mxu1 %v5358_v0  ;;  %vm6417_vm10 = vcmp.ne.s16.totalorder %v5688_v41, 0  ;;  %vm5712_vm12 = vcmp.ne.s16.totalorder %v1039_v36, 0 }
 0x129   : > { %4767 = vmatpush3.bf16.msra.mxu1 %v5184_v32 }
 0x12a   : > { %4772 = vmatprep.subr.bf16.mxu1 %v5358_v0 }
 0x12c   : > { %4769 = vmatmul.mubr.msk.bf16.vlgmr.msra.gmra.mxu1 %vm692_vm13, %v844_v37  ;;  %v5678_v37 = vrot.slane %v1041_v27, 4 }
 0x12d   : > { %4776 = vmatprep.mubr.msk.bf16.mxu1 %vm5359_vm0, %v5358_v0  ;;  %4773 = vmatpush3.bf16.msra.mxu1 %v5185_v38 }
 0x12e   : > { %4774 = vmatprep.subr.bf16.mxu1 %v5358_v0  ;;  %vm6418_vm9 = vcmp.ne.s16.totalorder %v5678_v37, 0 }
 0x131   : > { %4775 = vmatpush3.bf16.msra.mxu1 %v5186_v39  ;;  %v5190_v39 = vld [vmem:[#allocation3 + $0x58] sm:$0xff]  }
 0x132   : > { %4788 = vmatprep.subr.bf16.mxu1 %v5358_v0 }
 0x1d2   : > { %v730_v42 = vpop.f32.mrf.mxu1 }
 0x1d4   : > { %v4754_v44 = vpop.f32.mrf.mxu1 }
 0x1d5   : > { %v1001_v44 = vld [vmem:[#allocation2 + $0xc] sm:$0x1] }
 0x1d6   : > { %v733_v45 = vpop.f32.mrf.mxu1 }
 0x1d8   : > { %v4755_v46 = vpop.f32.mrf.mxu1 }
 0x1d9   : > { %v996_v46 = vld [vmem:[#allocation2] sm:$0x8] }
 0x1e4   : > { %v812_v47 = vpop.f32.mrf.mxu1 }
 0x1e5   : > { %v813_v51 = vadd.f32 %v812_v47, %v730_v42  ;;  %v1040_v42 = vrot.slane %v1039_v36, 4  ;;  %v5695_v47 = vrot.slane %v1017_v35, 4 }
 0x1e6   : > { %v4762_v48 = vpop.f32.mrf.mxu1 }
 0x1e7   : > { %vm6422_vm11 = vcmp.ne.s16.totalorder %v5695_v47, 0 }
 0x1e8   : > { %v815_v49 = vpop.f32.mrf.mxu1 }
 0x1e9   : > { %v816_v60 = vadd.f32 %v815_v49, %v733_v45  ;;  %v5192_v45 = vld [vmem:[#allocation3 + $0x50] sm:$0xff]   ;;  %v5703_v49 = vsel %vm1038_vm15, %v1040_v42, %v1041_v27 }
 0x1ea   : > { %v4763_v50 = vpop.f32.mrf.mxu1  ;;  %vm6421_vm15 = vcmp.ne.s16.totalorder %v5703_v49, 0 }
 0x1eb   : > { %v1049_v50 = vsel %vm6418_vm9, %v1001_v44, 0  ;;  %vm6419_vm9 = vcmask 1046528  }
 0x1ec   : > { %v894_v52 = vpop.f32.mrf.mxu1 }
 0x1ed   : > { %v901_v53 = vadd.f32 %v894_v52, %v813_v51  ;;  %v1023_v52 = vsel %vm5697_vm8, %v996_v46, 0 }
 0x1ee   : > { %v4770_v58 = vpop.f32.mrf.mxu1 }
 0x1ef   : > { %v910_v62 = vadd.f32 %v4284_v54, %v901_v53 }
 0x1f0   : > { %v897_v61 = vpop.f32.mrf.mxu1 }
 0x1f1   : > { %v902_v63 = vadd.f32 %v897_v61, %v816_v60  ;;  %v912_v3 = vmax.f32 %v910_v62, 0.0  ;;  %v4300_v60 = vcombine.low %v1049_v50, %v1049_v50 }
 0x1f2   : > { %v4771_v1 = vpop.f32.mrf.mxu1 }
 0x1f3   : > { %v911_v2 = vadd.f32 %v4284_v54, %v902_v63  ;;  %v1199_v7 = vrot.slane %v4300_v60, 1  ;;  %v5199_v60 = vld [vmem:[#allocation3 + $0x60] sm:$0xff]  }
 0x1f5   : > { %v913_v4 = vmax.f32 %v911_v2, 0.0 }
 0x1f7   : > { %v918_v6 = vpack.c.bf16 %v913_v4, %v912_v3 }
 0x1f9   : > { %4777 = vmatmul.mubr.msk.bf16.vlgmr.msra.gmra.mxu1 %vm692_vm13, %v918_v6 }
 0x1fa   : > { %4792 = vmatprep.mubr.msk.bf16.mxu1 %vm5359_vm0, %v5358_v0  ;;  %4789 = vmatpush3.bf16.msra.mxu1 %v5189_v9 }
 0x1fb   : > { %4790 = vmatprep.subr.bf16.mxu1 %v5358_v0 }
 0x1fe   : > { %4791 = vmatpush3.bf16.msra.mxu1 %v5191_v10 }
 0x1ff   : > { %4804 = vmatprep.subr.bf16.mxu1 %v5358_v0 }
 0x2b9   : > { %v975_v14 = vpop.f32.mrf.mxu1 }
 0x2ba   : > { %v976_v16 = vadd.f32 %v4285_v11, %v975_v14  ;;  %v5193_v14 = vld [vmem:[%s6411_s7 + $0x18] sm:$0xff]  }
 0x2bb   : > { %v4778_v21 = vpop.f32.mrf.mxu1 }
 0x2bc   : > { %v982_v24 = vadd.f32 %v976_v16, %v5572_v33  ;;  %v5676_v33 = vpop.permute.xlu0 %437  ;;  %v5194_v16 = vld [vmem:[%s6411_s7 + $0x10] sm:$0xff]  }
 0x2bd   : > { %v978_v26 = vpop.f32.mrf.mxu1 }
 0x2be   : > { %v5669_v28 = vmul.f32 %v982_v24, %v5665_v20  ;;  %v979_v29 = vadd.f32 %v4285_v11, %v978_v26 }
 0x2bf   : > { %v4779_v30 = vpop.f32.mrf.mxu1 }
 0x2c0   : > { %v4567_v32 = vpack.c.bf16 %v5669_v28, %v5669_v28  ;;  %v983_v34 = vadd.f32 %v979_v29, %v5581_v43 }
 0x2c2   : > { %994 = vst.msk [vmem:[#allocation2 + $0x4] sm:$0xf] %vm423_vm1, %v4567_v32  ;;  %v5682_v38 = vmul.f32 %v983_v34, %v5676_v33  ;;  %v4305_v34 = vld [vmem:[%s6410_s6 + $0x1] ss:$0 sm:$0xff] }
 0x2c4   : > { %v986_v43 = vpack.c.bf16 %v5682_v38, %v5669_v28  ;;  %v4568_v40 = vpack.c.bf16 %v5682_v38, %v5682_v38 }
 0x2c6   : > { %995 = vst.msk [vmem:[#allocation2 + $0x8] sm:$0xf] %vm423_vm1, %v4568_v40  ;;  %4785 = vmatmul.mubr.msk.bf16.vlgmr.msra.gmra.mxu0 %vm692_vm13, %v986_v43 }
 0x2c7   : > { %4797 = vmatpush3.bf16.msra.mxu0 %v5190_v39  ;;  %4800 = vmatprep.mubr.msk.bf16.mxu0 %vm5359_vm0, %v5358_v0 }
 0x2c8   : > { %4798 = vmatprep.subr.bf16.mxu0 %v5358_v0 }
 0x2c9   : > { %v997_v51 = vld [vmem:[#allocation2 + $0x4] sm:$0xf] }
 0x2ca   : > { %v1024_v53 = vsel %vm6417_vm10, %v997_v51, 0  ;;  %v999_v54 = vld [vmem:[#allocation2 + $0x4] sm:$0xe]  ;;  %vm6420_vm10 = vcmask 1044480  }
 0x2cb   : > { %4799 = vmatpush3.bf16.msra.mxu0 %v5192_v45  ;;  %v4294_v62 = vcombine.low %v1023_v52, %v1024_v53  ;;  %v1047_v2 = vsel %vm5712_vm12, %v999_v54, 0  ;;  %v5195_v52 = vld [vmem:[#allocation3 + $0x78] sm:$0xff]   ;;  %v5196_v53 = vld [vmem:[#allocation3 + $0x70] sm:$0xff]   ;;  %v5197_v54 = vld [vmem:[#allocation3 + $0x68] sm:$0xff]  }
 0x2cc   : > { %4812 = vmatprep.subr.bf16.mxu0 %v5358_v0 }
 0x2cd   : > { %v998_v61 = vld [vmem:[#allocation2 + $0x8] sm:$0x7]  ;;  %v1125_v8 = vrot.slane %v4294_v62, 3 }
 0x2ce   : > { %v1000_v63 = vld [vmem:[#allocation2 + $0x8] sm:$0xf]  ;;  %v1025_v1 = vsel %vm6422_vm11, %v998_v61, 0  ;;  %v4311_v61 = vld [vmem:[%s6412_s8 + $0x1] ss:$0 sm:$0xff] }
 0x2cf   : > { %v1048_v3 = vsel %vm6421_vm15, %v1000_v63, 0  ;;  %v4295_v4 = vcombine.low %v1025_v1, %v1025_v1 }
 0x2d0   : > { %v4299_v6 = vcombine.low %v1047_v2, %v1048_v3 }
 0x2d1   : > { %v1126_v9 = vrot.slane %v4295_v4, 3 }
 0x2d2   : > { %v1198_v10 = vrot.slane %v4299_v6, 1 }
 0x2d3   : > { %v1127_v11 = vsel %vm6420_vm10, %v1125_v8, %v1126_v9  ;;  %vm1386_vm10 = vcmp.lt.s32.totalorder %v5556_v19, 12 }
 0x2d4   : > { %v1200_v12 = vsel %vm6419_vm9, %v1198_v10, %v1199_v7  ;;  %4793 = vmatmul.mubr.msk.bf16.vlgmr.msra.gmra.mxu1 %vm692_vm13, %v1127_v11  ;;  %vm1361_vm9 = vcmp.ge.s32.totalorder %v5553_v17, 4  ;;  %vm1392_vm11 = vmpackc.low %vm1386_vm10, %vm1386_vm10 }
 0x2d5   : > { %4801 = vmatmul.mubr.msk.bf16.vlgmr.msra.gmra.mxu0 %vm692_vm13, %v1200_v12  ;;  %4808 = vmatprep.mubr.msk.bf16.mxu1 %vm5359_vm0, %v5358_v0  ;;  %vm1367_vm15 = vmpackc.low %vm1361_vm9, %vm1361_vm9  ;;  %v1394_v2 = vsel %vm1392_vm11, 65537, %v5360_v13  ;;  %vm1371_vm9 = vcmask 1041408  }
 0x2d6   : > { %4816 = vmatprep.mubr.msk.bf16.mxu0 %vm5359_vm0, %v5358_v0  ;;  %4805 = vmatpush3.bf16.msra.mxu1 %v5193_v14  ;;  %v1369_v63 = vsel %vm1367_vm15, 65537, %v5360_v13  ;;  %v1397_v17 = vrot.slane %v1394_v2, 6  ;;  %v5765_v13 = vrot.slane %v5563_v25, 6  ;;  %vm5767_vm10 = vmor %vm1371_vm9, %vm1372_vm7  ;;  %v5201_v2 = vld [vmem:[%s6411_s7 + $0x28] sm:$0xff]  }
 0x2d7   : > { %4806 = vmatprep.subr.bf16.mxu1 %v5358_v0  ;;  %4813 = vmatpush3.bf16.msra.mxu0 %v5195_v52  ;;  %v1374_v6 = vrot.slane %v1369_v63, 6 }
 0x2d8   : > { %4814 = vmatprep.subr.bf16.mxu0 %v5358_v0  ;;  %v5771_v14 = vrot.slane %v1397_v17, 4  ;;  %vm1400_vm5 = vcmp.ne.s16.totalorder %v5765_v13, 0 }
 0x2d9   : > { %v1375_v12 = vrot.slane %v1374_v6, 4  ;;  %vm5790_vm11 = vcmp.ne.s16.totalorder %v1374_v6, 0 }
 0x2da   : > { %4807 = vmatpush3.bf16.msra.mxu1 %v5194_v16  ;;  %vm6425_vm7 = vcmp.ne.s16.totalorder %v5771_v14, 0 }
 0x2db   : > { %4820 = vmatprep.subr.bf16.mxu1 %v5358_v0  ;;  %4815 = vmatpush3.bf16.msra.mxu0 %v5196_v53  ;;  %v1377_v25 = vsel %vm5767_vm10, %v1375_v12, %v5765_v13 }
 0x2dc   : > { %4828 = vmatprep.subr.bf16.mxu0 %v5358_v0  ;;  %vm5794_vm15 = vcmp.ne.s16.totalorder %v1377_v25, 0 }
 0x386   : > { %v1109_v18 = vpop.f32.mrf.mxu0 }
 0x388   : > { %v4786_v21 = vpop.f32.mrf.mxu0 }
 0x38a   : > { %v1112_v22 = vpop.f32.mrf.mxu0 }
 0x38c   : > { %v4787_v24 = vpop.f32.mrf.mxu0 }
 0x38d   : > { %v1360_v24 = vld [vmem:[#allocation2 + $0xc] sm:$0x3] }
 0x394   : > { %v1177_v26 = vpop.f32.mrf.mxu1 }
 0x395   : > { %v1250_v27 = vpop.f32.mrf.mxu0  ;;  %v1178_v29 = vadd.f32 %v1177_v26, %v1109_v18  ;;  %v5198_v18 = vld [vmem:[#allocation3 + $0x88] sm:$0xff]   ;;  %v5200_v26 = vld [vmem:[#allocation3 + $0x80] sm:$0xff]  }
 0x396   : > { %v4794_v30 = vpop.f32.mrf.mxu1 }
 0x397   : > { %v4802_v31 = vpop.f32.mrf.mxu0  ;;  %v1257_v32 = vadd.f32 %v1250_v27, %v1178_v29  ;;  %v1355_v27 = vld [vmem:[#allocation2] sm:$0xc] }
 0x398   : > { %v1180_v35 = vpop.f32.mrf.mxu1 }
 0x399   : > { %v1253_v36 = vpop.f32.mrf.mxu0  ;;  %v1181_v39 = vadd.f32 %v1180_v35, %v1112_v22  ;;  %v1267_v42 = vadd.f32 %v4305_v34, %v1257_v32  ;;  %v1378_v22 = vrot.slane %v5765_v13, 4  ;;  %v1405_v32 = vsel %vm6425_vm7, %v1360_v24, 0  ;;  %v5269_v13 = vld [vmem:[%s6411_s7 + $0x88] sm:$0xff]  }
 0x39a   : > { %v4795_v43 = vpop.f32.mrf.mxu1  ;;  %v1382_v35 = vsel %vm5790_vm11, %v1355_v27, 0  ;;  %vm6426_vm7 = vcmask 1045504  }
 0x39b   : > { %v4803_v40 = vpop.f32.mrf.mxu0  ;;  %v1258_v44 = vadd.f32 %v1253_v36, %v1181_v39  ;;  %v1269_v46 = vmax.f32 %v1267_v42, 0.0  ;;  %v5801_v31 = vsel %vm5767_vm10, %v1378_v22, %v1397_v17  ;;  %vm5809_vm9 = vcmp.ne.s16.totalorder %v1378_v22, 0 }
 0x39c   : > { %vm1401_vm10 = vcmp.ne.s16.totalorder %v5801_v31, 0  ;;  %v4326_v40 = vcombine.low %v1405_v32, %v1405_v32  ;;  %v5270_v31 = vld [vmem:[%s6411_s7 + $0x80] sm:$0xff]  }
 0x39d   : > { %v1268_v45 = vadd.f32 %v4305_v34, %v1258_v44 }
 0x39f   : > { %v1270_v50 = vmax.f32 %v1268_v45, 0.0 }
 0x3a1   : > { %v1276_v51 = vpack.c.bf16 %v1270_v50, %v1269_v46 }
 0x3a3   : > { %4809 = vmatmul.mubr.msk.bf16.vlgmr.msra.gmra.mxu1 %vm692_vm13, %v1276_v51 }
 0x3a4   : > { %4824 = vmatprep.mubr.msk.bf16.mxu1 %vm5359_vm0, %v5358_v0  ;;  %4821 = vmatpush3.bf16.msra.mxu1 %v5197_v54  ;;  %v1554_v54 = vrot.slane %v4326_v40, 2  ;;  %v5204_v40 = vld [vmem:[%s6413_s9] sm:$0xff]  }
 0x3a5   : > { %4822 = vmatprep.subr.bf16.mxu1 %v5358_v0 }
 0x3a8   : > { %4823 = vmatpush3.bf16.msra.mxu1 %v5199_v60 }
 0x3a9   : > { %4836 = vmatprep.subr.bf16.mxu1 %v5358_v0 }
 0x463   : > { %v1334_v62 = vpop.f32.mrf.mxu1 }
 0x464   : > { %v1335_v1 = vadd.f32 %v4311_v61, %v1334_v62 }
 0x465   : > { %v4810_v3 = vpop.f32.mrf.mxu1 }
 0x466   : > { %v1341_v4 = vadd.f32 %v1335_v1, %v5669_v28  ;;  %v5202_v3 = vld [vmem:[%s6411_s7 + $0x20] sm:$0xff]  }
 0x467   : > { %v1337_v7 = vpop.f32.mrf.mxu1 }
 0x468   : > { %v5759_v19 = vmul.f32 %v1341_v4, %v5665_v20  ;;  %v1338_v8 = vadd.f32 %v4311_v61, %v1337_v7 }
 0x469   : > { %v4811_v9 = vpop.f32.mrf.mxu1 }
 0x46a   : > { %v4569_v10 = vpack.c.bf16 %v5759_v19, %v5759_v19  ;;  %v1342_v11 = vadd.f32 %v1338_v8, %v5682_v38 }
 0x46c   : > { %1353 = vst.msk [vmem:[#allocation2 + $0x4] sm:$0xf] %vm423_vm1, %v4569_v10  ;;  %v5775_v16 = vmul.f32 %v1342_v11, %v5676_v33 }
 0x46e   : > { %v1345_v21 = vpack.c.bf16 %v5775_v16, %v5759_v19  ;;  %v4570_v38 = vpack.c.bf16 %v5775_v16, %v5775_v16 }
 0x470   : > { %1354 = vst.msk [vmem:[#allocation2 + $0x8] sm:$0xf] %vm423_vm1, %v4570_v38  ;;  %4817 = vmatmul.mubr.msk.bf16.vlgmr.msra.gmra.mxu0 %vm692_vm13, %v1345_v21 }
 0x471   : > { %4829 = vmatpush3.bf16.msra.mxu0 %v5198_v18  ;;  %4832 = vmatprep.mubr.msk.bf16.mxu0 %vm5359_vm0, %v5358_v0  ;;  %v4331_v18 = vld [vmem:[%s6410_s6 + $0x2] ss:$0 sm:$0xff] }
 0x472   : > { %4830 = vmatprep.subr.bf16.mxu0 %v5358_v0 }
 0x473   : > { %v1356_v34 = vld [vmem:[#allocation2 + $0x4] sm:$0xf] }
 0x474   : > { %v1383_v36 = vsel %vm5794_vm15, %v1356_v34, 0  ;;  %v1358_v43 = vld [vmem:[#allocation2 + $0x4] sm:$0xc] }
 0x475   : > { %4831 = vmatpush3.bf16.msra.mxu0 %v5200_v26  ;;  %v4320_v44 = vcombine.low %v1382_v35, %v1383_v36  ;;  %v1403_v50 = vsel %vm1400_vm5, %v1358_v43, 0  ;;  %v5203_v43 = vld [vmem:[%s6413_s9 + $0x8] sm:$0xff]  }
 0x476   : > { %4844 = vmatprep.subr.bf16.mxu0 %v5358_v0 }
 0x477   : > { %v1357_v42 = vld [vmem:[#allocation2 + $0x8] sm:$0x3]  ;;  %v1481_v60 = vrot.slane %v4320_v44, 2 }
 0x478   : > { %v1359_v45 = vld [vmem:[#allocation2 + $0x8] sm:$0xf]  ;;  %v1384_v46 = vsel %vm5809_vm9, %v1357_v42, 0  ;;  %v4337_v42 = vld [vmem:[%s6412_s8 + $0x2] ss:$0 sm:$0xff] }
 0x479   : > { %v1404_v51 = vsel %vm1401_vm10, %v1359_v45, 0  ;;  %v4321_v52 = vcombine.low %v1384_v46, %v1384_v46 }
 0x47a   : > { %v4325_v53 = vcombine.low %v1403_v50, %v1404_v51 }
 0x47b   : > { %v1482_v61 = vrot.slane %v4321_v52, 2 }
 0x47c   : > { %v1553_v62 = vrot.slane %v4325_v53, 2 }
 0x47d   : > { %v1483_v63 = vsel %vm6426_vm7, %v1481_v60, %v1482_v61 }
 0x47e   : > { %v1555_v1 = vsel %vm6426_vm7, %v1553_v62, %v1554_v54  ;;  %4825 = vmatmul.mubr.msk.bf16.vlgmr.msra.gmra.mxu1 %vm692_vm13, %v1483_v63  ;;  %v4341_v63 = vld [vmem:[%s6414_s10] ss:$0 sm:$0xff] }
 0x47f   : > { %4833 = vmatmul.mubr.msk.bf16.vlgmr.msra.gmra.mxu0 %vm692_vm13, %v1555_v1  ;;  %4840 = vmatprep.mubr.msk.bf16.mxu1 %vm5359_vm0, %v5358_v0 }
 0x480   : > { %4848 = vmatprep.mubr.msk.bf16.mxu0 %vm5359_vm0, %v5358_v0  ;;  %4837 = vmatpush3.bf16.msra.mxu1 %v5201_v2 }
 0x481   : > { %4838 = vmatprep.subr.bf16.mxu1 %v5358_v0  ;;  %4845 = vmatpush3.bf16.msra.mxu0 %v5203_v43 }
 0x482   : > { %4846 = vmatprep.subr.bf16.mxu0 %v5358_v0 }
 0x484   : > { %4839 = vmatpush3.bf16.msra.mxu1 %v5202_v3 }
 0x485   : > { %4852 = vmatprep.subr.bf16.mxu1 %v5358_v0  ;;  %4847 = vmatpush3.bf16.msra.mxu0 %v5204_v40 }
 0x486   : > { %4872 = vmatprep.subr.bf16.mxu0 %v5358_v0 }
 0x530   : > { %v1465_v4 = vpop.f32.mrf.mxu0 }
 0x532   : > { %v4818_v6 = vpop.f32.mrf.mxu0 }
 0x534   : > { %v1468_v7 = vpop.f32.mrf.mxu0 }
 0x536   : > { %v4819_v17 = vpop.f32.mrf.mxu0 }
 0x53e   : > { %v1533_v8 = vpop.f32.mrf.mxu1 }
 0x53f   : > { %v1605_v9 = vpop.f32.mrf.mxu0  ;;  %v1534_v10 = vadd.f32 %v1533_v8, %v1465_v4 }
 0x540   : > { %v4826_v11 = vpop.f32.mrf.mxu1 }
 0x541   : > { %v4834_v12 = vpop.f32.mrf.mxu0  ;;  %v1612_v28 = vadd.f32 %v1605_v9, %v1534_v10  ;;  %v5205_v9 = vld [vmem:[%s6407_s3 + $0x38] sm:$0xff]   ;;  %v5206_v10 = vld [vmem:[%s6407_s3 + $0x30] sm:$0xff]  }
 0x542   : > { %v1536_v21 = vpop.f32.mrf.mxu1 }
 0x543   : > { %v1608_v38 = vpop.f32.mrf.mxu0  ;;  %v1537_v25 = vadd.f32 %v1536_v21, %v1468_v7  ;;  %v1622_v26 = vadd.f32 %v4331_v18, %v1612_v28 }
 0x544   : > { %v4827_v22 = vpop.f32.mrf.mxu1 }
 0x545   : > { %v4835_v24 = vpop.f32.mrf.mxu0  ;;  %v1613_v27 = vadd.f32 %v1608_v38, %v1537_v25  ;;  %v1624_v34 = vmax.f32 %v1622_v26, 0.0  ;;  %v5208_v26 = vld [vmem:[%s6407_s3 + $0x20] sm:$0xff]  }
 0x546   : > { %v5207_v24 = vld [vmem:[%s6407_s3 + $0x28] sm:$0xff]  }
 0x547   : > { %v1623_v32 = vadd.f32 %v4331_v18, %v1613_v27  ;;  %v5209_v27 = vld [vmem:[%s6407_s3 + $0x18] sm:$0xff]  }
 0x549   : > { %v1625_v35 = vmax.f32 %v1623_v32, 0.0  ;;  %v5210_v32 = vld [vmem:[%s6407_s3 + $0x10] sm:$0xff]  }
 0x54b   : > { %v1631_v36 = vpack.c.bf16 %v1625_v35, %v1624_v34  ;;  %v5211_v34 = vld [vmem:[%s6407_s3 + $0x8] sm:$0xff]   ;;  %v5212_v35 = vld [vmem:[%s6407_s3] sm:$0xff]  }
 0x54d   : > { %4841 = vmatmul.mubr.msk.bf16.vlgmr.msra.gmra.mxu1 %vm692_vm13, %v1631_v36 }
 0x54e   : > { %4868 = vmatprep.mubr.msk.bf16.mxu1 %vm5359_vm0, %v5358_v0  ;;  %4853 = vmatpush3.bf16.msra.mxu1 %v5205_v9 }
 0x54f   : > { %4854 = vmatprep.subr.bf16.mxu1 %v5358_v0 }
 0x552   : > { %4855 = vmatpush3.bf16.msra.mxu1 %v5206_v10 }
 0x553   : > { %4856 = vmatprep.subr.bf16.mxu1 %v5358_v0 }
 0x556   : > { %4857 = vmatpush3.bf16.msra.mxu1 %v5207_v24 }
 0x557   : > { %4858 = vmatprep.subr.bf16.mxu1 %v5358_v0 }
 0x55a   : > { %4859 = vmatpush3.bf16.msra.mxu1 %v5208_v26 }
 0x55b   : > { %4860 = vmatprep.subr.bf16.mxu1 %v5358_v0 }
 0x55e   : > { %4861 = vmatpush3.bf16.msra.mxu1 %v5209_v27 }
 0x55f   : > { %4862 = vmatprep.subr.bf16.mxu1 %v5358_v0 }
 0x562   : > { %4863 = vmatpush3.bf16.msra.mxu1 %v5210_v32 }
 0x563   : > { %4864 = vmatprep.subr.bf16.mxu1 %v5358_v0 }
 0x566   : > { %4865 = vmatpush3.bf16.msra.mxu1 %v5211_v34 }
 0x567   : > { %4866 = vmatprep.subr.bf16.mxu1 %v5358_v0 }
 0x56a   : > { %4867 = vmatpush3.bf16.msra.mxu1 %v5212_v35 }
 0x56b   : > { %4904 = vmatprep.subr.bf16.mxu1 %v5358_v0 }
 0x60d   : > { %v1689_v44 = vpop.f32.mrf.mxu1 }
 0x60e   : > { %v1690_v45 = vadd.f32 %v4337_v42, %v1689_v44 }
 0x60f   : > { %v4842_v46 = vpop.f32.mrf.mxu1 }
 0x610   : > { %v1696_v51 = vadd.f32 %v1690_v45, %v5759_v19  ;;  %v5869_v19 = vand.u32 127, %v440_v15 }
 0x611   : > { %v1692_v50 = vpop.f32.mrf.mxu1 }
 0x612   : > { %v1693_v52 = vadd.f32 %v4337_v42, %v1692_v50  ;;  %v1698_v60 = vmul.f32 %v1696_v51, %v5665_v20  ;;  %vm6430_vm7 = vcmp.lt.s32.totalorder %v5869_v19, 4 }
 0x613   : > { %v4843_v53 = vpop.f32.mrf.mxu1 }
 0x614   : > { %v1697_v54 = vadd.f32 %v1693_v52, %v5775_v16  ;;  %v5213_v52 = vld [vmem:[#allocation3 + $0xa8] sm:$0xff]   ;;  %v5214_v53 = vld [vmem:[#allocation3 + $0xa0] sm:$0xff]  }
 0x616   : > { %v1699_v61 = vmul.f32 %v1697_v54, %v5676_v33  ;;  %v4346_v54 = vld [vmem:[%s6408_s4 + $0x1] ss:$0 sm:$0xff] }
 0x618   : > { %v1704_v62 = vpack.c.bf16 %v1699_v61, %v1698_v60 }
 0x61a   : > { %4849 = vmatmul.mubr.msk.bf16.vlgmr.msra.gmra.mxu0 %vm692_vm13, %v1704_v62 }
 0x61b   : > { %4876 = vmatprep.mubr.msk.bf16.mxu0 %vm5359_vm0, %v5358_v0  ;;  %4873 = vmatpush3.bf16.msra.mxu0 %v5213_v52 }
 0x61c   : > { %4874 = vmatprep.subr.bf16.mxu0 %v5358_v0 }
 0x61f   : > { %4875 = vmatpush3.bf16.msra.mxu0 %v5214_v53  ;;  %v5218_v53 = vld [vmem:[#allocation3 + $0xb0] sm:$0xff]  }
 0x620   : > { %4880 = vmatprep.subr.bf16.mxu0 %v5358_v0 }
 0x6da   : > { %v1761_v16 = vpop.f32.mrf.mxu0 }
 0x6db   : > { %v1762_v1 = vadd.f32 %v4341_v63, %v1761_v16 }
 0x6dc   : > { %v4850_v2 = vpop.f32.mrf.mxu0 }
 0x6dd   : > { %v1768_v3 = vmul.f32 %v1762_v1, %v5665_v20 }
 0x6de   : > { %v1764_v4 = vpop.f32.mrf.mxu0 }
 0x6df   : > { %v1765_v6 = vadd.f32 %v4341_v63, %v1764_v4  ;;  %v1772_v7 = vsel %vm6430_vm7, %v1768_v3, -inf  ;;  %1770 = vst [vmem:[%s5875_s14] sm:$0xff] %v1768_v3  ;;  %v5215_v3 = vld [vmem:[#allocation3 + $0x98] sm:$0xff]  }
 0x6e0   : > { %1774 = vmax.xlane.f32.xlu1 %v1772_v7  ;;  %v4851_v15 = vpop.f32.mrf.mxu0 }
 0x6e1   : > { %v1769_v17 = vmul.f32 %v1765_v6, %v5676_v33  ;;  %v5216_v15 = vld [vmem:[#allocation3 + $0x90] sm:$0xff]  }
 0x6e3   : > { %v1773_v8 = vsel %vm6430_vm7, %v1769_v17, -inf  ;;  %1771 = vst [vmem:[%s5875_s14 + $0x8] sm:$0xff] %v1769_v17  ;;  %vm6462_vm7 = vcmask 1046528  }
 0x6e4   : > { %1776 = vmax.xlane.f32.xlu1 %v1773_v8 }
 0x769   : > { %v1775_v11 = vpop.xlane.xlu1 %1774 }
 0x76a   : > { %v1778_v12 = vsub.f32 %v1772_v7, %v1775_v11  ;;  %v1918_v7 = vld [vmem:[#allocation2] sm:$0x8] }
 0x76b   : > { %v1922_v17 = vsel %vm6427_vm14, %v1918_v7, 0  ;;  %vm6454_vm14 = vcmp.ne.s16.totalorder %v5605_v59, 0 }
 0x76c   : > { %v1780_v28 = vmul.f32 1.442695, %v1778_v12 }
 0x76d   : > { %v1777_v18 = vpop.xlane.xlu1 %1776 }
 0x76e   : > { %5273 = vpow2.f32 %v1780_v28  ;;  %v1779_v21 = vsub.f32 %v1773_v8, %v1777_v18  ;;  %v1921_v18 = vld [vmem:[#allocation2 + $0xc] sm:$0x1] }
 0x76f   : > { %v1927_v26 = vsel %vm5613_vm6, %v1921_v18, 0 }
 0x770   : > { %v1782_v38 = vmul.f32 1.442695, %v1779_v21 }
 0x772   : > { %5275 = vpow2.f32 %v1782_v38 }
 0x77b   : > { %v5274_v25 = vpop.eup %5273 }
 0x77c   : > { %1784 = vadd.xlane.f32.xlu0 %v5274_v25 }
 0x77f   : > { %v5276_v22 = vpop.eup %5275 }
 0x780   : > { %1786 = vadd.xlane.f32.xlu1 %v5276_v22 }
 0x805   : > { %v1785_v36 = vpop.xlane.xlu0 %1784 }
 0x806   : > { %5277 = vrcp.f32 %v1785_v36 }
 0x809   : > { %v1787_v43 = vpop.xlane.xlu1 %1786 }
 0x80a   : > { %5279 = vrcp.f32 %v1787_v43 }
 0x813   : > { %v5278_v40 = vpop.eup %5277 }
 0x814   : > { %v1789_v42 = vmul.f32 %v5278_v40, %v5274_v25  ;;  %v4366_v40 = vcombine.low %v1927_v26, %v1927_v26 }
 0x816   : > { %v1792_v46 = vmul.f32 %v1789_v42, %v5665_v20  ;;  %v2096_v52 = vshll.u32 %v4366_v40, 16  ;;  %v5225_v40 = vld [vmem:[#allocation3 + $0xc0] sm:$0xff]  }
 0x817   : > { %v5280_v44 = vpop.eup %5279 }
 0x818   : > { %v1791_v45 = vmul.f32 %v5280_v44, %v5276_v22 }
 0x81a   : > { %v1793_v50 = vmul.f32 %v1791_v45, %v5676_v33 }
 0x81c   : > { %v1810_v51 = vpack.c.bf16 %v1793_v50, %v1792_v46  ;;  %v5217_v46 = vld [vmem:[#allocation3 + $0xb8] sm:$0xff]  }
 0x81e   : > { %4869 = vmatmul.mubr.bf16.vlgmr.msra.gmra.mxu1 %v1810_v51 }
 0x81f   : > { %4908 = vmatprep.mubr.msk.bf16.mxu1 %vm5359_vm0, %v5358_v0 }
 0x8de   : > { %v1901_v60 = vpop.f32.mrf.mxu1 }
 0x8df   : > { %v5923_v61 = vadd.f32 %v4346_v54, %v1901_v60 }
 0x8e0   : > { %v4870_v62 = vpop.f32.mrf.mxu1 }
 0x8e1   : > { %v4571_v63 = vpack.c.bf16 %v5923_v61, %v5923_v61  ;;  %v2098_v62 = vrot.slane %v2096_v52, 1 }
 0x8e2   : > { %v1904_v16 = vpop.f32.mrf.mxu1 }
 0x8e3   : > { %1916 = vst.msk [vmem:[#allocation2 + $0x4] sm:$0xf] %vm423_vm1, %v4571_v63  ;;  %v5928_v1 = vadd.f32 %v4346_v54, %v1904_v16  ;;  %v5219_v16 = vld [vmem:[%s6411_s7 + $0x38] sm:$0xff]  }
 0x8e4   : > { %v4871_v2 = vpop.f32.mrf.mxu1 }
 0x8e5   : > { %v1908_v4 = vpack.c.bf16 %v5928_v1, %v5923_v61  ;;  %v4572_v6 = vpack.c.bf16 %v5928_v1, %v5928_v1  ;;  %v5220_v2 = vld [vmem:[%s6411_s7 + $0x30] sm:$0xff]  }
 0x8e7   : > { %1917 = vst.msk [vmem:[#allocation2 + $0x8] sm:$0xf] %vm423_vm1, %v4572_v6  ;;  %4877 = vmatmul.mubr.msk.bf16.vlgmr.msra.gmra.mxu0 %vm692_vm13, %v1908_v4 }
 0x8e8   : > { %4881 = vmatpush3.bf16.msra.mxu0 %v5215_v3  ;;  %4884 = vmatprep.mubr.msk.bf16.mxu0 %vm5359_vm0, %v5358_v0 }
 0x8e9   : > { %4882 = vmatprep.subr.bf16.mxu0 %v5358_v0 }
 0x8ea   : > { %v1919_v8 = vld [vmem:[#allocation2 + $0x4] sm:$0xf] }
 0x8eb   : > { %v1923_v9 = vsel %vm5596_vm2, %v1919_v8, 0  ;;  %v1925_v38 = vsel %vm6428_vm4, %v1919_v8, 0  ;;  %vm6455_vm4 = vsmask.f32 4352 }
 0x8ec   : > { %4883 = vmatpush3.bf16.msra.mxu0 %v5216_v15  ;;  %v4360_v10 = vcombine.low %v1922_v17, %v1923_v9 }
 0x8ed   : > { %4888 = vmatprep.subr.bf16.mxu0 %v5358_v0 }
 0x8ee   : > { %v1920_v11 = vld [vmem:[#allocation2 + $0x8] sm:$0xf]  ;;  %v2003_v12 = vshrl.u32 %v4360_v10, 16  ;;  %v2006_v28 = vshll.u32 %v4360_v10, 16 }
 0x8ef   : > { %v1924_v21 = vsel %vm6429_vm3, %v1920_v11, 0  ;;  %v1926_v25 = vsel %vm6454_vm14, %v1920_v11, 0  ;;  %vm6456_vm14 = vsmask.f32 7424  ;;  %vm6459_vm3 = vcmp.ne.s16.totalorder %v5695_v47, 0 }
 0x8f0   : > { %v4361_v22 = vcombine.low %v1924_v21, %v1924_v21  ;;  %v4365_v24 = vcombine.low %v1925_v38, %v1926_v25  ;;  %v2005_v27 = vrot.slane %v2003_v12, 3  ;;  %v2008_v32 = vrot.slane %v2006_v28, 4  ;;  %v4371_v28 = vld [vmem:[%s6410_s6 + $0x3] ss:$0 sm:$0xff] }
 0x8f2   : > { %v2011_v34 = vshrl.u32 %v4361_v22, 16  ;;  %v2014_v35 = vshll.u32 %v4361_v22, 16  ;;  %v2091_v42 = vshll.u32 %v4365_v24, 16  ;;  %v2009_v44 = vor.u32 %v2008_v32, %v2005_v27 }
 0x8f3   : > { %v2089_v54 = vshrl.u32 %v4365_v24, 16 }
 0x8f4   : > { %v2013_v36 = vrot.slane %v2011_v34, 3  ;;  %v2016_v43 = vrot.slane %v2014_v35, 4  ;;  %v2093_v51 = vrot.slane %v2091_v42, 1  ;;  %v5221_v35 = vld [vmem:[#allocation3 + $0xd8] sm:$0xff]   ;;  %v4377_v42 = vld [vmem:[%s6412_s8 + $0x3] ss:$0 sm:$0xff] }
 0x8f5   : > { %4905 = vmatpush3.bf16.msra.mxu1 %v5221_v35  ;;  %v5227_v35 = vld [vmem:[%s6411_s7 + $0x48] sm:$0xff]  }
 0x8f6   : > { %v2017_v45 = vor.u32 %v2016_v43, %v2013_v36  ;;  %v2094_v60 = vor.u32 %v2093_v51, %v2089_v54  ;;  %4906 = vmatprep.subr.bf16.mxu1 %v5358_v0  ;;  %v5222_v36 = vld [vmem:[#allocation3 + $0xd0] sm:$0xff]   ;;  %v5223_v43 = vld [vmem:[#allocation3 + $0xc8] sm:$0xff]  }
 0x8f8   : > { %v2018_v50 = vsel %vm6455_vm4, %v2009_v44, %v2017_v45  ;;  %v2099_v63 = vsel %vm6456_vm14, %v2094_v60, %v2098_v62  ;;  %vm6457_vm4 = vcmp.ne.s16.totalorder %v5678_v37, 0  ;;  %vm6458_vm14 = vcmp.ne.s16.totalorder %v5688_v41, 0 }
 0x8f9   : > { %4885 = vmatmul.mubr.msk.bf16.vlgmr.msra.gmra.mxu0 %vm692_vm13, %v2018_v50  ;;  %4907 = vmatpush3.bf16.msra.mxu1 %v5222_v36  ;;  %v5228_v36 = vld [vmem:[%s6411_s7 + $0x40] sm:$0xff]  }
 0x8fa   : > { %4889 = vmatpush3.bf16.msra.mxu0 %v5217_v46  ;;  %4892 = vmatprep.mubr.msk.bf16.mxu0 %vm5359_vm0, %v5358_v0 }
 0x8fb   : > { %4890 = vmatprep.subr.bf16.mxu0 %v5358_v0  ;;  %4920 = vmatprep.subr.bf16.mxu1 %v5358_v0 }
 0x8fe   : > { %4891 = vmatpush3.bf16.msra.mxu0 %v5218_v53 }
 0x8ff   : > { %4896 = vmatprep.subr.bf16.mxu0 %v5358_v0 }
 0x901   : > { %4893 = vmatmul.mubr.msk.bf16.vlgmr.msra.gmra.mxu0 %vm692_vm13, %v2099_v63 }
 0x902   : > { %4900 = vmatprep.mubr.msk.bf16.mxu0 %vm5359_vm0, %v5358_v0  ;;  %4897 = vmatpush3.bf16.msra.mxu0 %v5219_v16  ;;  %v5224_v16 = vld [vmem:[#allocation3 + $0xe8] sm:$0xff]  }
 0x903   : > { %4898 = vmatprep.subr.bf16.mxu0 %v5358_v0 }
 0x906   : > { %4899 = vmatpush3.bf16.msra.mxu0 %v5220_v2 }
 0x907   : > { %4912 = vmatprep.subr.bf16.mxu0 %v5358_v0 }
 0x9a7   : > { %v1987_v3 = vpop.f32.mrf.mxu0 }
 0x9a9   : > { %v4878_v4 = vpop.f32.mrf.mxu0 }
 0x9aa   : > { %v5226_v4 = vld [vmem:[#allocation3 + $0xe0] sm:$0xff]  }
 0x9ab   : > { %v1990_v6 = vpop.f32.mrf.mxu0 }
 0x9ad   : > { %v4879_v7 = vpop.f32.mrf.mxu0 }
 0x9b9   : > { %v2068_v15 = vpop.f32.mrf.mxu0 }
 0x9ba   : > { %v2069_v10 = vadd.f32 %v2068_v15, %v1987_v3  ;;  %v2259_v3 = vld [vmem:[#allocation2 + $0xc] sm:$0x1] }
 0x9bb   : > { %v4886_v17 = vpop.f32.mrf.mxu0 }
 0x9bd   : > { %v2071_v8 = vpop.f32.mrf.mxu0 }
 0x9be   : > { %v2072_v21 = vadd.f32 %v2071_v8, %v1990_v6  ;;  %v2265_v6 = vsel %vm6457_vm4, %v2259_v3, 0  ;;  %vm6460_vm4 = vcmp.ne.s16.totalorder %v5703_v49, 0 }
 0x9bf   : > { %v4887_v9 = vpop.f32.mrf.mxu0 }
 0x9c0   : > { %v4392_v9 = vcombine.low %v2265_v6, %v2265_v6 }
 0x9c1   : > { %v2149_v11 = vpop.f32.mrf.mxu0 }
 0x9c2   : > { %v2156_v12 = vadd.f32 %v2149_v11, %v2069_v10 }
 0x9c3   : > { %v4894_v18 = vpop.f32.mrf.mxu0 }
 0x9c4   : > { %v2166_v25 = vadd.f32 %v4371_v28, %v2156_v12 }
 0x9c5   : > { %v2152_v38 = vpop.f32.mrf.mxu0 }
 0x9c6   : > { %v2157_v22 = vadd.f32 %v2152_v38, %v2072_v21  ;;  %v2168_v27 = vmax.f32 %v2166_v25, 0.0 }
 0x9c7   : > { %v4895_v24 = vpop.f32.mrf.mxu0 }
 0x9c8   : > { %v2167_v26 = vadd.f32 %v4371_v28, %v2157_v22  ;;  %v2413_v22 = vrot.slane %v4392_v9, 1  ;;  %v5230_v9 = vld [vmem:[#allocation3 + $0x100] sm:$0xff]  }
 0x9ca   : > { %v2169_v32 = vmax.f32 %v2167_v26, 0.0 }
 0x9cc   : > { %v2175_v34 = vpack.c.bf16 %v2169_v32, %v2168_v27 }
 0x9ce   : > { %4901 = vmatmul.mubr.msk.bf16.vlgmr.msra.gmra.mxu0 %vm692_vm13, %v2175_v34 }
 0x9cf   : > { %4916 = vmatprep.mubr.msk.bf16.mxu0 %vm5359_vm0, %v5358_v0  ;;  %4913 = vmatpush3.bf16.msra.mxu0 %v5223_v43 }
 0x9d0   : > { %4914 = vmatprep.subr.bf16.mxu0 %v5358_v0 }
 0x9d3   : > { %4915 = vmatpush3.bf16.msra.mxu0 %v5225_v40 }
 0x9d4   : > { %4928 = vmatprep.subr.bf16.mxu0 %v5358_v0 }
 0xa8e   : > { %v2233_v44 = vpop.f32.mrf.mxu0 }
 0xa8f   : > { %v2234_v45 = vadd.f32 %v4377_v42, %v2233_v44 }
 0xa90   : > { %v4902_v46 = vpop.f32.mrf.mxu0 }
 0xa91   : > { %v2240_v50 = vadd.f32 %v2234_v45, %v5923_v61 }
 0xa92   : > { %v2236_v51 = vpop.f32.mrf.mxu0 }
 0xa93   : > { %v5985_v52 = vmul.f32 %v2240_v50, %v5665_v20  ;;  %v2237_v53 = vadd.f32 %v4377_v42, %v2236_v51 }
 0xa94   : > { %v4903_v54 = vpop.f32.mrf.mxu0 }
 0xa95   : > { %v4573_v60 = vpack.c.bf16 %v5985_v52, %v5985_v52  ;;  %v2241_v62 = vadd.f32 %v2237_v53, %v5928_v1  ;;  %v2254_v1 = vld [vmem:[#allocation2] sm:$0x8] }
 0xa96   : > { %v2260_v15 = vsel %vm5697_vm8, %v2254_v1, 0 }
 0xa97   : > { %2252 = vst.msk [vmem:[#allocation2 + $0x4] sm:$0xf] %vm423_vm1, %v4573_v60  ;;  %v5992_v63 = vmul.f32 %v2241_v62, %v5676_v33  ;;  %v4397_v60 = vld [vmem:[%s6410_s6 + $0x4] ss:$0 sm:$0xff] }
 0xa99   : > { %v2244_v61 = vpack.c.bf16 %v5992_v63, %v5985_v52  ;;  %v4574_v2 = vpack.c.bf16 %v5992_v63, %v5992_v63 }
 0xa9b   : > { %2253 = vst.msk [vmem:[#allocation2 + $0x8] sm:$0xf] %vm423_vm1, %v4574_v2  ;;  %4909 = vmatmul.mubr.msk.bf16.vlgmr.msra.gmra.mxu1 %vm692_vm13, %v2244_v61 }
 0xa9c   : > { %4921 = vmatpush3.bf16.msra.mxu1 %v5224_v16  ;;  %4924 = vmatprep.mubr.msk.bf16.mxu1 %vm5359_vm0, %v5358_v0 }
 0xa9d   : > { %4922 = vmatprep.subr.bf16.mxu1 %v5358_v0 }
 0xa9e   : > { %v2255_v7 = vld [vmem:[#allocation2 + $0x4] sm:$0xf] }
 0xa9f   : > { %v2261_v17 = vsel %vm6458_vm14, %v2255_v7, 0  ;;  %v2257_v8 = vld [vmem:[#allocation2 + $0x4] sm:$0xe]  ;;  %vm6461_vm14 = vcmask 1044480  }
 0xaa0   : > { %4923 = vmatpush3.bf16.msra.mxu1 %v5226_v4  ;;  %v4386_v11 = vcombine.low %v2260_v15, %v2261_v17  ;;  %v2263_v18 = vsel %vm5712_vm12, %v2257_v8, 0  ;;  %v5229_v8 = vld [vmem:[#allocation3 + $0x108] sm:$0xff]  }
 0xaa1   : > { %4936 = vmatprep.subr.bf16.mxu1 %v5358_v0 }
 0xaa2   : > { %v2256_v10 = vld [vmem:[#allocation2 + $0x8] sm:$0x7]  ;;  %v2340_v24 = vrot.slane %v4386_v11, 3  ;;  %v5233_v11 = vld [vmem:[#allocation3 + $0xf0] sm:$0xff]  }
 0xaa3   : > { %v2258_v12 = vld [vmem:[#allocation2 + $0x8] sm:$0xf]  ;;  %v2262_v28 = vsel %vm6459_vm3, %v2256_v10, 0  ;;  %vm6463_vm3 = vcmp.ne.s16.totalorder %v5771_v14, 0 }
 0xaa4   : > { %v2264_v21 = vsel %vm6460_vm4, %v2258_v12, 0  ;;  %v4387_v38 = vcombine.low %v2262_v28, %v2262_v28  ;;  %v5231_v10 = vld [vmem:[#allocation3 + $0xf8] sm:$0xff]   ;;  %v4403_v12 = vld [vmem:[%s6412_s8 + $0x4] ss:$0 sm:$0xff] }
 0xaa5   : > { %v4391_v25 = vcombine.low %v2263_v18, %v2264_v21 }
 0xaa6   : > { %v2341_v26 = vrot.slane %v4387_v38, 3 }
 0xaa7   : > { %v2412_v27 = vrot.slane %v4391_v25, 1 }
 0xaa8   : > { %v2342_v32 = vsel %vm6461_vm14, %v2340_v24, %v2341_v26  ;;  %vm6466_vm14 = vcmp.lt.s32.totalorder %v5869_v19, 4 }
 0xaa9   : > { %v2414_v34 = vsel %vm6462_vm7, %v2412_v27, %v2413_v22  ;;  %4917 = vmatmul.mubr.msk.bf16.vlgmr.msra.gmra.mxu0 %vm692_vm13, %v2342_v32  ;;  %vm6464_vm7 = vcmask 1045504  }
 0xaaa   : > { %4925 = vmatmul.mubr.msk.bf16.vlgmr.msra.gmra.mxu1 %vm692_vm13, %v2414_v34  ;;  %4932 = vmatprep.mubr.msk.bf16.mxu0 %vm5359_vm0, %v5358_v0  ;;  %vm6465_vm4 = vmmov %vm6464_vm7 }
 0xaab   : > { %4940 = vmatprep.mubr.msk.bf16.mxu1 %vm5359_vm0, %v5358_v0  ;;  %4929 = vmatpush3.bf16.msra.mxu0 %v5227_v35  ;;  %v5232_v35 = vld [vmem:[#allocation3 + $0x118] sm:$0xff]  }
 0xaac   : > { %4930 = vmatprep.subr.bf16.mxu0 %v5358_v0  ;;  %4937 = vmatpush3.bf16.msra.mxu1 %v5229_v8  ;;  %v5235_v8 = vld [vmem:[%s6411_s7 + $0x58] sm:$0xff]  }
 0xaad   : > { %4938 = vmatprep.subr.bf16.mxu1 %v5358_v0 }
 0xaaf   : > { %4931 = vmatpush3.bf16.msra.mxu0 %v5228_v36 }
 0xab0   : > { %4944 = vmatprep.subr.bf16.mxu0 %v5358_v0  ;;  %4939 = vmatpush3.bf16.msra.mxu1 %v5230_v9  ;;  %v5236_v9 = vld [vmem:[%s6411_s7 + $0x50] sm:$0xff]  }
 0xab1   : > { %4952 = vmatprep.subr.bf16.mxu1 %v5358_v0 }
 0xb5b   : > { %v2325_v43 = vpop.f32.mrf.mxu1 }
 0xb5d   : > { %v4910_v40 = vpop.f32.mrf.mxu1 }
 0xb5e   : > { %v5234_v40 = vld [vmem:[#allocation3 + $0x110] sm:$0xff]  }
 0xb5f   : > { %v2328_v42 = vpop.f32.mrf.mxu1 }
 0xb61   : > { %v4911_v44 = vpop.f32.mrf.mxu1 }
 0xb69   : > { %v2392_v45 = vpop.f32.mrf.mxu0 }
 0xb6a   : > { %v2464_v46 = vpop.f32.mrf.mxu1  ;;  %v2393_v50 = vadd.f32 %v2392_v45, %v2325_v43  ;;  %v2574_v43 = vld [vmem:[#allocation2 + $0xc] sm:$0x3] }
 0xb6b   : > { %v4918_v51 = vpop.f32.mrf.mxu0 }
 0xb6c   : > { %v4926_v53 = vpop.f32.mrf.mxu1  ;;  %v2471_v54 = vadd.f32 %v2464_v46, %v2393_v50 }
 0xb6d   : > { %v2395_v62 = vpop.f32.mrf.mxu0 }
 0xb6e   : > { %v2467_v16 = vpop.f32.mrf.mxu1  ;;  %v2396_v61 = vadd.f32 %v2395_v62, %v2328_v42  ;;  %v2481_v4 = vadd.f32 %v4397_v60, %v2471_v54  ;;  %v2580_v42 = vsel %vm6463_vm3, %v2574_v43, 0  ;;  %vm6467_vm3 = vmmov %vm6466_vm14 }
 0xb6f   : > { %v4919_v2 = vpop.f32.mrf.mxu0  ;;  %v4418_v51 = vcombine.low %v2580_v42, %v2580_v42 }
 0xb70   : > { %v4927_v3 = vpop.f32.mrf.mxu1  ;;  %v2472_v1 = vadd.f32 %v2467_v16, %v2396_v61  ;;  %v2483_v7 = vmax.f32 %v2481_v4, 0.0 }
 0xb71   : > { %v2728_v4 = vrot.slane %v4418_v51, 2  ;;  %v5238_v51 = vld [vmem:[%s6413_s9 + $0x10] sm:$0xff]  }
 0xb72   : > { %v2482_v6 = vadd.f32 %v4397_v60, %v2472_v1 }
 0xb74   : > { %v2484_v15 = vmax.f32 %v2482_v6, 0.0 }
 0xb76   : > { %v2490_v17 = vpack.c.bf16 %v2484_v15, %v2483_v7 }
 0xb78   : > { %4933 = vmatmul.mubr.msk.bf16.vlgmr.msra.gmra.mxu0 %vm692_vm13, %v2490_v17 }
 0xb79   : > { %4948 = vmatprep.mubr.msk.bf16.mxu0 %vm5359_vm0, %v5358_v0  ;;  %4945 = vmatpush3.bf16.msra.mxu0 %v5231_v10 }
 0xb7a   : > { %4946 = vmatprep.subr.bf16.mxu0 %v5358_v0 }
 0xb7d   : > { %4947 = vmatpush3.bf16.msra.mxu0 %v5233_v11 }
 0xb7e   : > { %4960 = vmatprep.subr.bf16.mxu0 %v5358_v0 }
 0xc38   : > { %v2548_v28 = vpop.f32.mrf.mxu0 }
 0xc39   : > { %v2549_v18 = vadd.f32 %v4403_v12, %v2548_v28 }
 0xc3a   : > { %v4934_v21 = vpop.f32.mrf.mxu0 }
 0xc3b   : > { %v2555_v38 = vadd.f32 %v2549_v18, %v5985_v52 }
 0xc3c   : > { %v2551_v25 = vpop.f32.mrf.mxu0 }
 0xc3d   : > { %v6047_v22 = vmul.f32 %v2555_v38, %v5665_v20  ;;  %v2552_v24 = vadd.f32 %v4403_v12, %v2551_v25 }
 0xc3e   : > { %v4935_v26 = vpop.f32.mrf.mxu0 }
 0xc3f   : > { %v4575_v27 = vpack.c.bf16 %v6047_v22, %v6047_v22  ;;  %v2556_v32 = vadd.f32 %v2552_v24, %v5992_v63  ;;  %v2569_v63 = vld [vmem:[#allocation2] sm:$0xc] }
 0xc40   : > { %v2575_v45 = vsel %vm5790_vm11, %v2569_v63, 0 }
 0xc41   : > { %2567 = vst.msk [vmem:[#allocation2 + $0x4] sm:$0xf] %vm423_vm1, %v4575_v27  ;;  %v6054_v34 = vmul.f32 %v2556_v32, %v5676_v33  ;;  %v4423_v27 = vld [vmem:[%s6410_s6 + $0x5] ss:$0 sm:$0xff] }
 0xc43   : > { %v2559_v52 = vpack.c.bf16 %v6054_v34, %v6047_v22  ;;  %v4576_v36 = vpack.c.bf16 %v6054_v34, %v6054_v34 }
 0xc45   : > { %2568 = vst.msk [vmem:[#allocation2 + $0x8] sm:$0xf] %vm423_vm1, %v4576_v36  ;;  %4941 = vmatmul.mubr.msk.bf16.vlgmr.msra.gmra.mxu1 %vm692_vm13, %v2559_v52 }
 0xc46   : > { %4953 = vmatpush3.bf16.msra.mxu1 %v5232_v35  ;;  %4956 = vmatprep.mubr.msk.bf16.mxu1 %vm5359_vm0, %v5358_v0 }
 0xc47   : > { %4954 = vmatprep.subr.bf16.mxu1 %v5358_v0 }
 0xc48   : > { %v2570_v44 = vld [vmem:[#allocation2 + $0x4] sm:$0xf] }
 0xc49   : > { %v2576_v46 = vsel %vm5794_vm15, %v2570_v44, 0  ;;  %v2572_v50 = vld [vmem:[#allocation2 + $0x4] sm:$0xc] }
 0xc4a   : > { %4955 = vmatpush3.bf16.msra.mxu1 %v5234_v40  ;;  %v4412_v54 = vcombine.low %v2575_v45, %v2576_v46  ;;  %v2578_v16 = vsel %vm1400_vm5, %v2572_v50, 0  ;;  %v5237_v50 = vld [vmem:[%s6413_s9 + $0x18] sm:$0xff]  }
 0xc4b   : > { %4968 = vmatprep.subr.bf16.mxu1 %v5358_v0 }
 0xc4c   : > { %v2571_v53 = vld [vmem:[#allocation2 + $0x8] sm:$0x3]  ;;  %v2655_v1 = vrot.slane %v4412_v54, 2 }
 0xc4d   : > { %v2573_v60 = vld [vmem:[#allocation2 + $0x8] sm:$0xf]  ;;  %v2577_v62 = vsel %vm5809_vm9, %v2571_v53, 0  ;;  %v4429_v53 = vld [vmem:[%s6412_s8 + $0x5] ss:$0 sm:$0xff] }
 0xc4e   : > { %v2579_v61 = vsel %vm1401_vm10, %v2573_v60, 0  ;;  %v4413_v2 = vcombine.low %v2577_v62, %v2577_v62 }
 0xc4f   : > { %v4417_v3 = vcombine.low %v2578_v16, %v2579_v61 }
 0xc50   : > { %v2656_v6 = vrot.slane %v4413_v2, 2 }
 0xc51   : > { %v2727_v7 = vrot.slane %v4417_v3, 2 }
 0xc52   : > { %v2657_v15 = vsel %vm6464_vm7, %v2655_v1, %v2656_v6  ;;  %vm6468_vm7 = vcmp.ne.s16.totalorder %v5560_v23, 0 }
 0xc53   : > { %v2729_v17 = vsel %vm6465_vm4, %v2727_v7, %v2728_v4  ;;  %4949 = vmatmul.mubr.msk.bf16.vlgmr.msra.gmra.mxu0 %vm692_vm13, %v2657_v15  ;;  %vm6469_vm4 = vcmp.ne.s16.totalorder %v5594_v55, 0 }
 0xc54   : > { %4957 = vmatmul.mubr.msk.bf16.vlgmr.msra.gmra.mxu1 %vm692_vm13, %v2729_v17  ;;  %4964 = vmatprep.mubr.msk.bf16.mxu0 %vm5359_vm0, %v5358_v0 }
 0xc55   : > { %4972 = vmatprep.mubr.msk.bf16.mxu1 %vm5359_vm0, %v5358_v0  ;;  %4961 = vmatpush3.bf16.msra.mxu0 %v5235_v8 }
 0xc56   : > { %4962 = vmatprep.subr.bf16.mxu0 %v5358_v0  ;;  %4969 = vmatpush3.bf16.msra.mxu1 %v5237_v50 }
 0xc57   : > { %4970 = vmatprep.subr.bf16.mxu1 %v5358_v0 }
 0xc59   : > { %4963 = vmatpush3.bf16.msra.mxu0 %v5236_v9 }
 0xc5a   : > { %4976 = vmatprep.subr.bf16.mxu0 %v5358_v0  ;;  %4971 = vmatpush3.bf16.msra.mxu1 %v5238_v51 }
 0xc5b   : > { %4996 = vmatprep.subr.bf16.mxu1 %v5358_v0 }
 0xd05   : > { %v2640_v10 = vpop.f32.mrf.mxu1 }
 0xd07   : > { %v4942_v11 = vpop.f32.mrf.mxu1 }
 0xd09   : > { %v2643_v12 = vpop.f32.mrf.mxu1 }
 0xd0b   : > { %v4943_v28 = vpop.f32.mrf.mxu1 }
 0xd13   : > { %v2707_v18 = vpop.f32.mrf.mxu0 }
 0xd14   : > { %v2779_v21 = vpop.f32.mrf.mxu1  ;;  %v2708_v38 = vadd.f32 %v2707_v18, %v2640_v10 }
 0xd15   : > { %v4950_v25 = vpop.f32.mrf.mxu0 }
 0xd16   : > { %v4958_v24 = vpop.f32.mrf.mxu1  ;;  %v2786_v26 = vadd.f32 %v2779_v21, %v2708_v38  ;;  %v5239_v21 = vld [vmem:[%s6407_s3 + $0x78] sm:$0xff]   ;;  %v5240_v38 = vld [vmem:[%s6407_s3 + $0x70] sm:$0xff]  }
 0xd17   : > { %v2710_v32 = vpop.f32.mrf.mxu0 }
 0xd18   : > { %v2782_v35 = vpop.f32.mrf.mxu1  ;;  %v2711_v52 = vadd.f32 %v2710_v32, %v2643_v12  ;;  %v2796_v40 = vadd.f32 %v4423_v27, %v2786_v26 }
 0xd19   : > { %v4951_v36 = vpop.f32.mrf.mxu0 }
 0xd1a   : > { %v4959_v43 = vpop.f32.mrf.mxu1  ;;  %v2787_v63 = vadd.f32 %v2782_v35, %v2711_v52  ;;  %v2798_v44 = vmax.f32 %v2796_v40, 0.0  ;;  %v5241_v36 = vld [vmem:[%s6407_s3 + $0x68] sm:$0xff]   ;;  %v5243_v40 = vld [vmem:[%s6407_s3 + $0x58] sm:$0xff]  }
 0xd1b   : > { %v5242_v43 = vld [vmem:[%s6407_s3 + $0x60] sm:$0xff]  }
 0xd1c   : > { %v2797_v42 = vadd.f32 %v4423_v27, %v2787_v63  ;;  %v5244_v63 = vld [vmem:[%s6407_s3 + $0x50] sm:$0xff]  }
 0xd1e   : > { %v2799_v45 = vmax.f32 %v2797_v42, 0.0  ;;  %v5245_v42 = vld [vmem:[%s6407_s3 + $0x48] sm:$0xff]  }
 0xd20   : > { %v2805_v46 = vpack.c.bf16 %v2799_v45, %v2798_v44  ;;  %v5246_v44 = vld [vmem:[%s6407_s3 + $0x40] sm:$0xff]  }
 0xd22   : > { %4965 = vmatmul.mubr.msk.bf16.vlgmr.msra.gmra.mxu0 %vm692_vm13, %v2805_v46 }
 0xd23   : > { %4992 = vmatprep.mubr.msk.bf16.mxu0 %vm5359_vm0, %v5358_v0  ;;  %4977 = vmatpush3.bf16.msra.mxu0 %v5239_v21 }
 0xd24   : > { %4978 = vmatprep.subr.bf16.mxu0 %v5358_v0 }
 0xd27   : > { %4979 = vmatpush3.bf16.msra.mxu0 %v5240_v38 }
 0xd28   : > { %4980 = vmatprep.subr.bf16.mxu0 %v5358_v0 }
 0xd2b   : > { %4981 = vmatpush3.bf16.msra.mxu0 %v5241_v36 }
 0xd2c   : > { %4982 = vmatprep.subr.bf16.mxu0 %v5358_v0 }
 0xd2f   : > { %4983 = vmatpush3.bf16.msra.mxu0 %v5242_v43 }
 0xd30   : > { %4984 = vmatprep.subr.bf16.mxu0 %v5358_v0 }
 0xd33   : > { %4985 = vmatpush3.bf16.msra.mxu0 %v5243_v40 }
 0xd34   : > { %4986 = vmatprep.subr.bf16.mxu0 %v5358_v0 }
 0xd37   : > { %4987 = vmatpush3.bf16.msra.mxu0 %v5244_v63 }
 0xd38   : > { %4988 = vmatprep.subr.bf16.mxu0 %v5358_v0 }
 0xd3b   : > { %4989 = vmatpush3.bf16.msra.mxu0 %v5245_v42 }
 0xd3c   : > { %4990 = vmatprep.subr.bf16.mxu0 %v5358_v0 }
 0xd3f   : > { %4991 = vmatpush3.bf16.msra.mxu0 %v5246_v44 }
 0xd40   : > { %5028 = vmatprep.subr.bf16.mxu0 %v5358_v0 }
 0xde2   : > { %v2863_v54 = vpop.f32.mrf.mxu0 }
 0xde3   : > { %v2864_v60 = vadd.f32 %v4429_v53, %v2863_v54 }
 0xde4   : > { %v4966_v62 = vpop.f32.mrf.mxu0 }
 0xde5   : > { %v2870_v61 = vadd.f32 %v2864_v60, %v6047_v22  ;;  %v4438_v22 = vld [vmem:[%s6414_s10 + $0x1] ss:$0 sm:$0xff] }
 0xde6   : > { %v2866_v16 = vpop.f32.mrf.mxu0 }
 0xde7   : > { %v2867_v2 = vadd.f32 %v4429_v53, %v2866_v16  ;;  %v2872_v1 = vmul.f32 %v2870_v61, %v5665_v20  ;;  %v5247_v61 = vld [vmem:[#allocation3 + $0x138] sm:$0xff]  }
 0xde8   : > { %v4967_v3 = vpop.f32.mrf.mxu0 }
 0xde9   : > { %v2871_v4 = vadd.f32 %v2867_v2, %v6054_v34  ;;  %v5248_v2 = vld [vmem:[#allocation3 + $0x130] sm:$0xff]  }
 0xdea   : > { %v4461_v3 = vld [vmem:[%s6408_s4 + $0x2] ss:$0 sm:$0xff] }
 0xdeb   : > { %v2873_v6 = vmul.f32 %v2871_v4, %v5676_v33 }
 0xded   : > { %v2879_v7 = vpack.c.bf16 %v2873_v6, %v2872_v1 }
 0xdef   : > { %4973 = vmatmul.mubr.msk.bf16.vlgmr.msra.gmra.mxu1 %vm692_vm13, %v2879_v7 }
 0xdf0   : > { %5000 = vmatprep.mubr.msk.bf16.mxu1 %vm5359_vm0, %v5358_v0  ;;  %4997 = vmatpush3.bf16.msra.mxu1 %v5247_v61  ;;  %v5254_v61 = vld [vmem:[%s6411_s7 + $0x60] sm:$0xff]  }
 0xdf1   : > { %4998 = vmatprep.subr.bf16.mxu1 %v5358_v0 }
 0xdf4   : > { %4999 = vmatpush3.bf16.msra.mxu1 %v5248_v2 }
 0xdf5   : > { %5004 = vmatprep.subr.bf16.mxu1 %v5358_v0 }
 0xeaf   : > { %v2937_v15 = vpop.f32.mrf.mxu1 }
 0xeb0   : > { %v2938_v17 = vadd.f32 %v4438_v22, %v2937_v15 }
 0xeb1   : > { %v4974_v8 = vpop.f32.mrf.mxu1 }
 0xeb2   : > { %v2944_v34 = vmul.f32 %v2938_v17, %v5665_v20  ;;  %v5249_v8 = vld [vmem:[#allocation3 + $0x128] sm:$0xff]  }
 0xeb3   : > { %v2940_v9 = vpop.f32.mrf.mxu1 }
 0xeb4   : > { %v2941_v10 = vadd.f32 %v4438_v22, %v2940_v9  ;;  %v2949_v11 = vsel %vm6466_vm14, %v2944_v34, -inf  ;;  %4442 = vst [vmem:[%s5875_s14 + $0x10] sm:$0xff] %v2944_v34  ;;  %vm6470_vm14 = vcmp.ne.s16.totalorder %v5600_v57, 0  ;;  %v5251_v57 = vld [vmem:[#allocation3 + $0x148] sm:$0xff]  }
 0xeb5   : > { %2951 = vmax.xlane.f32.xlu1 %v2949_v11  ;;  %v4975_v12 = vpop.f32.mrf.mxu1 }
 0xeb6   : > { %v2945_v28 = vmul.f32 %v2941_v10, %v5676_v33  ;;  %v3096_v10 = vld [vmem:[#allocation2] sm:$0x8] }
 0xeb7   : > { %v3100_v12 = vsel %vm6468_vm7, %v3096_v10, 0  ;;  %vm6474_vm7 = vcmp.ne.s16.totalorder %v5678_v37, 0 }
 0xeb8   : > { %v2950_v18 = vsel %vm6467_vm3, %v2945_v28, -inf  ;;  %4443 = vst [vmem:[%s5875_s14 + $0x18] sm:$0xff] %v2945_v28  ;;  %vm6471_vm3 = vcmp.ne.s16.totalorder %v5605_v59, 0 }
 0xeb9   : > { %2953 = vmax.xlane.f32.xlu1 %v2950_v18 }
 0xf3e   : > { %v2952_v25 = vpop.xlane.xlu1 %2951 }
 0xf3f   : > { %v2955_v24 = vsub.f32 %v2949_v11, %v2952_v25  ;;  %v5250_v11 = vld [vmem:[#allocation3 + $0x120] sm:$0xff]  }
 0xf41   : > { %v2957_v19 = vmul.f32 1.442695, %v2955_v24 }
 0xf42   : > { %v2954_v26 = vpop.xlane.xlu1 %2953 }
 0xf43   : > { %5281 = vpow2.f32 %v2957_v19  ;;  %v2956_v27 = vsub.f32 %v2950_v18, %v2954_v26  ;;  %v3099_v19 = vld [vmem:[#allocation2 + $0xc] sm:$0x1] }
 0xf45   : > { %v2959_v32 = vmul.f32 1.442695, %v2956_v27 }
 0xf47   : > { %5283 = vpow2.f32 %v2959_v32 }
 0xf50   : > { %v5282_v35 = vpop.eup %5281 }
 0xf51   : > { %2961 = vadd.xlane.f32.xlu1 %v5282_v35 }
 0xf54   : > { %v5284_v52 = vpop.eup %5283 }
 0xf55   : > { %2963 = vadd.xlane.f32.xlu1 %v5284_v52 }
 0xfda   : > { %v2962_v45 = vpop.xlane.xlu1 %2961 }
 0xfdb   : > { %5285 = vrcp.f32 %v2962_v45 }
 0xfde   : > { %v2964_v46 = vpop.xlane.xlu1 %2963 }
 0xfdf   : > { %5287 = vrcp.f32 %v2964_v46 }
 0xfe8   : > { %v5286_v50 = vpop.eup %5285 }
 0xfe9   : > { %v2966_v51 = vmul.f32 %v5286_v50, %v5282_v35  ;;  %v3105_v35 = vsel %vm5613_vm6, %v3099_v19, 0  ;;  %vm6473_vm6 = vsmask.f32 7424 }
 0xfea   : > { %v4481_v44 = vcombine.low %v3105_v35, %v3105_v35  ;;  %v5259_v35 = vld [vmem:[#allocation3 + $0x150] sm:$0xff]  }
 0xfeb   : > { %v2969_v60 = vmul.f32 %v2966_v51, %v5665_v20 }
 0xfec   : > { %v5288_v53 = vpop.eup %5287  ;;  %v3274_v51 = vshll.u32 %v4481_v44, 16 }
 0xfed   : > { %v2968_v54 = vmul.f32 %v5288_v53, %v5284_v52 }
 0xfef   : > { %v2970_v62 = vmul.f32 %v2968_v54, %v5676_v33 }
 0xff1   : > { %v2988_v16 = vpack.c.bf16 %v2970_v62, %v2969_v60  ;;  %v3276_v60 = vrot.slane %v3274_v51, 1 }
 0xff3   : > { %4993 = vmatmul.mubr.bf16.vlgmr.msra.gmra.mxu0 %v2988_v16  ;;  %v5253_v16 = vld [vmem:[%s6411_s7 + $0x68] sm:$0xff]  }
 0xff4   : > { %5032 = vmatprep.mubr.msk.bf16.mxu0 %vm5359_vm0, %v5358_v0 }
0x10b3   : > { %v3079_v4 = vpop.f32.mrf.mxu0 }
0x10b4   : > { %v6170_v1 = vadd.f32 %v4461_v3, %v3079_v4 }
0x10b5   : > { %v4994_v6 = vpop.f32.mrf.mxu0 }
0x10b6   : > { %v4577_v7 = vpack.c.bf16 %v6170_v1, %v6170_v1 }
0x10b7   : > { %v3082_v22 = vpop.f32.mrf.mxu0 }
0x10b8   : > { %3094 = vst.msk [vmem:[#allocation2 + $0x4] sm:$0xf] %vm423_vm1, %v4577_v7  ;;  %v6175_v15 = vadd.f32 %v4461_v3, %v3082_v22 }
0x10b9   : > { %v4995_v17 = vpop.f32.mrf.mxu0 }
0x10ba   : > { %v3086_v34 = vpack.c.bf16 %v6175_v15, %v6170_v1  ;;  %v4578_v9 = vpack.c.bf16 %v6175_v15, %v6175_v15 }
0x10bc   : > { %3095 = vst.msk [vmem:[#allocation2 + $0x8] sm:$0xf] %vm423_vm1, %v4578_v9  ;;  %5001 = vmatmul.mubr.msk.bf16.vlgmr.msra.gmra.mxu1 %vm692_vm13, %v3086_v34 }
0x10bd   : > { %5005 = vmatpush3.bf16.msra.mxu1 %v5249_v8  ;;  %5008 = vmatprep.mubr.msk.bf16.mxu1 %vm5359_vm0, %v5358_v0 }
0x10be   : > { %5006 = vmatprep.subr.bf16.mxu1 %v5358_v0 }
0x10bf   : > { %v3097_v28 = vld [vmem:[#allocation2 + $0x4] sm:$0xf] }
0x10c0   : > { %v3101_v18 = vsel %vm5596_vm2, %v3097_v28, 0  ;;  %v3103_v27 = vsel %vm6470_vm14, %v3097_v28, 0  ;;  %vm6472_vm2 = vsmask.f32 4352  ;;  %vm6476_vm14 = vcmp.ne.s16.totalorder %v5695_v47, 0  ;;  %v5261_v47 = vld [vmem:[%s6411_s7 + $0x78] sm:$0xff]  }
0x10c1   : > { %5007 = vmatpush3.bf16.msra.mxu1 %v5250_v11  ;;  %v4475_v21 = vcombine.low %v3100_v12, %v3101_v18  ;;  %v4486_v11 = vld [vmem:[%s6410_s6 + $0x6] ss:$0 sm:$0xff] }
0x10c2   : > { %5012 = vmatprep.subr.bf16.mxu1 %v5358_v0 }
0x10c3   : > { %v3098_v38 = vld [vmem:[#allocation2 + $0x8] sm:$0xf]  ;;  %v3181_v25 = vshrl.u32 %v4475_v21, 16  ;;  %v3184_v24 = vshll.u32 %v4475_v21, 16 }
0x10c4   : > { %v3102_v26 = vsel %vm6469_vm4, %v3098_v38, 0  ;;  %v3104_v23 = vsel %vm6471_vm3, %v3098_v38, 0  ;;  %vm6475_vm4 = vcmp.ne.s16.totalorder %v5688_v41, 0  ;;  %vm6477_vm3 = vcmp.ne.s16.totalorder %v5703_v49, 0  ;;  %v5262_v49 = vld [vmem:[%s6411_s7 + $0x70] sm:$0xff]  }
0x10c5   : > { %v4476_v32 = vcombine.low %v3102_v26, %v3102_v26  ;;  %v4480_v56 = vcombine.low %v3103_v27, %v3104_v23  ;;  %v3183_v52 = vrot.slane %v3181_v25, 3  ;;  %v3186_v36 = vrot.slane %v3184_v24, 4  ;;  %v5255_v23 = vld [vmem:[#allocation3 + $0x168] sm:$0xff]  }
0x10c6   : > { %5029 = vmatpush3.bf16.msra.mxu0 %v5255_v23 }
0x10c7   : > { %v3189_v43 = vshrl.u32 %v4476_v32, 16  ;;  %v3192_v40 = vshll.u32 %v4476_v32, 16  ;;  %v3269_v55 = vshll.u32 %v4480_v56, 16  ;;  %v3187_v45 = vor.u32 %v3186_v36, %v3183_v52  ;;  %5030 = vmatprep.subr.bf16.mxu0 %v5358_v0  ;;  %v5256_v32 = vld [vmem:[#allocation3 + $0x160] sm:$0xff]   ;;  %v4492_v52 = vld [vmem:[%s6412_s8 + $0x6] ss:$0 sm:$0xff] }
0x10c8   : > { %v3267_v53 = vshrl.u32 %v4480_v56, 16  ;;  %v5257_v56 = vld [vmem:[#allocation3 + $0x158] sm:$0xff]  }
0x10c9   : > { %v3191_v63 = vrot.slane %v3189_v43, 3  ;;  %v3194_v42 = vrot.slane %v3192_v40, 4  ;;  %v3271_v59 = vrot.slane %v3269_v55, 1 }
0x10ca   : > { %5031 = vmatpush3.bf16.msra.mxu0 %v5256_v32 }
0x10cb   : > { %v3195_v46 = vor.u32 %v3194_v42, %v3191_v63  ;;  %v3272_v54 = vor.u32 %v3271_v59, %v3267_v53  ;;  %5044 = vmatprep.subr.bf16.mxu0 %v5358_v0  ;;  %v5258_v59 = vld [vmem:[#allocation3 + $0x178] sm:$0xff]   ;;  %v5260_v53 = vld [vmem:[#allocation3 + $0x170] sm:$0xff]  }
0x10cd   : > { %v3196_v50 = vsel %vm6472_vm2, %v3187_v45, %v3195_v46  ;;  %v3277_v62 = vsel %vm6473_vm6, %v3272_v54, %v3276_v60  ;;  %vm6479_vm2 = vcmask 1046528  }
0x10ce   : > { %5009 = vmatmul.mubr.msk.bf16.vlgmr.msra.gmra.mxu1 %vm692_vm13, %v3196_v50 }
0x10cf   : > { %5013 = vmatpush3.bf16.msra.mxu1 %v5251_v57  ;;  %5016 = vmatprep.mubr.msk.bf16.mxu1 %vm5359_vm0, %v5358_v0 }
0x10d0   : > { %5014 = vmatprep.subr.bf16.mxu1 %v5358_v0 }
0x10d3   : > { %5015 = vmatpush3.bf16.msra.mxu1 %v5252_v5  ;;  %v3437_v5 = vld [vmem:[#allocation2 + $0xc] sm:$0x1] }
0x10d4   : > { %5020 = vmatprep.subr.bf16.mxu1 %v5358_v0  ;;  %v3443_v54 = vsel %vm6474_vm7, %v3437_v5, 0 }
0x10d6   : > { %5017 = vmatmul.mubr.msk.bf16.vlgmr.msra.gmra.mxu1 %vm692_vm13, %v3277_v62 }
0x10d7   : > { %5024 = vmatprep.mubr.msk.bf16.mxu1 %vm5359_vm0, %v5358_v0  ;;  %5021 = vmatpush3.bf16.msra.mxu1 %v5253_v16 }
0x10d8   : > { %5022 = vmatprep.subr.bf16.mxu1 %v5358_v0 }
0x10db   : > { %5023 = vmatpush3.bf16.msra.mxu1 %v5254_v61 }
0x10dc   : > { %5036 = vmatprep.subr.bf16.mxu1 %v5358_v0 }
0x117c   : > { %v3165_v2 = vpop.f32.mrf.mxu1 }
0x117e   : > { %v5002_v3 = vpop.f32.mrf.mxu1 }
0x1180   : > { %v3168_v4 = vpop.f32.mrf.mxu1 }
0x1182   : > { %v5003_v6 = vpop.f32.mrf.mxu1 }
0x118e   : > { %v3246_v7 = vpop.f32.mrf.mxu1 }
0x118f   : > { %v3247_v34 = vadd.f32 %v3246_v7, %v3165_v2  ;;  %v4507_v2 = vcombine.low %v3443_v54, %v3443_v54 }
0x1190   : > { %v5010_v22 = vpop.f32.mrf.mxu1 }
0x1192   : > { %v3249_v17 = vpop.f32.mrf.mxu1 }
0x1193   : > { %v3250_v28 = vadd.f32 %v3249_v17, %v3168_v4  ;;  %v3591_v17 = vrot.slane %v4507_v2, 1 }
0x1194   : > { %v5011_v8 = vpop.f32.mrf.mxu1 }
0x1196   : > { %v3327_v9 = vpop.f32.mrf.mxu1 }
0x1197   : > { %v3334_v10 = vadd.f32 %v3327_v9, %v3247_v34 }
0x1198   : > { %v5018_v12 = vpop.f32.mrf.mxu1 }
0x1199   : > { %v3344_v21 = vadd.f32 %v4486_v11, %v3334_v10 }
0x119a   : > { %v3330_v18 = vpop.f32.mrf.mxu1 }
0x119b   : > { %v3335_v38 = vadd.f32 %v3330_v18, %v3250_v28  ;;  %v3346_v19 = vmax.f32 %v3344_v21, 0.0 }
0x119c   : > { %v5019_v25 = vpop.f32.mrf.mxu1 }
0x119d   : > { %v3345_v24 = vadd.f32 %v4486_v11, %v3335_v38 }
0x119f   : > { %v3347_v26 = vmax.f32 %v3345_v24, 0.0 }
0x11a1   : > { %v3353_v27 = vpack.c.bf16 %v3347_v26, %v3346_v19 }
0x11a3   : > { %5025 = vmatmul.mubr.msk.bf16.vlgmr.msra.gmra.mxu1 %vm692_vm13, %v3353_v27  ;;  %v4512_v27 = vld [vmem:[%s6410_s6 + $0x7] ss:$0 sm:$0xff] }
0x11a4   : > { %5040 = vmatprep.mubr.msk.bf16.mxu1 %vm5359_vm0, %v5358_v0  ;;  %5037 = vmatpush3.bf16.msra.mxu1 %v5257_v56 }
0x11a5   : > { %5038 = vmatprep.subr.bf16.mxu1 %v5358_v0 }
0x11a8   : > { %5039 = vmatpush3.bf16.msra.mxu1 %v5259_v35 }
0x11a9   : > { %5052 = vmatprep.subr.bf16.mxu1 %v5358_v0 }
0x1263   : > { %v3411_v36 = vpop.f32.mrf.mxu1 }
0x1264   : > { %v3412_v43 = vadd.f32 %v4492_v52, %v3411_v36 }
0x1265   : > { %v5026_v40 = vpop.f32.mrf.mxu1 }
0x1266   : > { %v3418_v63 = vadd.f32 %v3412_v43, %v6170_v1 }
0x1267   : > { %v3414_v42 = vpop.f32.mrf.mxu1 }
0x1268   : > { %v6232_v44 = vmul.f32 %v3418_v63, %v5665_v20  ;;  %v3415_v55 = vadd.f32 %v4492_v52, %v3414_v42 }
0x1269   : > { %v5027_v45 = vpop.f32.mrf.mxu1 }
0x126a   : > { %v4579_v46 = vpack.c.bf16 %v6232_v44, %v6232_v44  ;;  %v3419_v57 = vadd.f32 %v3415_v55, %v6175_v15  ;;  %v3432_v15 = vld [vmem:[#allocation2] sm:$0x8]  ;;  %v5263_v45 = vld [vmem:[#allocation3 + $0x198] sm:$0xff]  }
0x126b   : > { %v3438_v62 = vsel %vm5697_vm8, %v3432_v15, 0  ;;  %vm6478_vm8 = vcmask 1044480  }
0x126c   : > { %3430 = vst.msk [vmem:[#allocation2 + $0x4] sm:$0xf] %vm423_vm1, %v4579_v46  ;;  %v6239_v50 = vmul.f32 %v3419_v57, %v5676_v33  ;;  %v5264_v46 = vld [vmem:[#allocation3 + $0x190] sm:$0xff]   ;;  %v5265_v57 = vld [vmem:[#allocation3 + $0x188] sm:$0xff]  }
0x126e   : > { %v3422_v1 = vpack.c.bf16 %v6239_v50, %v6232_v44  ;;  %v4580_v51 = vpack.c.bf16 %v6239_v50, %v6239_v50 }
0x1270   : > { %3431 = vst.msk [vmem:[#allocation2 + $0x8] sm:$0xf] %vm423_vm1, %v4580_v51  ;;  %5033 = vmatmul.mubr.msk.bf16.vlgmr.msra.gmra.mxu0 %vm692_vm13, %v3422_v1  ;;  %v4518_v1 = vld [vmem:[%s6412_s8 + $0x7] ss:$0 sm:$0xff] }
0x1271   : > { %5045 = vmatpush3.bf16.msra.mxu0 %v5258_v59  ;;  %5048 = vmatprep.mubr.msk.bf16.mxu0 %vm5359_vm0, %v5358_v0  ;;  %v5267_v59 = vld [vmem:[#allocation3 + $0x180] sm:$0xff]  }
0x1272   : > { %5046 = vmatprep.subr.bf16.mxu0 %v5358_v0 }
0x1273   : > { %v3433_v60 = vld [vmem:[#allocation2 + $0x4] sm:$0xf] }
0x1274   : > { %v3439_v16 = vsel %vm6475_vm4, %v3433_v60, 0  ;;  %v3435_v61 = vld [vmem:[#allocation2 + $0x4] sm:$0xe] }
0x1275   : > { %5047 = vmatpush3.bf16.msra.mxu0 %v5260_v53  ;;  %v4501_v4 = vcombine.low %v3438_v62, %v3439_v16  ;;  %v3441_v37 = vsel %vm5712_vm12, %v3435_v61, 0  ;;  %vm6480_vm12 = vcmp.ne.s16.totalorder %v5771_v14, 0 }
0x1276   : > { %5060 = vmatprep.subr.bf16.mxu0 %v5358_v0 }
0x1277   : > { %v3434_v3 = vld [vmem:[#allocation2 + $0x8] sm:$0x7]  ;;  %v3518_v8 = vrot.slane %v4501_v4, 3  ;;  %v5266_v4 = vld [vmem:[#allocation3 + $0x1a8] sm:$0xff]  }
0x1278   : > { %v3436_v6 = vld [vmem:[#allocation2 + $0x8] sm:$0xf]  ;;  %v3440_v7 = vsel %vm6476_vm14, %v3434_v3, 0 }
0x1279   : > { %v3442_v48 = vsel %vm6477_vm3, %v3436_v6, 0  ;;  %v4502_v22 = vcombine.low %v3440_v7, %v3440_v7  ;;  %v3752_v7 = vld [vmem:[#allocation2 + $0xc] sm:$0x3] }
0x127a   : > { %v4506_v41 = vcombine.low %v3441_v37, %v3442_v48  ;;  %v5268_v37 = vld [vmem:[#allocation3 + $0x1a0] sm:$0xff]   ;;  %v3758_v48 = vsel %vm6480_vm12, %v3752_v7, 0 }
0x127b   : > { %v3519_v34 = vrot.slane %v4502_v22, 3 }
0x127c   : > { %v3590_v9 = vrot.slane %v4506_v41, 1 }
0x127d   : > { %v3520_v10 = vsel %vm6478_vm8, %v3518_v8, %v3519_v34  ;;  %v4533_v34 = vcombine.low %v3758_v48, %v3758_v48 }
0x127e   : > { %v3592_v11 = vsel %vm6479_vm2, %v3590_v9, %v3591_v17  ;;  %5041 = vmatmul.mubr.msk.bf16.vlgmr.msra.gmra.mxu1 %vm692_vm13, %v3520_v10 }
0x127f   : > { %5049 = vmatmul.mubr.msk.bf16.vlgmr.msra.gmra.mxu0 %vm692_vm13, %v3592_v11  ;;  %5056 = vmatprep.mubr.msk.bf16.mxu1 %vm5359_vm0, %v5358_v0 }
0x1280   : > { %5064 = vmatprep.mubr.msk.bf16.mxu0 %vm5359_vm0, %v5358_v0  ;;  %5053 = vmatpush3.bf16.msra.mxu1 %v5261_v47 }
0x1281   : > { %5054 = vmatprep.subr.bf16.mxu1 %v5358_v0  ;;  %5061 = vmatpush3.bf16.msra.mxu0 %v5263_v45 }
0x1282   : > { %5062 = vmatprep.subr.bf16.mxu0 %v5358_v0 }
0x1284   : > { %5055 = vmatpush3.bf16.msra.mxu1 %v5262_v49 }
0x1285   : > { %5068 = vmatprep.subr.bf16.mxu1 %v5358_v0  ;;  %5063 = vmatpush3.bf16.msra.mxu0 %v5264_v46 }
0x1286   : > { %5076 = vmatprep.subr.bf16.mxu0 %v5358_v0 }
0x1330   : > { %v3503_v58 = vpop.f32.mrf.mxu0 }
0x1332   : > { %v5034_v12 = vpop.f32.mrf.mxu0 }
0x1334   : > { %v3506_v28 = vpop.f32.mrf.mxu0 }
0x1336   : > { %v5035_v18 = vpop.f32.mrf.mxu0 }
0x133e   : > { %v3570_v21 = vpop.f32.mrf.mxu1 }
0x133f   : > { %v3642_v38 = vpop.f32.mrf.mxu0  ;;  %v3571_v25 = vadd.f32 %v3570_v21, %v3503_v58  ;;  %v3906_v58 = vrot.slane %v4533_v34, 2 }
0x1340   : > { %v5042_v24 = vpop.f32.mrf.mxu1 }
0x1341   : > { %v5050_v19 = vpop.f32.mrf.mxu0  ;;  %v3649_v26 = vadd.f32 %v3642_v38, %v3571_v25 }
0x1342   : > { %v3573_v23 = vpop.f32.mrf.mxu1 }
0x1343   : > { %v3645_v32 = vpop.f32.mrf.mxu0  ;;  %v3574_v56 = vadd.f32 %v3573_v23, %v3506_v28  ;;  %v3659_v36 = vadd.f32 %v4512_v27, %v3649_v26 }
0x1344   : > { %v5043_v35 = vpop.f32.mrf.mxu1 }
0x1345   : > { %v5051_v52 = vpop.f32.mrf.mxu0  ;;  %v3650_v43 = vadd.f32 %v3645_v32, %v3574_v56  ;;  %v3661_v63 = vmax.f32 %v3659_v36, 0.0 }
0x1346   : > { %v4538_v52 = vld [vmem:[%s6410_s6 + $0x8] ss:$0 sm:$0xff] }
0x1347   : > { %v3660_v40 = vadd.f32 %v4512_v27, %v3650_v43 }
0x1349   : > { %v3662_v42 = vmax.f32 %v3660_v40, 0.0 }
0x134b   : > { %v3668_v55 = vpack.c.bf16 %v3662_v42, %v3661_v63 }
0x134d   : > { %5057 = vmatmul.mubr.msk.bf16.vlgmr.msra.gmra.mxu1 %vm692_vm13, %v3668_v55 }
0x134e   : > { %5072 = vmatprep.mubr.msk.bf16.mxu1 %vm5359_vm0, %v5358_v0  ;;  %5069 = vmatpush3.bf16.msra.mxu1 %v5265_v57 }
0x134f   : > { %5070 = vmatprep.subr.bf16.mxu1 %v5358_v0 }
0x1352   : > { %5071 = vmatpush3.bf16.msra.mxu1 %v5267_v59 }
0x1353   : > { %5084 = vmatprep.subr.bf16.mxu1 %v5358_v0 }
0x140d   : > { %v3726_v51 = vpop.f32.mrf.mxu1 }
0x140e   : > { %v3727_v5 = vadd.f32 %v4518_v1, %v3726_v51  ;;  %v5271_v51 = vld [vmem:[%s6413_s9 + $0x28] sm:$0xff]  }
0x140f   : > { %v5058_v53 = vpop.f32.mrf.mxu1 }
0x1410   : > { %v3733_v15 = vadd.f32 %v3727_v5, %v6232_v44  ;;  %v5272_v5 = vld [vmem:[%s6413_s9 + $0x20] sm:$0xff]   ;;  %v4544_v53 = vld [vmem:[%s6412_s8 + $0x8] ss:$0 sm:$0xff] }
0x1411   : > { %v3729_v54 = vpop.f32.mrf.mxu1 }
0x1412   : > { %v6294_v60 = vmul.f32 %v3733_v15, %v5665_v20  ;;  %v3730_v62 = vadd.f32 %v4518_v1, %v3729_v54 }
0x1413   : > { %v5059_v16 = vpop.f32.mrf.mxu1 }
0x1414   : > { %v4581_v61 = vpack.c.bf16 %v6294_v60, %v6294_v60  ;;  %v3734_v2 = vadd.f32 %v3730_v62, %v6239_v50  ;;  %v3747_v50 = vld [vmem:[#allocation2] sm:$0xc] }
0x1415   : > { %v3753_v41 = vsel %vm5790_vm11, %v3747_v50, 0 }
0x1416   : > { %3745 = vst.msk [vmem:[#allocation2 + $0x4] sm:$0xf] %vm423_vm1, %v4581_v61  ;;  %v6301_v3 = vmul.f32 %v3734_v2, %v5676_v33 }
0x1418   : > { %v3737_v44 = vpack.c.bf16 %v6301_v3, %v6294_v60  ;;  %v4582_v6 = vpack.c.bf16 %v6301_v3, %v6301_v3 }
0x141a   : > { %3746 = vst.msk [vmem:[#allocation2 + $0x8] sm:$0xf] %vm423_vm1, %v4582_v6  ;;  %5065 = vmatmul.mubr.msk.bf16.vlgmr.msra.gmra.mxu0 %vm692_vm13, %v3737_v44  ;;  %vm6481_vm1 = vcmask 1045504  }
0x141b   : > { %5077 = vmatpush3.bf16.msra.mxu0 %v5266_v4  ;;  %5080 = vmatprep.mubr.msk.bf16.mxu0 %vm5359_vm0, %v5358_v0  ;;  %vm6482_vm11 = vmmov %vm6481_vm1 }
0x141c   : > { %5078 = vmatprep.subr.bf16.mxu0 %v5358_v0 }
0x141d   : > { %v3748_v22 = vld [vmem:[#allocation2 + $0x4] sm:$0xf] }
0x141e   : > { %v3754_v17 = vsel %vm5794_vm15, %v3748_v22, 0  ;;  %v3750_v8 = vld [vmem:[#allocation2 + $0x4] sm:$0xc] }
0x141f   : > { %5079 = vmatpush3.bf16.msra.mxu0 %v5268_v37  ;;  %v4527_v10 = vcombine.low %v3753_v41, %v3754_v17  ;;  %v3756_v14 = vsel %vm1400_vm5, %v3750_v8, 0  ;;  %v4553_v37 = vld [vmem:[%s6414_s10 + $0x2] ss:$0 sm:$0xff] }
0x1420   : > { %5092 = vmatprep.subr.bf16.mxu0 %v5358_v0 }
0x1421   : > { %v3749_v9 = vld [vmem:[#allocation2 + $0x8] sm:$0x3]  ;;  %v3833_v12 = vrot.slane %v4527_v10, 2 }
0x1422   : > { %v3751_v11 = vld [vmem:[#allocation2 + $0x8] sm:$0xf]  ;;  %v3755_v47 = vsel %vm5809_vm9, %v3749_v9, 0 }
0x1423   : > { %v3757_v29 = vsel %vm1401_vm10, %v3751_v11, 0  ;;  %v4528_v49 = vcombine.low %v3755_v47, %v3755_v47 }
0x1424   : > { %v4532_v30 = vcombine.low %v3756_v14, %v3757_v29 }
0x1425   : > { %v3834_v28 = vrot.slane %v4528_v49, 2 }
0x1426   : > { %v3905_v18 = vrot.slane %v4532_v30, 2 }
0x1427   : > { %v3835_v21 = vsel %vm6481_vm1, %v3833_v12, %v3834_v28 }
0x1428   : > { %v3907_v38 = vsel %vm6482_vm11, %v3905_v18, %v3906_v58  ;;  %5073 = vmatmul.mubr.msk.bf16.vlgmr.msra.gmra.mxu1 %vm692_vm13, %v3835_v21 }
0x1429   : > { %5081 = vmatmul.mubr.msk.bf16.vlgmr.msra.gmra.mxu0 %vm692_vm13, %v3907_v38  ;;  %5088 = vmatprep.mubr.msk.bf16.mxu1 %vm5359_vm0, %v5358_v0 }
0x142a   : > { %5096 = vmatprep.mubr.msk.bf16.mxu0 %vm5359_vm0, %v5358_v0  ;;  %5085 = vmatpush3.bf16.msra.mxu1 %v5269_v13 }
0x142b   : > { %5086 = vmatprep.subr.bf16.mxu1 %v5358_v0  ;;  %5093 = vmatpush3.bf16.msra.mxu0 %v5271_v51 }
0x142c   : > { %5094 = vmatprep.subr.bf16.mxu0 %v5358_v0 }
0x142e   : > { %5087 = vmatpush3.bf16.msra.mxu1 %v5270_v31 }
0x142f   : > { %5095 = vmatpush3.bf16.msra.mxu0 %v5272_v5 }
0x14da   : > { %v3818_v39 = vpop.f32.mrf.mxu0 }
0x14dc   : > { %v5066_v25 = vpop.f32.mrf.mxu0 }
0x14de   : > { %v3821_v24 = vpop.f32.mrf.mxu0 }
0x14e0   : > { %v5067_v19 = vpop.f32.mrf.mxu0 }
0x14e8   : > { %v3885_v26 = vpop.f32.mrf.mxu1 }
0x14e9   : > { %v3957_v27 = vpop.f32.mrf.mxu0  ;;  %v3886_v23 = vadd.f32 %v3885_v26, %v3818_v39 }
0x14ea   : > { %v5074_v32 = vpop.f32.mrf.mxu1 }
0x14eb   : > { %v5082_v56 = vpop.f32.mrf.mxu0  ;;  %v3964_v35 = vadd.f32 %v3957_v27, %v3886_v23 }
0x14ec   : > { %v3888_v36 = vpop.f32.mrf.mxu1 }
0x14ed   : > { %v3960_v43 = vpop.f32.mrf.mxu0  ;;  %v3889_v40 = vadd.f32 %v3888_v36, %v3821_v24  ;;  %v3974_v55 = vadd.f32 %v4538_v52, %v3964_v35 }
0x14ee   : > { %v5075_v63 = vpop.f32.mrf.mxu1 }
0x14ef   : > { %v5083_v42 = vpop.f32.mrf.mxu0  ;;  %v3965_v45 = vadd.f32 %v3960_v43, %v3889_v40  ;;  %v3976_v57 = vmax.f32 %v3974_v55, 0.0 }
0x14f1   : > { %v3975_v46 = vadd.f32 %v4538_v52, %v3965_v45 }
0x14f3   : > { %v3977_v59 = vmax.f32 %v3975_v46, 0.0 }
0x14f5   : > { %v3983_v1 = vpack.c.bf16 %v3977_v59, %v3976_v57 }
0x14f7   : > { %5089 = vmatmul.mubr.msk.bf16.vlgmr.msra.gmra.mxu1 %vm692_vm13, %v3983_v1 }
0x15b7   : > { %v4041_v15 = vpop.f32.mrf.mxu1 }
0x15b8   : > { %v4042_v54 = vadd.f32 %v4544_v53, %v4041_v15 }
0x15b9   : > { %v5090_v62 = vpop.f32.mrf.mxu1 }
0x15ba   : > { %v4048_v61 = vadd.f32 %v4042_v54, %v6294_v60 }
0x15bb   : > { %v4044_v16 = vpop.f32.mrf.mxu1 }
0x15bc   : > { %v4045_v2 = vadd.f32 %v4544_v53, %v4044_v16  ;;  %v4050_v44 = vmul.f32 %v4048_v61, %v5665_v20 }
0x15bd   : > { %v5091_v4 = vpop.f32.mrf.mxu1 }
0x15be   : > { %v4049_v0 = vadd.f32 %v4045_v2, %v6301_v3 }
0x15c0   : > { %v4051_v6 = vmul.f32 %v4049_v0, %v5676_v33 }
0x15c2   : > { %v4057_v7 = vpack.c.bf16 %v4051_v6, %v4050_v44 }
0x15c4   : > { %5097 = vmatmul.mubr.msk.bf16.vlgmr.msra.gmra.mxu0 %vm692_vm13, %v4057_v7 }
0x1684   : > { %v4115_v50 = vpop.f32.mrf.mxu0 }
0x1685   : > { %v4116_v48 = vadd.f32 %v4553_v37, %v4115_v50 }
0x1686   : > { %v5098_v60 = vpop.f32.mrf.mxu0 }
0x1687   : > { %v4122_v22 = vmul.f32 %v4116_v48, %v5665_v20 }
0x1688   : > { %v4118_v41 = vpop.f32.mrf.mxu0 }
0x1689   : > { %4557 = vst [vmem:[%s5875_s14 + $0x20] sm:$0xff] %v4122_v22  ;;  %v4119_v3 = vadd.f32 %v4553_v37, %v4118_v41 }
0x168a   : > { %v5099_v17 = vpop.f32.mrf.mxu0 }
0x168b   : > { %v4123_v8 = vmul.f32 %v4119_v3, %v5676_v33 }
0x168d   : > { %4558 = vst [vmem:[%s5875_s14 + $0x28] sm:$0xff] %v4123_v8 }
0x168e   : > { %s4583_s30 = sshll.u32 %s5450_s21, 8  ;;  %s4151_s13 = sshll.u32 %s5875_s14, 4  ;;  %s4152_s13 = int_to_ptr.vmem [resolvable:$true] %s4151_s13 }
0x168f   : > { %s4140_s24 = scalar_lea.hbm %s6415_s11, %s4583_s30  ;;  %s5362_s25 = smov 256  }
0x1690   : > { %5105 = sst [smem:[#allocation8]] (%p5467_p5), %s5362_s25  ;;  %s5363_s22 = smov 512  }
0x1691   : > { %5106 = sst [smem:[#allocation8 + $0x1]] (%p5467_p5), %s5363_s22  ;;  %s5364_s12 = smov 2  }
0x1692   : > { %5107 = sst [smem:[#allocation8 + $0x2]] (%p5467_p5), %s5364_s12  ;;  %s5365_s5 = smov 128  }
0x1693   : > { %5108 = sst [smem:[#allocation8 + $0x3]] (%p5467_p5), %s5365_s5  ;;  %s5366_s21 = smov 8  }
0x1694   : > { %5109 = sst [smem:[#allocation8 + $0x4]] (%p5467_p5), %s5365_s5  ;;  %s5367_s14 = smov 131072  }
0x1695   : > { %5110 = sst [smem:[#allocation8 + $0x5]] (%p5467_p5), %s5366_s21  ;;  %s5368_s30 = smov 0  }
0x1696   : > { %5111 = dma.general (%p5467_p5), %s4152_s13, 768, %s4140_s24, %s4128_s29, %s5367_s14, [#allocation8], %s5368_s30, 0  }
0x1697 PF: > { %p5123_p8 = scmp.ge.s32.totalorder %s5353_s20, 2  ;;  %s4179_s15 = sand.u32 1, %s5341_s17  }
0x1698   : > { %p6483_p9 = scmp.ne.s32.totalorder %s6433_s28, 0  ;;  %s4180_s16 = scalar_lea.sflag [#allocation5], %s4179_s15 }
0x169a   : > { %p5118_p10 = pnand %p5123_p8, %p6483_p9 }
0x169c   : > { %p5119_p11 = pneg %p5118_p10 }
0x169e   : > { %5336 = dma.done.wait (%p5119_p11), %s4180_s16, 768  }
0x169f   : > { %5338 = vsyncadd (%p5119_p11), %s4180_s16, 4294966528  ;;  %p22_p12 = scmp.ge.s32.totalorder %s5454_s23, 4   ;;  %s6484_s17 = smov %s5345_s18 }
0x16a0   : > { %s6485_s18 = smov %s5349_s19  ;;  %s6486_s19 = smov %s5465_s26 }
0x16a1   : > { %s6487_s20 = smov %s5454_s23  ;;  %24 = sbr.rel (!%p22_p12) target bundleno = 6 (0x6), region = 171 }
0x16a6   :  { %4185 = vsyncpa [#allocation4], 1 }
0x16a7   :  { %4187 = vsyncpa [#allocation4 + $0x1], 1 }
0x16a8   :  { %4188 = vsyncpa [#allocation5], 1 }
0x16a9   :  { %4190 = vsyncpa [#allocation5 + $0x1], 1 }

</bundles_post_ra>
